<compile_context>
chip_gen: v7x
topology: tpu7x:2x2x1
jax: 0.10.0
libtpu: 0.0.40
codegen_flags: <defaults>
</compile_context>

<pallas_src>
import functools

import jax
import jax.numpy as jnp
from jax.experimental import pallas as pl
from jax.experimental.pallas import tpu as pltpu

_UNROLL = 8  # rows per unrolled gather/issue chunk (block_b is a multiple of 128)


def ultragcn_vmem_kernel(users_ref, items_ref, user_tab_ref, item_tab_ref, out_ref,
                         u_buf, i_buf):
    # users_ref / items_ref : (B_padded,) int32 in SMEM (scalar prefetch)
    # user_tab_ref/item_tab_ref : full tables, VMEM-resident (constant block index)
    # out_ref               : (1, block_b) float32 VMEM tile (lane-dense output)
    # u_buf / i_buf         : (block_b, D) VMEM scratch (gather destinations)
    block_b = u_buf.shape[0]
    base = pl.program_id(0) * block_b

    # Gather rows with in-VMEM dynamic-row loads; unrolled so index reads and the
    # dynamic loads/stores co-issue.
    @pl.loop(0, block_b // _UNROLL)
    def _gather(c):
        r0 = c * _UNROLL
        for k in range(_UNROLL):
            r = r0 + k
            u_idx = users_ref[base + r]
            i_idx = items_ref[base + r]
            u_buf[r, :] = user_tab_ref[u_idx, :]
            i_buf[r, :] = item_tab_ref[i_idx, :]

    u = u_buf[...].astype(jnp.float32)
    v = i_buf[...].astype(jnp.float32)
    scores = jnp.sum(u * v, axis=-1)                       # (block_b,)
    out_ref[...] = jax.nn.sigmoid(scores).reshape(1, block_b)


def ultragcn_hbm_kernel(users_ref, items_ref, user_tab_hbm, item_tab_hbm, out_ref,
                        u_buf, i_buf, sem):
    # HBM-resident tables; per-row DMA gather into VMEM scratch.
    # sem : DMA semaphores, shape (2,)  [0]=user copies, [1]=item copies
    block_b = u_buf.shape[0]
    base = pl.program_id(0) * block_b

    # Issue all row-gather DMAs up front (unrolled) so the DMA engine pipelines them.
    @pl.loop(0, block_b // _UNROLL)
    def _issue(c):
        r0 = c * _UNROLL
        for k in range(_UNROLL):
            r = r0 + k
            u_idx = users_ref[base + r]
            i_idx = items_ref[base + r]
            pltpu.make_async_copy(user_tab_hbm.at[pl.ds(u_idx, 1), :],
                                  u_buf.at[pl.ds(r, 1), :], sem.at[0]).start()
            pltpu.make_async_copy(item_tab_hbm.at[pl.ds(i_idx, 1), :],
                                  i_buf.at[pl.ds(r, 1), :], sem.at[1]).start()

    # One bulk wait per table: every row copy signals its semaphore with one row's worth
    # of bytes, so a single wait sized (block_b, D) consumes exactly what was signaled.
    # (Wrapper guarantees block_b <= min(user_rows, item_rows) on this path.)
    pltpu.make_async_copy(user_tab_hbm.at[pl.ds(0, block_b), :], u_buf, sem.at[0]).wait()
    pltpu.make_async_copy(item_tab_hbm.at[pl.ds(0, block_b), :], i_buf, sem.at[1]).wait()

    u = u_buf[...].astype(jnp.float32)
    v = i_buf[...].astype(jnp.float32)
    scores = jnp.sum(u * v, axis=-1)                       # (block_b,)
    out_ref[...] = jax.nn.sigmoid(scores).reshape(1, block_b)


def _vmem_capacity_bytes():
    """Per-core VMEM capacity; conservative fallback (v7x = 64 MiB) if unavailable."""
    try:
        return int(pltpu.get_tpu_info().vmem_capacity_bytes)
    except Exception:
        return 64 * 1024 * 1024


@functools.partial(jax.jit, static_argnames=("block_b", "force_hbm_gather"))
def ultragcn_forward(data, user_table, item_table, *, block_b=512,
                     force_hbm_gather=False):
    """data: (B, 2) int; returns sigmoid dot-product scores, shape (B,) float32."""
    B = data.shape[0]
    U, D = user_table.shape
    I, D2 = item_table.shape
    assert D == D2, "user/item embedding dims must match"

    users = data[:, 0].astype(jnp.int32)   # (B,)
    items = data[:, 1].astype(jnp.int32)   # (B,)

    # Tile size: multiple of 128 (lane-dense output), no larger than the 128-padded batch.
    block_b = max(128, min(block_b, pl.cdiv(B, 128) * 128))
    assert block_b % 128 == 0

    # Generation-aware residency decision: tables + scratch must fit the VMEM budget
    # (~48 MiB usable on v7x, ~96 MiB on v5e/v6e).  Tables are counted x2 to stay
    # conservative about pipeline buffering.
    itemsize_u = user_table.dtype.itemsize
    itemsize_i = item_table.dtype.itemsize
    tab_bytes = U * D * itemsize_u + I * D * itemsize_i
    scratch_bytes = block_b * D * (itemsize_u + itemsize_i)
    vmem_needed = 2 * tab_bytes + scratch_bytes + 2 * block_b * 4 + (2 << 20)
    budget = int(0.75 * _vmem_capacity_bytes())
    use_resident = (not force_hbm_gather) and (vmem_needed <= budget)

    if not use_resident:
        # HBM path: the bulk wait references a block_b-row slice of each table, so keep
        # block_b <= min(U, I) (rounded down to a multiple of 128).
        max_rows = (min(U, I) // 128) * 128
        assert max_rows >= 128, "HBM-gather path needs embedding tables with >= 128 rows"
        block_b = min(block_b, max_rows)

    num_blocks = pl.cdiv(B, block_b)
    b_padded = num_blocks * block_b
    if b_padded != B:
        pad = b_padded - B
        users = jnp.pad(users, (0, pad))   # padded lanes gather row 0; sliced off below
        items = jnp.pad(items, (0, pad))

    out_spec = pl.BlockSpec((1, block_b), lambda b, users_s, items_s: (0, b))

    if use_resident:
        grid_spec = pltpu.PrefetchScalarGridSpec(
            num_scalar_prefetch=2,                 # users, items -> SMEM
            grid=(num_blocks,),
            in_specs=[
                # Full-table VMEM blocks; constant block index -> loaded once, resident.
                pl.BlockSpec((U, D), lambda b, us, it: (0, 0)),
                pl.BlockSpec((I, D), lambda b, us, it: (0, 0)),
            ],
            out_specs=out_spec,
            scratch_shapes=[
                pltpu.VMEM((block_b, D), user_table.dtype),
                pltpu.VMEM((block_b, D), item_table.dtype),
            ],
        )
        kernel = ultragcn_vmem_kernel
        vmem_limit = min(budget, max(vmem_needed + (4 << 20), 32 << 20))
    else:
        # TODO(synk): for very large tables, add cross-tile double-buffered prefetch of
        # the next tile's row gathers to hide HBM latency behind compute.
        grid_spec = pltpu.PrefetchScalarGridSpec(
            num_scalar_prefetch=2,
            grid=(num_blocks,),
            in_specs=[
                pl.BlockSpec(memory_space=pl.ANY),     # user table stays in HBM
                pl.BlockSpec(memory_space=pl.ANY),     # item table stays in HBM
            ],
            out_specs=out_spec,
            scratch_shapes=[
                pltpu.VMEM((block_b, D), user_table.dtype),
                pltpu.VMEM((block_b, D), item_table.dtype),
                pltpu.SemaphoreType.DMA((2,)),
            ],
        )
        kernel = ultragcn_hbm_kernel
        scratch_bytes = block_b * D * (itemsize_u + itemsize_i)
        vmem_limit = min(budget, max(scratch_bytes + 2 * block_b * 4 + (4 << 20), 32 << 20))

    out = pl.pallas_call(
        kernel,
        out_shape=jax.ShapeDtypeStruct((1, b_padded), jnp.float32),
        grid_spec=grid_spec,
        compiler_params=pltpu.CompilerParams(
            dimension_semantics=("parallel",),         # batch tiles shard across TCs
            vmem_limit_bytes=int(vmem_limit),
        ),
    )(users, items, user_table, item_table)

    return out[0, :B]


def xavier_normal(key, shape):
    fan_in, fan_out = shape[0], shape[1]
    std = (2.0 / (fan_in + fan_out)) ** 0.5
    return std * jax.random.normal(key, shape, dtype=jnp.float32)


if __name__ == "__main__":
    # Deterministic synthetic setup (no pickle / file loading).
    user_num, item_num, embedding_dim = 384, 512, 128
    batch = 1024                     # 2 tiles of 512 on the resident path (megacore work)

    key = jax.random.PRNGKey(0)
    k_u, k_i, k_users, k_items = jax.random.split(key, 4)

    user_table = xavier_normal(k_u, (user_num, embedding_dim))
    item_table = xavier_normal(k_i, (item_num, embedding_dim))

    users = jax.random.randint(k_users, (batch,), 0, user_num, dtype=jnp.int32)
    items = jax.random.randint(k_items, (batch,), 0, item_num, dtype=jnp.int32)
    data = jnp.stack([users, items], axis=1)  # (B, 2) int32

    # Pure-JAX reference.
    ref = jax.nn.sigmoid(
        jnp.sum(jnp.take(user_table, users, axis=0) *
                jnp.take(item_table, items, axis=0), axis=-1))

    # Main path: tables are tiny -> VMEM-resident gather.
    out = jax.block_until_ready(ultragcn_forward(data, user_table, item_table))
    assert out.shape == (batch,)
    assert jnp.allclose(out, ref, atol=1e-5, rtol=1e-5)

    # Also exercise the HBM-gather fallback (used when tables exceed the VMEM budget).
    out_hbm = jax.block_until_ready(
        ultragcn_forward(data, user_table, item_table, force_hbm_gather=True))
    assert jnp.allclose(out_hbm, ref, atol=1e-5, rtol=1e-5)

    print("KERNEL_OK")
</pallas_src>

<mosaic_0001>
module attributes {stable_mosaic.version = 11 : i64} {
  func.func @ultragcn_vmem_kernel(%arg0: i32, %arg1: memref<1024xi32, #tpu.memory_space<smem>>, %arg2: memref<1024xi32, #tpu.memory_space<smem>>, %arg3: memref<384x128xf32, #tpu.memory_space<vmem>>, %arg4: memref<512x128xf32, #tpu.memory_space<vmem>>, %arg5: memref<1x512xf32, #tpu.memory_space<vmem>>, %arg6: memref<512x128xf32, #tpu.memory_space<vmem>>, %arg7: memref<512x128xf32, #tpu.memory_space<vmem>>) attributes {dimension_semantics = [#tpu.dimension_semantics<parallel>], iteration_bounds = array<i64: 2>, scalar_prefetch = 2 : i64, scratch_operands = 2 : i64, tpu.core_type = #tpu.core_type<tc>, window_params = [{pipeline_mode = #tpu.pipeline_mode<synchronous>, transform_indices = @transform_0, window_bounds = array<i64: 384, 128>}, {pipeline_mode = #tpu.pipeline_mode<synchronous>, transform_indices = @transform_1, window_bounds = array<i64: 512, 128>}, {transform_indices = @transform_2, window_bounds = array<i64: 1, 512>}]} {
    %c512_i32 = arith.constant 512 : i32
    %0 = arith.muli %arg0, %c512_i32 : i32
    %c0_i32 = arith.constant 0 : i32
    %c64_i32 = arith.constant 64 : i32
    %1 = arith.addi %c0_i32, %c64_i32 : i32
    %c1_i32 = arith.constant 1 : i32
    scf.for %arg8 = %c0_i32 to %1 step %c1_i32  : i32 {
      %c1_i32_7 = arith.constant 1 : i32
      %13 = arith.muli %arg8, %c1_i32_7 : i32
      %c0_i32_8 = arith.constant 0 : i32
      %14 = arith.addi %c0_i32_8, %13 : i32
      %c8_i32 = arith.constant 8 : i32
      %15 = arith.muli %14, %c8_i32 : i32
      %c0_i32_9 = arith.constant 0 : i32
      %16 = arith.addi %15, %c0_i32_9 : i32
      %17 = arith.addi %0, %16 : i32
      %18 = arith.index_cast %17 : i32 to index
      %19 = memref.load %arg1[%18] : memref<1024xi32, #tpu.memory_space<smem>>
      %20 = arith.addi %0, %16 : i32
      %21 = arith.index_cast %20 : i32 to index
      %22 = memref.load %arg2[%21] : memref<1024xi32, #tpu.memory_space<smem>>
      %23 = arith.index_cast %19 : i32 to index
      %c0_10 = arith.constant 0 : index
      %24 = vector.load %arg3[%23, %c0_10] : memref<384x128xf32, #tpu.memory_space<vmem>>, vector<1x128xf32>
      %25 = vector.shape_cast %24 : vector<1x128xf32> to vector<128xf32>
      %26 = arith.index_cast %16 : i32 to index
      %c0_11 = arith.constant 0 : index
      %27 = vector.load %arg6[%26, %c0_11] : memref<512x128xf32, #tpu.memory_space<vmem>>, vector<1x128xf32>
      %28 = vector.shape_cast %27 : vector<1x128xf32> to vector<128xf32>
      %29 = vector.shape_cast %25 : vector<128xf32> to vector<1x128xf32>
      tpu.vector_store %arg6[%26, %c0_11], %29 {strides = array<i32>} : memref<512x128xf32, #tpu.memory_space<vmem>>, vector<1x128xf32>,
      %30 = arith.index_cast %22 : i32 to index
      %c0_12 = arith.constant 0 : index
      %31 = vector.load %arg4[%30, %c0_12] : memref<512x128xf32, #tpu.memory_space<vmem>>, vector<1x128xf32>
      %32 = vector.shape_cast %31 : vector<1x128xf32> to vector<128xf32>
      %33 = arith.index_cast %16 : i32 to index
      %c0_13 = arith.constant 0 : index
      %34 = vector.load %arg7[%33, %c0_13] : memref<512x128xf32, #tpu.memory_space<vmem>>, vector<1x128xf32>
      %35 = vector.shape_cast %34 : vector<1x128xf32> to vector<128xf32>
      %36 = vector.shape_cast %32 : vector<128xf32> to vector<1x128xf32>
      tpu.vector_store %arg7[%33, %c0_13], %36 {strides = array<i32>} : memref<512x128xf32, #tpu.memory_space<vmem>>, vector<1x128xf32>,
      %c1_i32_14 = arith.constant 1 : i32
      %37 = arith.addi %15, %c1_i32_14 : i32
      %38 = arith.addi %0, %37 : i32
      %39 = arith.index_cast %38 : i32 to index
      %40 = memref.load %arg1[%39] : memref<1024xi32, #tpu.memory_space<smem>>
      %41 = arith.addi %0, %37 : i32
      %42 = arith.index_cast %41 : i32 to index
      %43 = memref.load %arg2[%42] : memref<1024xi32, #tpu.memory_space<smem>>
      %44 = arith.index_cast %40 : i32 to index
      %c0_15 = arith.constant 0 : index
      %45 = vector.load %arg3[%44, %c0_15] : memref<384x128xf32, #tpu.memory_space<vmem>>, vector<1x128xf32>
      %46 = vector.shape_cast %45 : vector<1x128xf32> to vector<128xf32>
      %47 = arith.index_cast %37 : i32 to index
      %c0_16 = arith.constant 0 : index
      %48 = vector.load %arg6[%47, %c0_16] : memref<512x128xf32, #tpu.memory_space<vmem>>, vector<1x128xf32>
      %49 = vector.shape_cast %48 : vector<1x128xf32> to vector<128xf32>
      %50 = vector.shape_cast %46 : vector<128xf32> to vector<1x128xf32>
      tpu.vector_store %arg6[%47, %c0_16], %50 {strides = array<i32>} : memref<512x128xf32, #tpu.memory_space<vmem>>, vector<1x128xf32>,
      %51 = arith.index_cast %43 : i32 to index
      %c0_17 = arith.constant 0 : index
      %52 = vector.load %arg4[%51, %c0_17] : memref<512x128xf32, #tpu.memory_space<vmem>>, vector<1x128xf32>
      %53 = vector.shape_cast %52 : vector<1x128xf32> to vector<128xf32>
      %54 = arith.index_cast %37 : i32 to index
      %c0_18 = arith.constant 0 : index
      %55 = vector.load %arg7[%54, %c0_18] : memref<512x128xf32, #tpu.memory_space<vmem>>, vector<1x128xf32>
      %56 = vector.shape_cast %55 : vector<1x128xf32> to vector<128xf32>
      %57 = vector.shape_cast %53 : vector<128xf32> to vector<1x128xf32>
      tpu.vector_store %arg7[%54, %c0_18], %57 {strides = array<i32>} : memref<512x128xf32, #tpu.memory_space<vmem>>, vector<1x128xf32>,
      %c2_i32 = arith.constant 2 : i32
      %58 = arith.addi %15, %c2_i32 : i32
      %59 = arith.addi %0, %58 : i32
      %60 = arith.index_cast %59 : i32 to index
      %61 = memref.load %arg1[%60] : memref<1024xi32, #tpu.memory_space<smem>>
      %62 = arith.addi %0, %58 : i32
      %63 = arith.index_cast %62 : i32 to index
      %64 = memref.load %arg2[%63] : memref<1024xi32, #tpu.memory_space<smem>>
      %65 = arith.index_cast %61 : i32 to index
      %c0_19 = arith.constant 0 : index
      %66 = vector.load %arg3[%65, %c0_19] : memref<384x128xf32, #tpu.memory_space<vmem>>, vector<1x128xf32>
      %67 = vector.shape_cast %66 : vector<1x128xf32> to vector<128xf32>
      %68 = arith.index_cast %58 : i32 to index
      %c0_20 = arith.constant 0 : index
      %69 = vector.load %arg6[%68, %c0_20] : memref<512x128xf32, #tpu.memory_space<vmem>>, vector<1x128xf32>
      %70 = vector.shape_cast %69 : vector<1x128xf32> to vector<128xf32>
      %71 = vector.shape_cast %67 : vector<128xf32> to vector<1x128xf32>
      tpu.vector_store %arg6[%68, %c0_20], %71 {strides = array<i32>} : memref<512x128xf32, #tpu.memory_space<vmem>>, vector<1x128xf32>,
      %72 = arith.index_cast %64 : i32 to index
      %c0_21 = arith.constant 0 : index
      %73 = vector.load %arg4[%72, %c0_21] : memref<512x128xf32, #tpu.memory_space<vmem>>, vector<1x128xf32>
      %74 = vector.shape_cast %73 : vector<1x128xf32> to vector<128xf32>
      %75 = arith.index_cast %58 : i32 to index
      %c0_22 = arith.constant 0 : index
      %76 = vector.load %arg7[%75, %c0_22] : memref<512x128xf32, #tpu.memory_space<vmem>>, vector<1x128xf32>
      %77 = vector.shape_cast %76 : vector<1x128xf32> to vector<128xf32>
      %78 = vector.shape_cast %74 : vector<128xf32> to vector<1x128xf32>
      tpu.vector_store %arg7[%75, %c0_22], %78 {strides = array<i32>} : memref<512x128xf32, #tpu.memory_space<vmem>>, vector<1x128xf32>,
      %c3_i32 = arith.constant 3 : i32
      %79 = arith.addi %15, %c3_i32 : i32
      %80 = arith.addi %0, %79 : i32
      %81 = arith.index_cast %80 : i32 to index
      %82 = memref.load %arg1[%81] : memref<1024xi32, #tpu.memory_space<smem>>
      %83 = arith.addi %0, %79 : i32
      %84 = arith.index_cast %83 : i32 to index
      %85 = memref.load %arg2[%84] : memref<1024xi32, #tpu.memory_space<smem>>
      %86 = arith.index_cast %82 : i32 to index
      %c0_23 = arith.constant 0 : index
      %87 = vector.load %arg3[%86, %c0_23] : memref<384x128xf32, #tpu.memory_space<vmem>>, vector<1x128xf32>
      %88 = vector.shape_cast %87 : vector<1x128xf32> to vector<128xf32>
      %89 = arith.index_cast %79 : i32 to index
      %c0_24 = arith.constant 0 : index
      %90 = vector.load %arg6[%89, %c0_24] : memref<512x128xf32, #tpu.memory_space<vmem>>, vector<1x128xf32>
      %91 = vector.shape_cast %90 : vector<1x128xf32> to vector<128xf32>
      %92 = vector.shape_cast %88 : vector<128xf32> to vector<1x128xf32>
      tpu.vector_store %arg6[%89, %c0_24], %92 {strides = array<i32>} : memref<512x128xf32, #tpu.memory_space<vmem>>, vector<1x128xf32>,
      %93 = arith.index_cast %85 : i32 to index
      %c0_25 = arith.constant 0 : index
      %94 = vector.load %arg4[%93, %c0_25] : memref<512x128xf32, #tpu.memory_space<vmem>>, vector<1x128xf32>
      %95 = vector.shape_cast %94 : vector<1x128xf32> to vector<128xf32>
      %96 = arith.index_cast %79 : i32 to index
      %c0_26 = arith.constant 0 : index
      %97 = vector.load %arg7[%96, %c0_26] : memref<512x128xf32, #tpu.memory_space<vmem>>, vector<1x128xf32>
      %98 = vector.shape_cast %97 : vector<1x128xf32> to vector<128xf32>
      %99 = vector.shape_cast %95 : vector<128xf32> to vector<1x128xf32>
      tpu.vector_store %arg7[%96, %c0_26], %99 {strides = array<i32>} : memref<512x128xf32, #tpu.memory_space<vmem>>, vector<1x128xf32>,
      %c4_i32 = arith.constant 4 : i32
      %100 = arith.addi %15, %c4_i32 : i32
      %101 = arith.addi %0, %100 : i32
      %102 = arith.index_cast %101 : i32 to index
      %103 = memref.load %arg1[%102] : memref<1024xi32, #tpu.memory_space<smem>>
      %104 = arith.addi %0, %100 : i32
      %105 = arith.index_cast %104 : i32 to index
      %106 = memref.load %arg2[%105] : memref<1024xi32, #tpu.memory_space<smem>>
      %107 = arith.index_cast %103 : i32 to index
      %c0_27 = arith.constant 0 : index
      %108 = vector.load %arg3[%107, %c0_27] : memref<384x128xf32, #tpu.memory_space<vmem>>, vector<1x128xf32>
      %109 = vector.shape_cast %108 : vector<1x128xf32> to vector<128xf32>
      %110 = arith.index_cast %100 : i32 to index
      %c0_28 = arith.constant 0 : index
      %111 = vector.load %arg6[%110, %c0_28] : memref<512x128xf32, #tpu.memory_space<vmem>>, vector<1x128xf32>
      %112 = vector.shape_cast %111 : vector<1x128xf32> to vector<128xf32>
      %113 = vector.shape_cast %109 : vector<128xf32> to vector<1x128xf32>
      tpu.vector_store %arg6[%110, %c0_28], %113 {strides = array<i32>} : memref<512x128xf32, #tpu.memory_space<vmem>>, vector<1x128xf32>,
      %114 = arith.index_cast %106 : i32 to index
      %c0_29 = arith.constant 0 : index
      %115 = vector.load %arg4[%114, %c0_29] : memref<512x128xf32, #tpu.memory_space<vmem>>, vector<1x128xf32>
      %116 = vector.shape_cast %115 : vector<1x128xf32> to vector<128xf32>
      %117 = arith.index_cast %100 : i32 to index
      %c0_30 = arith.constant 0 : index
      %118 = vector.load %arg7[%117, %c0_30] : memref<512x128xf32, #tpu.memory_space<vmem>>, vector<1x128xf32>
      %119 = vector.shape_cast %118 : vector<1x128xf32> to vector<128xf32>
      %120 = vector.shape_cast %116 : vector<128xf32> to vector<1x128xf32>
      tpu.vector_store %arg7[%117, %c0_30], %120 {strides = array<i32>} : memref<512x128xf32, #tpu.memory_space<vmem>>, vector<1x128xf32>,
      %c5_i32 = arith.constant 5 : i32
      %121 = arith.addi %15, %c5_i32 : i32
      %122 = arith.addi %0, %121 : i32
      %123 = arith.index_cast %122 : i32 to index
      %124 = memref.load %arg1[%123] : memref<1024xi32, #tpu.memory_space<smem>>
      %125 = arith.addi %0, %121 : i32
      %126 = arith.index_cast %125 : i32 to index
      %127 = memref.load %arg2[%126] : memref<1024xi32, #tpu.memory_space<smem>>
      %128 = arith.index_cast %124 : i32 to index
      %c0_31 = arith.constant 0 : index
      %129 = vector.load %arg3[%128, %c0_31] : memref<384x128xf32, #tpu.memory_space<vmem>>, vector<1x128xf32>
      %130 = vector.shape_cast %129 : vector<1x128xf32> to vector<128xf32>
      %131 = arith.index_cast %121 : i32 to index
      %c0_32 = arith.constant 0 : index
      %132 = vector.load %arg6[%131, %c0_32] : memref<512x128xf32, #tpu.memory_space<vmem>>, vector<1x128xf32>
      %133 = vector.shape_cast %132 : vector<1x128xf32> to vector<128xf32>
      %134 = vector.shape_cast %130 : vector<128xf32> to vector<1x128xf32>
      tpu.vector_store %arg6[%131, %c0_32], %134 {strides = array<i32>} : memref<512x128xf32, #tpu.memory_space<vmem>>, vector<1x128xf32>,
      %135 = arith.index_cast %127 : i32 to index
      %c0_33 = arith.constant 0 : index
      %136 = vector.load %arg4[%135, %c0_33] : memref<512x128xf32, #tpu.memory_space<vmem>>, vector<1x128xf32>
      %137 = vector.shape_cast %136 : vector<1x128xf32> to vector<128xf32>
      %138 = arith.index_cast %121 : i32 to index
      %c0_34 = arith.constant 0 : index
      %139 = vector.load %arg7[%138, %c0_34] : memref<512x128xf32, #tpu.memory_space<vmem>>, vector<1x128xf32>
      %140 = vector.shape_cast %139 : vector<1x128xf32> to vector<128xf32>
      %141 = vector.shape_cast %137 : vector<128xf32> to vector<1x128xf32>
      tpu.vector_store %arg7[%138, %c0_34], %141 {strides = array<i32>} : memref<512x128xf32, #tpu.memory_space<vmem>>, vector<1x128xf32>,
      %c6_i32 = arith.constant 6 : i32
      %142 = arith.addi %15, %c6_i32 : i32
      %143 = arith.addi %0, %142 : i32
      %144 = arith.index_cast %143 : i32 to index
      %145 = memref.load %arg1[%144] : memref<1024xi32, #tpu.memory_space<smem>>
      %146 = arith.addi %0, %142 : i32
      %147 = arith.index_cast %146 : i32 to index
      %148 = memref.load %arg2[%147] : memref<1024xi32, #tpu.memory_space<smem>>
      %149 = arith.index_cast %145 : i32 to index
      %c0_35 = arith.constant 0 : index
      %150 = vector.load %arg3[%149, %c0_35] : memref<384x128xf32, #tpu.memory_space<vmem>>, vector<1x128xf32>
      %151 = vector.shape_cast %150 : vector<1x128xf32> to vector<128xf32>
      %152 = arith.index_cast %142 : i32 to index
      %c0_36 = arith.constant 0 : index
      %153 = vector.load %arg6[%152, %c0_36] : memref<512x128xf32, #tpu.memory_space<vmem>>, vector<1x128xf32>
      %154 = vector.shape_cast %153 : vector<1x128xf32> to vector<128xf32>
      %155 = vector.shape_cast %151 : vector<128xf32> to vector<1x128xf32>
      tpu.vector_store %arg6[%152, %c0_36], %155 {strides = array<i32>} : memref<512x128xf32, #tpu.memory_space<vmem>>, vector<1x128xf32>,
      %156 = arith.index_cast %148 : i32 to index
      %c0_37 = arith.constant 0 : index
      %157 = vector.load %arg4[%156, %c0_37] : memref<512x128xf32, #tpu.memory_space<vmem>>, vector<1x128xf32>
      %158 = vector.shape_cast %157 : vector<1x128xf32> to vector<128xf32>
      %159 = arith.index_cast %142 : i32 to index
      %c0_38 = arith.constant 0 : index
      %160 = vector.load %arg7[%159, %c0_38] : memref<512x128xf32, #tpu.memory_space<vmem>>, vector<1x128xf32>
      %161 = vector.shape_cast %160 : vector<1x128xf32> to vector<128xf32>
      %162 = vector.shape_cast %158 : vector<128xf32> to vector<1x128xf32>
      tpu.vector_store %arg7[%159, %c0_38], %162 {strides = array<i32>} : memref<512x128xf32, #tpu.memory_space<vmem>>, vector<1x128xf32>,
      %c7_i32 = arith.constant 7 : i32
      %163 = arith.addi %15, %c7_i32 : i32
      %164 = arith.addi %0, %163 : i32
      %165 = arith.index_cast %164 : i32 to index
      %166 = memref.load %arg1[%165] : memref<1024xi32, #tpu.memory_space<smem>>
      %167 = arith.addi %0, %163 : i32
      %168 = arith.index_cast %167 : i32 to index
      %169 = memref.load %arg2[%168] : memref<1024xi32, #tpu.memory_space<smem>>
      %170 = arith.index_cast %166 : i32 to index
      %c0_39 = arith.constant 0 : index
      %171 = vector.load %arg3[%170, %c0_39] : memref<384x128xf32, #tpu.memory_space<vmem>>, vector<1x128xf32>
      %172 = vector.shape_cast %171 : vector<1x128xf32> to vector<128xf32>
      %173 = arith.index_cast %163 : i32 to index
      %c0_40 = arith.constant 0 : index
      %174 = vector.load %arg6[%173, %c0_40] : memref<512x128xf32, #tpu.memory_space<vmem>>, vector<1x128xf32>
      %175 = vector.shape_cast %174 : vector<1x128xf32> to vector<128xf32>
      %176 = vector.shape_cast %172 : vector<128xf32> to vector<1x128xf32>
      tpu.vector_store %arg6[%173, %c0_40], %176 {strides = array<i32>} : memref<512x128xf32, #tpu.memory_space<vmem>>, vector<1x128xf32>,
      %177 = arith.index_cast %169 : i32 to index
      %c0_41 = arith.constant 0 : index
      %178 = vector.load %arg4[%177, %c0_41] : memref<512x128xf32, #tpu.memory_space<vmem>>, vector<1x128xf32>
      %179 = vector.shape_cast %178 : vector<1x128xf32> to vector<128xf32>
      %180 = arith.index_cast %163 : i32 to index
      %c0_42 = arith.constant 0 : index
      %181 = vector.load %arg7[%180, %c0_42] : memref<512x128xf32, #tpu.memory_space<vmem>>, vector<1x128xf32>
      %182 = vector.shape_cast %181 : vector<1x128xf32> to vector<128xf32>
      %183 = vector.shape_cast %179 : vector<128xf32> to vector<1x128xf32>
      tpu.vector_store %arg7[%180, %c0_42], %183 {strides = array<i32>} : memref<512x128xf32, #tpu.memory_space<vmem>>, vector<1x128xf32>,
    }
    %c64_i32_0 = arith.constant 64 : i32
    %c0 = arith.constant 0 : index
    %c0_1 = arith.constant 0 : index
    %2 = vector.load %arg6[%c0, %c0_1] : memref<512x128xf32, #tpu.memory_space<vmem>>, vector<512x128xf32>
    %c0_2 = arith.constant 0 : index
    %c0_3 = arith.constant 0 : index
    %3 = vector.load %arg7[%c0_2, %c0_3] : memref<512x128xf32, #tpu.memory_space<vmem>>, vector<512x128xf32>
    %4 = arith.mulf %2, %3 : vector<512x128xf32>
    %cst = arith.constant dense<0.000000e+00> : vector<512xf32>
    %5 = vector.multi_reduction <add>, %4, %cst [1] : vector<512x128xf32> to vector<512xf32>
    %6 = arith.negf %5 : vector<512xf32>
    %7 = math.exp %6 : vector<512xf32>
    %cst_4 = arith.constant 1.000000e+00 : f32
    %8 = vector.broadcast %cst_4 : f32 to vector<512xf32>
    %9 = arith.addf %8, %7 : vector<512xf32>
    %10 = arith.divf %8, %9 : vector<512xf32>
    %11 = vector.shape_cast %10 : vector<512xf32> to vector<1x512xf32>
    %c0_5 = arith.constant 0 : index
    %c0_6 = arith.constant 0 : index
    %12 = vector.load %arg5[%c0_5, %c0_6] : memref<1x512xf32, #tpu.memory_space<vmem>>, vector<1x512xf32>
    tpu.vector_store %arg5[%c0_5, %c0_6], %11 {strides = array<i32>} : memref<1x512xf32, #tpu.memory_space<vmem>>, vector<1x512xf32>,
    return
  }
  func.func @transform_0(%arg0: i32, %arg1: memref<1024xi32, #tpu.memory_space<smem>>, %arg2: memref<1024xi32, #tpu.memory_space<smem>>) -> (i32, i32) {
    %c0_i32 = arith.constant 0 : i32
    %c0_i32_0 = arith.constant 0 : i32
    %c0_i32_1 = arith.constant 0 : i32
    return %c0_i32, %c0_i32_0 : i32, i32
  }
  func.func @transform_1(%arg0: i32, %arg1: memref<1024xi32, #tpu.memory_space<smem>>, %arg2: memref<1024xi32, #tpu.memory_space<smem>>) -> (i32, i32) {
    %c0_i32 = arith.constant 0 : i32
    %c0_i32_0 = arith.constant 0 : i32
    %c0_i32_1 = arith.constant 0 : i32
    return %c0_i32, %c0_i32_0 : i32, i32
  }
  func.func @transform_2(%arg0: i32, %arg1: memref<1024xi32, #tpu.memory_space<smem>>, %arg2: memref<1024xi32, #tpu.memory_space<smem>>) -> (i32, i32) {
    %c0_i32 = arith.constant 0 : i32
    %c0_i32_0 = arith.constant 0 : i32
    return %c0_i32, %arg0 : i32, i32
  }
}

</mosaic_0001>

<bundles_post_ra>
// kernel: ultragcn_forward.1
= control target key start
LH: loop header
LB: loop body
LE: loop exit
PB: predicated region body
PF: predicated region fallthrough
CT: control target
= control target key end

     0   :  { %s9668_s0 = inlined_call_operand.vmem [shape: s32[1024], index: 0, kind: input, shape index: {}]   ;;  %s9669_s2 = inlined_call_operand.hbm [shape: f32[384,128], index: 2, kind: input, shape index: {}]   ;;  %s9670_s3 = inlined_call_operand.hbm [shape: f32[512,128], index: 3, kind: input, shape index: {}]   ;;  %s9671_s4 = inlined_call_operand.hbm [shape: f32[1,1024], index: 4, kind: output, shape index: {}]   ;;  %s9672_s1 = inlined_call_operand.vmem [shape: s32[1024], index: 1, kind: input, shape index: {}]  }
   0x1   :  { %9682 = sst [smem:[#allocation22_spill]] %s9669_s2  ;;  %s9_s17 = sshll.u32 %s9668_s0, 4  ;;  %s10_s17 = int_to_ptr.vmem [resolvable:$true] %s9_s17 }
   0x2   :  { %9683 = sst [smem:[#allocation23_spill]] %s9670_s3  ;;  %s13_s20 = sshll.u32 %s9672_s1, 4  ;;  %s14_s20 = int_to_ptr.vmem [resolvable:$true] %s13_s20 }
   0x3   :  { %s7381_s21 = scalar_lea.vmem %s10_s17, 128  ;;  %p7386_p1 = scmp.lt.s32.totalorder %s10_s17, %s10_s17 }
   0x4   :  { %p7382_p0 = scmp.ne.s32.totalorder %s10_s17, %s7381_s21  ;;  %p7387_p2 = scmp.lt.s32.totalorder %s7381_s21, %s7381_s21 }
   0x6   :  { %p7388_p3 = por %p7387_p2, %p7386_p1 }
   0x8   :  { %p7389_p4 = pnand %p7388_p3, %p7382_p0 }
   0xa   :  { %7392 = shalt.err (!%p7389_p4)  }
   0xb   :  { %s7543_s22 = smov [#allocation5]   ;;  %s7393_s23 = scalar_lea.vmem %s14_s20, 128 }
   0xc   :  { %12 = dma.vmem_to_smem %s10_s17, 128, %s7543_s22, [#allocation4] }
   0xd   :  { %p7394_p5 = scmp.ne.s32.totalorder %s14_s20, %s7393_s23  ;;  %p7398_p6 = scmp.lt.s32.totalorder %s14_s20, %s14_s20 }
   0xe   :  { %p7399_p7 = scmp.lt.s32.totalorder %s7393_s23, %s7393_s23 }
  0x10   :  { %p7400_p8 = por %p7399_p7, %p7398_p6 }
  0x12   :  { %p7401_p9 = pnand %p7400_p8, %p7394_p5 }
  0x14   :  { %7404 = shalt.err (!%p7401_p9)  }
  0x15   :  { %s7544_s0 = smov [#allocation6]  }
  0x16   :  { %16 = dma.vmem_to_smem %s14_s20, 128, %s7544_s0, [#allocation4] }
  0x17   :  { %7509 = dma.done.wait [#allocation4], 256 }
  0x18   :  { %7510 = vsyncadd [#allocation4], 4294967040 }
  0x19   :  { %18 = sfence }
  0x1a   :  { %19 = vsyncpa [#allocation8], 0 }
  0x1b   :  { %20 = vsyncpa [#allocation11], 0 }
  0x1c   :  { %21 = vsyncpa [#allocation9], 0 }
  0x1d   :  { %23 = vsyncpa [#allocation9 + $0x1], 0  ;;  %s7583_s1 = smov 0   ;;  %s7585_s24 = smov 0  }
  0x1e   :  { %s7587_s25 = smov 0   ;;  %s7589_s26 = smov 0  }
  0x1f LB: > { %s7604_s27 = sadd.s32 4294967295, %s7537_s26   ;;  %s6941_s28 = sadd.s32 4294967294, %s7537_s26   ;;  %s7537_s26 = sphi %s7589_s26, %s9714_s26   ;;  %s7533_s25 = sphi %s7587_s25, %s9713_s25   ;;  %s7529_s24 = sphi %s7585_s24, %s9712_s24   ;;  %s7525_s1 = sphi %s7583_s1, %s9711_s1  }
  0x20   : > { %s7608_s29 = sadd.s32 1, %s7537_s26   ;;  %s78_s30 = sadd.s32 1, %s7533_s25 }
  0x21   : > { %s75_s5 = ssub.s32 %s7537_s26, %s7608_s29  ;;  %p88_p10 = scmp.ne.s32.totalorder %s7533_s25, %s7529_s24 }
  0x22   : > { %p76_p11 = scmp.eq.s32.totalorder %s75_s5, 0  ;;  %p89_p12 = scmp.eq.s32.totalorder %s7604_s27, 1 }
  0x23   : > { %p94_p13 = scmp.ne.s32.totalorder %s7529_s24, %s7525_s1  ;;  %p95_p0 = scmp.eq.s32.totalorder %s6941_s28, 1 }
  0x24   : > { %s7619_s6 = scalar_select %p76_p11, %s7533_s25, %s78_s30  }
  0x25   : > { %p7621_p1 = por %p89_p12, %p88_p10  ;;  %p7625_p2 = por %p95_p0, %p94_p13 }
  0x26   : > { %9684 = sst [smem:[#allocation17_spill]] %s7619_s6  ;;  %p6942_p3 = scmp.ge.s32.totalorder %s7537_s26, 1 }
  0x27   : > { %s9685_s7 = scalar_select %p7621_p1, 1, 0 }
  0x28   : > { %s9686_s8 = scalar_select %p7625_p2, 1, 0 }
  0x29   : > { %p102_p4 = scmp.lt.s32.totalorder %s7537_s26, 3  ;;  %p9673_p5 = scmp.eq.s32.totalorder %s7604_s27, 0 }
  0x2a   : > { %s7545_s10 = smov [#allocation7]   ;;  %s7546_s13 = smov [#allocation10]  }
  0x2b   : > { %p7632_p6 = pnand %p6942_p3, %p102_p4  ;;  %s114_s11 = sshll.u32 %s7545_s10, 4  ;;  %s115_s11 = int_to_ptr.vmem [resolvable:$true] %s114_s11 }
  0x2c   : > { %s127_s14 = sshll.u32 %s7546_s13, 4  ;;  %s9689_s2 = sld [smem:[#allocation22_spill]]  ;;  %s7644_s14 = int_to_ptr.vmem [resolvable:$true] %s127_s14 }
  0x2d   : > { %s9687_s9 = scalar_select %p7632_p6, 1, 0 }
  0x2e   : > { %p7059_p7 = pneg %p7632_p6 }
  0x30   : > { %p7640_p8 = pnand %p9673_p5, %p7059_p7 }
  0x32   : > { %s7405_s17 = scalar_lea.hbm %s9689_s2, 6144  ;;  %p7407_p10 = pneg %p7640_p8 }
  0x33   : > { %p7406_p9 = scmp.ne.s32.totalorder %s9689_s2, %s7405_s17  ;;  %p7412_p13 = scmp.lt.u32.totalorder %s7405_s17, %s9689_s2 }
  0x35   : > { %p7408_p11 = pnand %p7407_p10, %p7406_p9 }
  0x37   : > { %p7409_p12 = pneg %p7408_p11 }
  0x39   : > { %p7414_p0 = pnand %p7412_p13, %p7409_p12 }
  0x3b   : > { %7417 = shalt.err (!%p7414_p0)
}
  0x3c   : > { %s7418_s22 = scalar_lea.vmem %s115_s11, 6144  ;;  %p7426_p5 = scmp.lt.s32.totalorder %s115_s11, %s115_s11 }
  0x3d   : > { %p7419_p3 = scmp.ne.s32.totalorder %s115_s11, %s7418_s22  ;;  %p7427_p2 = scmp.lt.s32.totalorder %s7418_s22, %s7418_s22 }
  0x3f   : > { %p7421_p4 = pnand %p7419_p3, %p7407_p10  ;;  %p7428_p1 = por %p7427_p2, %p7426_p5 }
  0x41   : > { %p7422_p7 = pneg %p7421_p4 }
  0x43   : > { %p7429_p6 = pnand %p7428_p1, %p7422_p7 }
  0x45   : > { %7432 = shalt.err (!%p7429_p6)
}
  0x46   : > { %s7547_s23 = smov 128   ;;  %s7548_s0 = smov 8  }
  0x47   : > { %7062 = dma.hbm_to_vmem [thread:$0]  (!%p7640_p8), %s9689_s2, 6144, %s115_s11, [#allocation8], %s7547_s23, %s7547_s23, %s7548_s0  }
  0x48   : > { %s9690_s3 = sld [smem:[#allocation23_spill]] }
  0x4e   : > { %s7433_s13 = scalar_lea.hbm %s9690_s3, 8192 }
  0x4f   : > { %p7434_p9 = scmp.ne.s32.totalorder %s9690_s3, %s7433_s13  ;;  %p7440_p5 = scmp.lt.u32.totalorder %s7433_s13, %s9690_s3 }
  0x51   : > { %p7436_p1 = pnand %p7434_p9, %p7407_p10 }
  0x53   : > { %p7437_p2 = pneg %p7436_p1 }
  0x55   : > { %p7442_p6 = pnand %p7440_p5, %p7437_p2 }
  0x57   : > { %7445 = shalt.err (!%p7442_p6)
}
  0x58   : > { %s7446_s11 = scalar_lea.vmem %s7644_s14, 8192  ;;  %p7454_p0 = scmp.lt.s32.totalorder %s7644_s14, %s7644_s14 }
  0x59   : > { %p7447_p11 = scmp.ne.s32.totalorder %s7644_s14, %s7446_s11  ;;  %p7455_p3 = scmp.lt.s32.totalorder %s7446_s11, %s7446_s11 }
  0x5b   : > { %p7449_p12 = pnand %p7447_p11, %p7407_p10  ;;  %p7456_p4 = por %p7455_p3, %p7454_p0 }
  0x5d   : > { %p7450_p13 = pneg %p7449_p12 }
  0x5f   : > { %p7457_p7 = pnand %p7456_p4, %p7450_p13 }
  0x61   : > { %7460 = shalt.err (!%p7457_p7)
}
  0x62   : > { %7065 = dma.hbm_to_vmem [thread:$0]  (!%p7640_p8), %s9690_s3, 8192, %s7644_s14, [#allocation11], %s7547_s23, %s7547_s23, %s7548_s0  }
  0x63   : > { %p9691_p9 = scmp.ne.s32.totalorder %s9687_s9, 0 }
  0x65   : > { %143 = sbr.rel (%p9691_p9) target bundleno = 874 (0x36a), region = 28 }
  0x6c   : > { %p9692_p1 = scmp.eq.s32.totalorder %s7604_s27, 0 }
  0x6e   : > { %7512 = dma.done.wait (%p9692_p1), [#allocation8], 6144   ;;  %p9693_p10 = pmov %p9692_p1 }
  0x6f   : > { %p9694_p2 = pmov %p9692_p1 }
  0x70   : > { %7514 = vsyncadd (%p9693_p10), [#allocation8], 4294961152 }
  0x71   : > { %7516 = dma.done.wait (%p9694_p2), [#allocation11], 8192   ;;  %p9695_p5 = pmov %p9692_p1 }
  0x72   : > { %s9676_s12 = sand.u32 1, %s7529_s24   ;;  %s7705_s14 = sshll.u32 %s7604_s27, 9 }
  0x73   : > { %7518 = vsyncadd (%p9695_p5), [#allocation11], 4294959104  ;;  %s7709_s9 = sshll.u32 %s9676_s12, 2  ;;  %s7712_s22 = smov 0  }
  0x74 LB: >> { %s7718_s23 = sshll.u32 %s7541_s22, 3  ;;  %s171_s22 = sadd.s32 1, %s7541_s22   ;;  %s7541_s22 = sphi %s7712_s22, %s171_s22  }
  0x75   : >> { %s173_s0 = sadd.s32 %s7718_s23, %s7705_s14  ;;  %s184_s5 = sadd.s32 1, %s7718_s23 }
  0x76   : >> { %s174_s28 = sld [smem:[#allocation5 + %s173_s0]]  ;;  %s185_s10 = sadd.s32 %s7705_s14, %s184_s5 }
  0x77   : >> { %s175_s30 = sld [smem:[#allocation6 + %s173_s0]]  ;;  %s196_s13 = sadd.s32 2, %s7718_s23 }
  0x78   : >> { %s186_s15 = sld [smem:[#allocation5 + %s185_s10]]  ;;  %s197_s17 = sadd.s32 %s7705_s14, %s196_s13 }
  0x79   : >> { %s187_s16 = sld [smem:[#allocation6 + %s185_s10]]  ;;  %s208_s18 = sadd.s32 3, %s7718_s23 }
  0x7a   : >> { %s198_s11 = sld [smem:[#allocation5 + %s197_s17]]  ;;  %s209_s21 = sadd.s32 %s7705_s14, %s208_s18 }
  0x7b   : >> { %s199_s19 = sld [smem:[#allocation6 + %s197_s17]]  ;;  %s220_s2 = sadd.s32 4, %s7718_s23 }
  0x7c   : >> { %s176_s20 = scalar_lea.vmem [#allocation7], %s174_s28  ;;  %s7730_s0 = scalar_lea.vmem [#allocation2], %s7718_s23 }
  0x7d   : >> { %v177_v0 = vld [vmem:[%s176_s20] sm:$0x1]  ;;  %s180_s12 = scalar_lea.vmem [#allocation10], %s175_s30  ;;  %s7734_s5 = scalar_lea.vmem [#allocation3], %s7718_s23 }
  0x7e   : >> { %v181_v1 = vld [vmem:[%s180_s12] sm:$0x1]  ;;  %179 = vst [vmem:[%s7730_s0] sm:$0x1] %v177_v0  ;;  %s210_s10 = sld [smem:[#allocation5 + %s209_s21]]  ;;  %s188_s13 = scalar_lea.vmem [#allocation7], %s186_s15 }
  0x7f   : >> { %183 = vst [vmem:[%s7734_s5] sm:$0x1] %v181_v1  ;;  %s211_s28 = sld [smem:[#allocation6 + %s209_s21]]  ;;  %v189_v2 = vld [vmem:[%s188_s13] sm:$0x1]  ;;  %s192_s12 = scalar_lea.vmem [#allocation10], %s187_s16 }
  0x80   : >> { %v193_v3 = vld [vmem:[%s192_s12] sm:$0x1]  ;;  %s221_s30 = sadd.s32 %s7705_s14, %s220_s2  ;;  %s232_s17 = sadd.s32 5, %s7718_s23  ;;  %6952 = vst [vmem:[%s7730_s0 + $0x1] sm:$0x1] %v189_v2 }
  0x81   : >> { %6954 = vst [vmem:[%s7734_s5 + $0x1] sm:$0x1] %v193_v3  ;;  %s200_s18 = scalar_lea.vmem [#allocation7], %s198_s11  ;;  %s204_s20 = scalar_lea.vmem [#allocation10], %s199_s19 }
  0x82   : >> { %v201_v4 = vld [vmem:[%s200_s18] sm:$0x1]  ;;  %s222_s21 = sld [smem:[#allocation5 + %s221_s30]]  ;;  %s233_s15 = sadd.s32 %s7705_s14, %s232_s17 }
  0x83   : >> { %v205_v5 = vld [vmem:[%s204_s20] sm:$0x1]  ;;  %s223_s3 = sld [smem:[#allocation6 + %s221_s30]]  ;;  %6956 = vst [vmem:[%s7730_s0 + $0x2] sm:$0x1] %v201_v4  ;;  %s244_s13 = sadd.s32 6, %s7718_s23 }
  0x84   : >> { %6958 = vst [vmem:[%s7734_s5 + $0x2] sm:$0x1] %v205_v5  ;;  %s212_s16 = scalar_lea.vmem [#allocation7], %s210_s10  ;;  %s234_s11 = sld [smem:[#allocation5 + %s233_s15]] }
  0x85   : >> { %v213_v6 = vld [vmem:[%s212_s16] sm:$0x1]  ;;  %s216_s2 = scalar_lea.vmem [#allocation10], %s211_s28  ;;  %s235_s12 = sld [smem:[#allocation6 + %s233_s15]] }
  0x86   : >> { %v217_v7 = vld [vmem:[%s216_s2] sm:$0x1]  ;;  %6960 = vst [vmem:[%s7730_s0 + $0x3] sm:$0x1] %v213_v6  ;;  %s245_s19 = sadd.s32 %s7705_s14, %s244_s13  ;;  %s256_s18 = sadd.s32 7, %s7718_s23 }
  0x87   : >> { %6962 = vst [vmem:[%s7734_s5 + $0x3] sm:$0x1] %v217_v7  ;;  %s246_s20 = sld [smem:[#allocation5 + %s245_s19]]  ;;  %s257_s10 = sadd.s32 %s7705_s14, %s256_s18 }
  0x88   : >> { %s247_s30 = sld [smem:[#allocation6 + %s245_s19]]  ;;  %s224_s6 = scalar_lea.vmem [#allocation7], %s222_s21 }
  0x89   : >> { %v225_v8 = vld [vmem:[%s224_s6] sm:$0x1]  ;;  %s228_s17 = scalar_lea.vmem [#allocation10], %s223_s3  ;;  %s258_s28 = sld [smem:[#allocation5 + %s257_s10]] }
  0x8a   : >> { %v229_v9 = vld [vmem:[%s228_s17] sm:$0x1]  ;;  %6964 = vst [vmem:[%s7730_s0 + $0x4] sm:$0x1] %v225_v8  ;;  %s259_s16 = sld [smem:[#allocation6 + %s257_s10]]  ;;  %s236_s15 = scalar_lea.vmem [#allocation7], %s234_s11 }
  0x8b   : >> { %6966 = vst [vmem:[%s7734_s5 + $0x4] sm:$0x1] %v229_v9  ;;  %v237_v10 = vld [vmem:[%s236_s15] sm:$0x1]  ;;  %s240_s23 = scalar_lea.vmem [#allocation10], %s235_s12  ;;  %p168_p8 = scmp.ge.s32.totalorder %s171_s22, 64  }
  0x8c   : >> { %v241_v11 = vld [vmem:[%s240_s23] sm:$0x1]  ;;  %6968 = vst [vmem:[%s7730_s0 + $0x5] sm:$0x1] %v237_v10  ;;  %vm6423_vm0 = vcmask (%p168_p8), 130112   ;;  %vm6430_vm1 = vcmask (%p168_p8), 195712  }
  0x8d   : >> { %6970 = vst [vmem:[%s7734_s5 + $0x5] sm:$0x1] %v241_v11  ;;  %s248_s13 = scalar_lea.vmem [#allocation7], %s246_s20  ;;  %170 = sbr.rel (!%p168_p8) target bundleno = 116 (0x74), region = 108  ;;  %vm6437_vm2 = vcmask (%p168_p8), 261312   ;;  %vm6444_vm3 = vcmask (%p168_p8), 326912  }
  0x8e   : >> { %v249_v12 = vld [vmem:[%s248_s13] sm:$0x1]  ;;  %s252_s6 = scalar_lea.vmem [#allocation10], %s247_s30  ;;  %vm6451_vm4 = vcmask (%p168_p8), 392512   ;;  %vm6458_vm5 = vcmask (%p168_p8), 458112   ;;  %vm6465_vm6 = vcmask (%p168_p8), 523712  }
  0x8f   : >> { %v253_v13 = vld [vmem:[%s252_s6] sm:$0x1]  ;;  %6972 = vst [vmem:[%s7730_s0 + $0x6] sm:$0x1] %v249_v12  ;;  %s260_s3 = scalar_lea.vmem [#allocation7], %s258_s28  ;;  %vm6472_vm7 = vcmask (%p168_p8), 589312  }
  0x90   : >> { %6974 = vst [vmem:[%s7734_s5 + $0x6] sm:$0x1] %v253_v13  ;;  %v261_v14 = vld [vmem:[%s260_s3] sm:$0x1]  ;;  %s264_s21 = scalar_lea.vmem [#allocation10], %s259_s16  ;;  %vm6479_vm8 = vcmask (%p168_p8), 654912  }
  0x91   : >> { %v265_v15 = vld [vmem:[%s264_s21] sm:$0x1]  ;;  %6976 = vst [vmem:[%s7730_s0 + $0x7] sm:$0x1] %v261_v14  ;;  %vm6486_vm9 = vcmask (%p168_p8), 720512   ;;  %vm6493_vm10 = vcmask (%p168_p8), 786112  }
  0x92   : >> { %6978 = vst [vmem:[%s7734_s5 + $0x7] sm:$0x1] %v265_v15  ;;  %vm6500_vm11 = vcmask (%p168_p8), 851712   ;;  %vm6507_vm12 = vcmask (%p168_p8), 917312   ;;  %vm6514_vm13 = vcmask (%p168_p8), 982912   ;;  %vm6521_vm14 = vcmask (%p168_p8), 1048512  }
  0x93   : > { %s7048_s14 = sshll.u32 (%p168_p8), %s7604_s27, 6  ;;  %s9704_s22 = scalar_lea.vmem (%p168_p8), [#allocation12], %s7709_s9 }
  0x94   : > { %s6805_s0 = sshll.u32 %s9704_s22, 4  ;;  %s9622_s11 = scalar_lea.hbm %s9671_s4, %s7048_s14  ;;  %s9624_s0 = int_to_ptr.vmem [resolvable:$true] %s6805_s0 }
  0x95   : > { %s9706_s12 = smov %s9704_s22  ;;  %s9707_s27 = sand.u32 1, %s7529_s24  }
  0x96   : > { %s6791_s19 = scalar_lea.sflag [#allocation9], %s9707_s27  ;;  %s7461_s18 = scalar_lea.vmem %s9624_s0, 64 }
  0x97   : > { %p7462_p6 = scmp.ne.s32.totalorder %s9624_s0, %s7461_s18  ;;  %p9708_p11 = scmp.ne.s32.totalorder %s9685_s7, 0 }
  0x98   : > { %v270_v16 = vld [vmem:[#allocation2 + $0x10] sm:$0xff]  ;;  %v268_v18 = vld [vmem:[#allocation2] sm:$0xff]  ;;  %v271_v21 = vld [vmem:[#allocation2 + $0x18] sm:$0xff]  ;;  %s7551_s20 = smov [#allocation12]  }
  0x99   : > { %v334_v17 = vld [vmem:[#allocation3 + $0x10] sm:$0xff]  ;;  %v332_v20 = vld [vmem:[#allocation3] sm:$0xff]  ;;  %v335_v22 = vld [vmem:[#allocation3 + $0x18] sm:$0xff]  ;;  %p7463_p12 = pnand %p7462_p6, %p9708_p11  ;;  %s7465_s30 = sshll.u32 %s7551_s20, 4  ;;  %s7466_s30 = int_to_ptr.vmem [resolvable:$false] %s7465_s30 }
  0x9a   : > { %v398_v19 = vmul.f32 %v334_v17, %v270_v16  ;;  %v396_v23 = vmul.f32 %v332_v20, %v268_v18  ;;  %v269_v24 = vld [vmem:[#allocation2 + $0x8] sm:$0xff]  ;;  %v399_v26 = vmul.f32 %v335_v22, %v271_v21  ;;  %v272_v30 = vld [vmem:[#allocation2 + $0x20] sm:$0xff]  ;;  %v275_v34 = vld [vmem:[#allocation2 + $0x38] sm:$0xff]  ;;  %s7467_s17 = scalar_lea.vmem %s7466_s30, 128  ;;  %p7468_p0 = scmp.lt.s32.totalorder %s9624_s0, %s7466_s30 }
  0x9b   : > { %v333_v25 = vld [vmem:[#allocation3 + $0x8] sm:$0xff]  ;;  %v336_v31 = vld [vmem:[#allocation3 + $0x20] sm:$0xff]  ;;  %v339_v35 = vld [vmem:[#allocation3 + $0x38] sm:$0xff]  ;;  %p7464_p13 = pneg %p7463_p12  ;;  %p7469_p3 = scmp.lt.s32.totalorder %s7467_s17, %s7461_s18 }
  0x9c   : > { %464 = vadd.xlane.f32.xlu1 %v398_v19  ;;  %460 = vadd.xlane.f32.xlu0 %v396_v23  ;;  %v397_v27 = vmul.f32 %v333_v25, %v269_v24  ;;  %v273_v28 = vld [vmem:[#allocation2 + $0x28] sm:$0xff]  ;;  %v400_v33 = vmul.f32 %v336_v31, %v272_v30  ;;  %v274_v36 = vld [vmem:[#allocation2 + $0x30] sm:$0xff]  ;;  %v403_v38 = vmul.f32 %v339_v35, %v275_v34  ;;  %v276_v42 = vld [vmem:[#allocation2 + $0x40] sm:$0xff] }
  0x9d   : > { %v337_v29 = vld [vmem:[#allocation3 + $0x28] sm:$0xff]  ;;  %v338_v37 = vld [vmem:[#allocation3 + $0x30] sm:$0xff]  ;;  %v340_v43 = vld [vmem:[#allocation3 + $0x40] sm:$0xff]  ;;  %p7470_p4 = por %p7469_p3, %p7468_p0 }
  0x9e   : > { %v401_v32 = vmul.f32 %v337_v29, %v273_v28  ;;  %v402_v39 = vmul.f32 %v338_v37, %v274_v36  ;;  %v277_v40 = vld [vmem:[#allocation2 + $0x48] sm:$0xff]  ;;  %v404_v45 = vmul.f32 %v340_v43, %v276_v42  ;;  %v279_v46 = vld [vmem:[#allocation2 + $0x58] sm:$0xff]  ;;  %v278_v48 = vld [vmem:[#allocation2 + $0x50] sm:$0xff] }
  0x9f   : > { %v341_v41 = vld [vmem:[#allocation3 + $0x48] sm:$0xff]  ;;  %v343_v47 = vld [vmem:[#allocation3 + $0x58] sm:$0xff]  ;;  %v342_v49 = vld [vmem:[#allocation3 + $0x50] sm:$0xff]  ;;  %p7471_p7 = pnand %p7470_p4, %p7464_p13 }
  0xa0   : > { %466 = vadd.xlane.f32.xlu1 %v399_v26  ;;  %462 = vadd.xlane.f32.xlu0 %v397_v27  ;;  %v405_v44 = vmul.f32 %v341_v41, %v277_v40  ;;  %v407_v50 = vmul.f32 %v343_v47, %v279_v46  ;;  %v406_v51 = vmul.f32 %v342_v49, %v278_v48  ;;  %v281_v52 = vld [vmem:[#allocation2 + $0x68] sm:$0xff]  ;;  %v280_v54 = vld [vmem:[#allocation2 + $0x60] sm:$0xff]  ;;  %v283_v58 = vld [vmem:[#allocation2 + $0x78] sm:$0xff] }
  0xa1   : > { %v345_v53 = vld [vmem:[#allocation3 + $0x68] sm:$0xff]  ;;  %v344_v55 = vld [vmem:[#allocation3 + $0x60] sm:$0xff]  ;;  %v347_v59 = vld [vmem:[#allocation3 + $0x78] sm:$0xff] }
  0xa2   : > { %v409_v56 = vmul.f32 %v345_v53, %v281_v52  ;;  %v408_v57 = vmul.f32 %v344_v55, %v280_v54  ;;  %v282_v60 = vld [vmem:[#allocation2 + $0x70] sm:$0xff]  ;;  %v411_v62 = vmul.f32 %v347_v59, %v283_v58  ;;  %v285_v0 = vld [vmem:[#allocation2 + $0x88] sm:$0xff]  ;;  %v284_v2 = vld [vmem:[#allocation2 + $0x80] sm:$0xff] }
  0xa3   : > { %v346_v61 = vld [vmem:[#allocation3 + $0x70] sm:$0xff]  ;;  %v349_v1 = vld [vmem:[#allocation3 + $0x88] sm:$0xff]  ;;  %v348_v3 = vld [vmem:[#allocation3 + $0x80] sm:$0xff] }
  0xa4   : > { %470 = vadd.xlane.f32.xlu1 %v401_v32  ;;  %468 = vadd.xlane.f32.xlu0 %v400_v33  ;;  %v410_v63 = vmul.f32 %v346_v61, %v282_v60  ;;  %v413_v4 = vmul.f32 %v349_v1, %v285_v0  ;;  %v412_v5 = vmul.f32 %v348_v3, %v284_v2  ;;  %v287_v6 = vld [vmem:[#allocation2 + $0x98] sm:$0xff]  ;;  %v286_v8 = vld [vmem:[#allocation2 + $0x90] sm:$0xff]  ;;  %v289_v12 = vld [vmem:[#allocation2 + $0xa8] sm:$0xff] }
  0xa5   : > { %v351_v7 = vld [vmem:[#allocation3 + $0x98] sm:$0xff]  ;;  %v350_v9 = vld [vmem:[#allocation3 + $0x90] sm:$0xff]  ;;  %v353_v13 = vld [vmem:[#allocation3 + $0xa8] sm:$0xff] }
  0xa6   : > { %v415_v10 = vmul.f32 %v351_v7, %v287_v6  ;;  %v414_v11 = vmul.f32 %v350_v9, %v286_v8  ;;  %v288_v14 = vld [vmem:[#allocation2 + $0xa0] sm:$0xff]  ;;  %v417_v16 = vmul.f32 %v353_v13, %v289_v12  ;;  %v291_v18 = vld [vmem:[#allocation2 + $0xb8] sm:$0xff]  ;;  %v290_v20 = vld [vmem:[#allocation2 + $0xb0] sm:$0xff] }
  0xa7   : > { %v352_v15 = vld [vmem:[#allocation3 + $0xa0] sm:$0xff]  ;;  %v355_v19 = vld [vmem:[#allocation3 + $0xb8] sm:$0xff]  ;;  %v354_v21 = vld [vmem:[#allocation3 + $0xb0] sm:$0xff] }
  0xa8   : > { %474 = vadd.xlane.f32.xlu1 %v403_v38  ;;  %472 = vadd.xlane.f32.xlu0 %v402_v39  ;;  %v416_v17 = vmul.f32 %v352_v15, %v288_v14  ;;  %v419_v22 = vmul.f32 %v355_v19, %v291_v18  ;;  %v418_v23 = vmul.f32 %v354_v21, %v290_v20  ;;  %v293_v24 = vld [vmem:[#allocation2 + $0xc8] sm:$0xff]  ;;  %v292_v26 = vld [vmem:[#allocation2 + $0xc0] sm:$0xff]  ;;  %v295_v30 = vld [vmem:[#allocation2 + $0xd8] sm:$0xff] }
  0xa9   : > { %v357_v25 = vld [vmem:[#allocation3 + $0xc8] sm:$0xff]  ;;  %v356_v27 = vld [vmem:[#allocation3 + $0xc0] sm:$0xff]  ;;  %v359_v31 = vld [vmem:[#allocation3 + $0xd8] sm:$0xff] }
  0xaa   : > { %v421_v28 = vmul.f32 %v357_v25, %v293_v24  ;;  %v420_v29 = vmul.f32 %v356_v27, %v292_v26  ;;  %v294_v32 = vld [vmem:[#allocation2 + $0xd0] sm:$0xff]  ;;  %v423_v34 = vmul.f32 %v359_v31, %v295_v30  ;;  %v297_v36 = vld [vmem:[#allocation2 + $0xe8] sm:$0xff]  ;;  %v296_v38 = vld [vmem:[#allocation2 + $0xe0] sm:$0xff] }
  0xab   : > { %v358_v33 = vld [vmem:[#allocation3 + $0xd0] sm:$0xff]  ;;  %v361_v37 = vld [vmem:[#allocation3 + $0xe8] sm:$0xff]  ;;  %v360_v39 = vld [vmem:[#allocation3 + $0xe0] sm:$0xff] }
  0xac   : > { %478 = vadd.xlane.f32.xlu1 %v405_v44  ;;  %476 = vadd.xlane.f32.xlu0 %v404_v45  ;;  %v422_v35 = vmul.f32 %v358_v33, %v294_v32  ;;  %v425_v40 = vmul.f32 %v361_v37, %v297_v36  ;;  %v424_v41 = vmul.f32 %v360_v39, %v296_v38  ;;  %v299_v42 = vld [vmem:[#allocation2 + $0xf8] sm:$0xff]  ;;  %v7549_v44 = vmov 0   ;;  %v298_v45 = vld [vmem:[#allocation2 + $0xf0] sm:$0xff]  ;;  %v301_v49 = vld [vmem:[#allocation2 + $0x108] sm:$0xff] }
  0xad   : > { %v363_v43 = vld [vmem:[#allocation3 + $0xf8] sm:$0xff]  ;;  %7124 = vset.pattern.permute.xlu1 %v7549_v44  ;;  %v362_v46 = vld [vmem:[#allocation3 + $0xf0] sm:$0xff]  ;;  %7123 = vset.pattern.permute.xlu0 %v7549_v44  ;;  %v364_v52 = vld [vmem:[#allocation3 + $0x100] sm:$0xff] }
  0xae   : > { %v427_v47 = vmul.f32 %v363_v43, %v299_v42  ;;  %v426_v48 = vmul.f32 %v362_v46, %v298_v45  ;;  %v303_v55 = vld [vmem:[#allocation2 + $0x118] sm:$0xff]  ;;  %v366_v58 = vld [vmem:[#allocation3 + $0x110] sm:$0xff]  ;;  %v305_v61 = vld [vmem:[#allocation2 + $0x128] sm:$0xff] }
  0xaf   : > { %v368_v0 = vld [vmem:[#allocation3 + $0x120] sm:$0xff]  ;;  %v307_v3 = vld [vmem:[#allocation2 + $0x138] sm:$0xff]  ;;  %v370_v6 = vld [vmem:[#allocation3 + $0x130] sm:$0xff] }
  0xb0   : > { %482 = vadd.xlane.f32.xlu1 %v407_v50  ;;  %480 = vadd.xlane.f32.xlu0 %v406_v51  ;;  %v365_v50 = vld [vmem:[#allocation3 + $0x108] sm:$0xff]  ;;  %v300_v51 = vld [vmem:[#allocation2 + $0x100] sm:$0xff]  ;;  %v311_v15 = vld [vmem:[#allocation2 + $0x158] sm:$0xff] }
  0xb1   : > { %v429_v53 = vmul.f32 %v365_v50, %v301_v49  ;;  %v428_v54 = vmul.f32 %v364_v52, %v300_v51  ;;  %v309_v9 = vld [vmem:[#allocation2 + $0x148] sm:$0xff]  ;;  %v372_v12 = vld [vmem:[#allocation3 + $0x140] sm:$0xff]  ;;  %v374_v18 = vld [vmem:[#allocation3 + $0x150] sm:$0xff] }
  0xb2   : > { %v313_v21 = vld [vmem:[#allocation2 + $0x168] sm:$0xff]  ;;  %v376_v24 = vld [vmem:[#allocation3 + $0x160] sm:$0xff]  ;;  %v315_v27 = vld [vmem:[#allocation2 + $0x178] sm:$0xff] }
  0xb3   : > { %v378_v30 = vld [vmem:[#allocation3 + $0x170] sm:$0xff]  ;;  %v317_v33 = vld [vmem:[#allocation2 + $0x188] sm:$0xff]  ;;  %v380_v36 = vld [vmem:[#allocation3 + $0x180] sm:$0xff] }
  0xb4   : > { %486 = vadd.xlane.f32.xlu1 %v409_v56  ;;  %484 = vadd.xlane.f32.xlu0 %v408_v57  ;;  %v367_v56 = vld [vmem:[#allocation3 + $0x118] sm:$0xff]  ;;  %v302_v57 = vld [vmem:[#allocation2 + $0x110] sm:$0xff]  ;;  %v321_v45 = vld [vmem:[#allocation2 + $0x1a8] sm:$0xff] }
  0xb5   : > { %v431_v59 = vmul.f32 %v367_v56, %v303_v55  ;;  %v430_v60 = vmul.f32 %v366_v58, %v302_v57  ;;  %v319_v39 = vld [vmem:[#allocation2 + $0x198] sm:$0xff]  ;;  %v382_v42 = vld [vmem:[#allocation3 + $0x190] sm:$0xff]  ;;  %v385_v46 = vld [vmem:[#allocation3 + $0x1a8] sm:$0xff] }
  0xb6   : > { %v449_v49 = vmul.f32 %v385_v46, %v321_v45  ;;  %v323_v51 = vld [vmem:[#allocation2 + $0x1b8] sm:$0xff]  ;;  %v325_v57 = vld [vmem:[#allocation2 + $0x1c8] sm:$0xff]  ;;  %v7550_v46 = vmov 1966171168  }
  0xb7   : > { %v387_v52 = vld [vmem:[#allocation3 + $0x1b8] sm:$0xff]  ;;  %v389_v58 = vld [vmem:[#allocation3 + $0x1c8] sm:$0xff] }
  0xb8   : > { %490 = vadd.xlane.f32.xlu1 %v411_v62  ;;  %488 = vadd.xlane.f32.xlu0 %v410_v63  ;;  %v369_v62 = vld [vmem:[#allocation3 + $0x128] sm:$0xff]  ;;  %v304_v63 = vld [vmem:[#allocation2 + $0x120] sm:$0xff]  ;;  %v451_v55 = vmul.f32 %v387_v52, %v323_v51 }
  0xb9   : > { %v433_v1 = vmul.f32 %v369_v62, %v305_v61  ;;  %v432_v2 = vmul.f32 %v368_v0, %v304_v63  ;;  %v453_v61 = vmul.f32 %v389_v58, %v325_v57  ;;  %v327_v63 = vld [vmem:[#allocation2 + $0x1d8] sm:$0xff] }
  0xba   : > { %v391_v0 = vld [vmem:[#allocation3 + $0x1d8] sm:$0xff] }
  0xbc   : > { %494 = vadd.xlane.f32.xlu1 %v413_v4  ;;  %492 = vadd.xlane.f32.xlu0 %v412_v5  ;;  %v371_v4 = vld [vmem:[#allocation3 + $0x138] sm:$0xff]  ;;  %v306_v5 = vld [vmem:[#allocation2 + $0x130] sm:$0xff] }
  0xbd   : > { %v435_v7 = vmul.f32 %v371_v4, %v307_v3  ;;  %v434_v8 = vmul.f32 %v370_v6, %v306_v5  ;;  %v455_v3 = vmul.f32 %v391_v0, %v327_v63  ;;  %v329_v5 = vld [vmem:[#allocation2 + $0x1e8] sm:$0xff] }
  0xbe   : > { %v393_v6 = vld [vmem:[#allocation3 + $0x1e8] sm:$0xff] }
  0xc0   : > { %498 = vadd.xlane.f32.xlu1 %v415_v10  ;;  %496 = vadd.xlane.f32.xlu0 %v414_v11  ;;  %v373_v10 = vld [vmem:[#allocation3 + $0x148] sm:$0xff]  ;;  %v308_v11 = vld [vmem:[#allocation2 + $0x140] sm:$0xff] }
  0xc1   : > { %v437_v13 = vmul.f32 %v373_v10, %v309_v9  ;;  %v436_v14 = vmul.f32 %v372_v12, %v308_v11  ;;  %v457_v9 = vmul.f32 %v393_v6, %v329_v5  ;;  %v331_v11 = vld [vmem:[#allocation2 + $0x1f8] sm:$0xff] }
  0xc2   : > { %v395_v12 = vld [vmem:[#allocation3 + $0x1f8] sm:$0xff] }
  0xc4   : > { %502 = vadd.xlane.f32.xlu1 %v417_v16  ;;  %500 = vadd.xlane.f32.xlu0 %v416_v17  ;;  %v375_v16 = vld [vmem:[#allocation3 + $0x158] sm:$0xff]  ;;  %v310_v17 = vld [vmem:[#allocation2 + $0x150] sm:$0xff] }
  0xc5   : > { %v439_v19 = vmul.f32 %v375_v16, %v311_v15  ;;  %v438_v20 = vmul.f32 %v374_v18, %v310_v17  ;;  %v459_v15 = vmul.f32 %v395_v12, %v331_v11 }
  0xc8   : > { %506 = vadd.xlane.f32.xlu1 %v419_v22  ;;  %504 = vadd.xlane.f32.xlu0 %v418_v23  ;;  %v377_v22 = vld [vmem:[#allocation3 + $0x168] sm:$0xff]  ;;  %v312_v23 = vld [vmem:[#allocation2 + $0x160] sm:$0xff] }
  0xc9   : > { %v441_v25 = vmul.f32 %v377_v22, %v313_v21  ;;  %v440_v26 = vmul.f32 %v376_v24, %v312_v23 }
  0xcc   : > { %510 = vadd.xlane.f32.xlu1 %v421_v28  ;;  %508 = vadd.xlane.f32.xlu0 %v420_v29  ;;  %v379_v28 = vld [vmem:[#allocation3 + $0x178] sm:$0xff]  ;;  %v314_v29 = vld [vmem:[#allocation2 + $0x170] sm:$0xff] }
  0xcd   : > { %v443_v31 = vmul.f32 %v379_v28, %v315_v27  ;;  %v442_v32 = vmul.f32 %v378_v30, %v314_v29 }
  0xd0   : > { %514 = vadd.xlane.f32.xlu1 %v423_v34  ;;  %512 = vadd.xlane.f32.xlu0 %v422_v35  ;;  %v381_v34 = vld [vmem:[#allocation3 + $0x188] sm:$0xff]  ;;  %v316_v35 = vld [vmem:[#allocation2 + $0x180] sm:$0xff] }
  0xd1   : > { %v445_v37 = vmul.f32 %v381_v34, %v317_v33  ;;  %v444_v38 = vmul.f32 %v380_v36, %v316_v35  ;;  %v9677_v33 = vlaneseq }
  0xd4   : > { %518 = vadd.xlane.f32.xlu1 %v425_v40  ;;  %516 = vadd.xlane.f32.xlu0 %v424_v41  ;;  %v383_v40 = vld [vmem:[#allocation3 + $0x198] sm:$0xff]  ;;  %v318_v41 = vld [vmem:[#allocation2 + $0x190] sm:$0xff] }
  0xd5   : > { %v447_v43 = vmul.f32 %v383_v40, %v319_v39  ;;  %v446_v44 = vmul.f32 %v382_v42, %v318_v41  ;;  %v7762_v42 = vshrl.u32 %v9677_v33, 7 }
  0xd7   : > { %v7777_v63 = vsub.s32 4, %v7762_v42  ;;  %v7780_v0 = vsub.s32 5, %v7762_v42  ;;  %v7786_v5 = vsub.s32 7, %v7762_v42 }
  0xd8   : > { %522 = vadd.xlane.f32.xlu1 %v427_v47  ;;  %520 = vadd.xlane.f32.xlu0 %v426_v48  ;;  %v320_v47 = vld [vmem:[#allocation2 + $0x1a0] sm:$0xff] }
  0xd9   : > { %v384_v48 = vld [vmem:[#allocation3 + $0x1a0] sm:$0xff] }
  0xda   : > { %v448_v50 = vmul.f32 %v384_v48, %v320_v47  ;;  %v3089_v47 = vunpack.c.l.s4 %v7550_v46 }
  0xdc   : > { %526 = vadd.xlane.f32.xlu1 %v429_v53  ;;  %524 = vadd.xlane.f32.xlu0 %v428_v54  ;;  %v322_v53 = vld [vmem:[#allocation2 + $0x1b0] sm:$0xff]  ;;  %v3090_v57 = vunpack.c.0.s8 %v3089_v47 }
  0xdd   : > { %v386_v54 = vld [vmem:[#allocation3 + $0x1b0] sm:$0xff] }
  0xde   : > { %v450_v56 = vmul.f32 %v386_v54, %v322_v53  ;;  %v7765_v53 = vsub.s32 0, %v7762_v42 }
  0xe0   : > { %530 = vadd.xlane.f32.xlu1 %v431_v59  ;;  %528 = vadd.xlane.f32.xlu0 %v430_v60  ;;  %v324_v59 = vld [vmem:[#allocation2 + $0x1c0] sm:$0xff] }
  0xe1   : > { %v388_v60 = vld [vmem:[#allocation3 + $0x1c0] sm:$0xff] }
  0xe2   : > { %v452_v62 = vmul.f32 %v388_v60, %v324_v59  ;;  %v7768_v59 = vsub.s32 1, %v7762_v42  ;;  %v7771_v60 = vsub.s32 2, %v7762_v42 }
  0xe4   : > { %534 = vadd.xlane.f32.xlu1 %v433_v1  ;;  %532 = vadd.xlane.f32.xlu0 %v432_v2  ;;  %v326_v1 = vld [vmem:[#allocation2 + $0x1d0] sm:$0xff] }
  0xe5   : > { %v390_v2 = vld [vmem:[#allocation3 + $0x1d0] sm:$0xff] }
  0xe6   : > { %v454_v4 = vmul.f32 %v390_v2, %v326_v1 }
  0xe8   : > { %538 = vadd.xlane.f32.xlu1 %v435_v7  ;;  %536 = vadd.xlane.f32.xlu0 %v434_v8  ;;  %v328_v7 = vld [vmem:[#allocation2 + $0x1e0] sm:$0xff] }
  0xe9   : > { %v392_v8 = vld [vmem:[#allocation3 + $0x1e0] sm:$0xff] }
  0xea   : > { %v456_v10 = vmul.f32 %v392_v8, %v328_v7 }
  0xec   : > { %542 = vadd.xlane.f32.xlu1 %v437_v13  ;;  %540 = vadd.xlane.f32.xlu0 %v436_v14  ;;  %v330_v13 = vld [vmem:[#allocation2 + $0x1f0] sm:$0xff] }
  0xed   : > { %v394_v14 = vld [vmem:[#allocation3 + $0x1f0] sm:$0xff] }
  0xee   : > { %v458_v16 = vmul.f32 %v394_v14, %v330_v13 }
  0xf0   : > { %546 = vadd.xlane.f32.xlu1 %v439_v19  ;;  %544 = vadd.xlane.f32.xlu0 %v438_v20 }
  0xf4   : > { %550 = vadd.xlane.f32.xlu1 %v441_v25  ;;  %548 = vadd.xlane.f32.xlu0 %v440_v26 }
  0xf8   : > { %554 = vadd.xlane.f32.xlu1 %v443_v31  ;;  %552 = vadd.xlane.f32.xlu0 %v442_v32 }
  0xfc   : > { %558 = vadd.xlane.f32.xlu1 %v445_v37  ;;  %556 = vadd.xlane.f32.xlu0 %v444_v38 }
 0x100   : > { %562 = vadd.xlane.f32.xlu1 %v447_v43  ;;  %560 = vadd.xlane.f32.xlu0 %v446_v44 }
 0x104   : > { %566 = vadd.xlane.f32.xlu1 %v449_v49  ;;  %564 = vadd.xlane.f32.xlu0 %v448_v50 }
 0x108   : > { %570 = vadd.xlane.f32.xlu1 %v451_v55  ;;  %568 = vadd.xlane.f32.xlu0 %v450_v56 }
 0x10c   : > { %574 = vadd.xlane.f32.xlu1 %v453_v61  ;;  %572 = vadd.xlane.f32.xlu0 %v452_v62  ;;  %v7774_v62 = vsub.s32 3, %v7762_v42 }
 0x110   : > { %578 = vadd.xlane.f32.xlu1 %v455_v3  ;;  %576 = vadd.xlane.f32.xlu0 %v454_v4  ;;  %v7783_v4 = vsub.s32 6, %v7762_v42 }
 0x114   : > { %582 = vadd.xlane.f32.xlu1 %v457_v9  ;;  %580 = vadd.xlane.f32.xlu0 %v456_v10  ;;  %v7791_v9 = vsub.s32 %v3090_v57, %v7762_v42 }
 0x116   : > { %9696 = vst [vmem:[#allocation18_spill] sm:$0xff] %v7791_v9 }
 0x118   : > { %586 = vadd.xlane.f32.xlu1 %v459_v15  ;;  %584 = vadd.xlane.f32.xlu0 %v458_v16 }
 0x129   : > { %v465_v17 = vpop.xlane.xlu1 %464  ;;  %v461_v19 = vpop.xlane.xlu0 %460 }
 0x12a   : > { %v6981_v18 = vmul.f32 -1.442695, %v465_v17  ;;  %v6979_v20 = vmul.f32 -1.442695, %v461_v19 }
 0x12c   : > { %7125 = vpow2.f32 %v6981_v18 }
 0x12d   : > { %7127 = vpow2.f32 %v6979_v20  ;;  %v467_v21 = vpop.xlane.xlu1 %466  ;;  %v463_v23 = vpop.xlane.xlu0 %462 }
 0x12e   : > { %v6982_v22 = vmul.f32 -1.442695, %v467_v21  ;;  %v6980_v24 = vmul.f32 -1.442695, %v463_v23 }
 0x130   : > { %7129 = vpow2.f32 %v6982_v22 }
 0x131   : > { %7131 = vpow2.f32 %v6980_v24  ;;  %v471_v25 = vpop.xlane.xlu1 %470  ;;  %v469_v27 = vpop.xlane.xlu0 %468 }
 0x132   : > { %v6984_v26 = vmul.f32 -1.442695, %v471_v25  ;;  %v6983_v28 = vmul.f32 -1.442695, %v469_v27 }
 0x134   : > { %7133 = vpow2.f32 %v6984_v26 }
 0x135   : > { %7135 = vpow2.f32 %v6983_v28  ;;  %v475_v29 = vpop.xlane.xlu1 %474  ;;  %v473_v32 = vpop.xlane.xlu0 %472 }
 0x136   : > { %v7126_v30 = vpop.eup %7125  ;;  %v6986_v31 = vmul.f32 -1.442695, %v475_v29  ;;  %v6985_v36 = vmul.f32 -1.442695, %v473_v32 }
 0x137   : > { %v7128_v34 = vpop.eup %7127  ;;  %v782_v35 = vadd.f32 1.0, %v7126_v30 }
 0x138   : > { %v780_v37 = vadd.f32 1.0, %v7128_v34  ;;  %7137 = vpow2.f32 %v6986_v31 }
 0x139   : > { %7139 = vrcp.f32 %v782_v35  ;;  %v479_v38 = vpop.xlane.xlu1 %478  ;;  %v477_v41 = vpop.xlane.xlu0 %476 }
 0x13a   : > { %v7130_v39 = vpop.eup %7129  ;;  %7141 = vrcp.f32 %v780_v37  ;;  %v6988_v40 = vmul.f32 -1.442695, %v479_v38  ;;  %v6987_v45 = vmul.f32 -1.442695, %v477_v41 }
 0x13b   : > { %v7132_v43 = vpop.eup %7131  ;;  %v783_v44 = vadd.f32 1.0, %v7130_v39  ;;  %7143 = vpow2.f32 %v6985_v36 }
 0x13c   : > { %v781_v48 = vadd.f32 1.0, %v7132_v43  ;;  %7145 = vpow2.f32 %v6988_v40 }
 0x13d   : > { %7147 = vrcp.f32 %v783_v44  ;;  %v483_v49 = vpop.xlane.xlu1 %482  ;;  %v481_v52 = vpop.xlane.xlu0 %480 }
 0x13e   : > { %v7134_v50 = vpop.eup %7133  ;;  %7149 = vrcp.f32 %v781_v48  ;;  %v6990_v51 = vmul.f32 -1.442695, %v483_v49  ;;  %v6989_v56 = vmul.f32 -1.442695, %v481_v52 }
 0x13f   : > { %v7136_v54 = vpop.eup %7135  ;;  %v785_v55 = vadd.f32 1.0, %v7134_v50  ;;  %7151 = vpow2.f32 %v6987_v45 }
 0x140   : > { %v784_v58 = vadd.f32 1.0, %v7136_v54  ;;  %7153 = vpow2.f32 %v6990_v51 }
 0x141   : > { %7155 = vrcp.f32 %v785_v55  ;;  %v487_v61 = vpop.xlane.xlu1 %486  ;;  %v485_v3 = vpop.xlane.xlu0 %484 }
 0x142   : > { %v7138_v1 = vpop.eup %7137  ;;  %7157 = vrcp.f32 %v784_v58  ;;  %v6992_v2 = vmul.f32 -1.442695, %v487_v61  ;;  %v6991_v8 = vmul.f32 -1.442695, %v485_v3 }
 0x143   : > { %v7788_v6 = vpop.eup %7139  ;;  %v787_v7 = vadd.f32 1.0, %v7138_v1  ;;  %7159 = vpow2.f32 %v6989_v56 }
 0x144   : > { %v7142_v10 = vpop.eup %7141  ;;  %7161 = vpow2.f32 %v6992_v2  ;;  %v1103_v11 = vrot.slane %v7788_v6, %v7765_v53  ;;  %v1107_v12 = vrot.slane %v7788_v6, %v7768_v59  ;;  %v1111_v13 = vrot.slane %v7788_v6, %v7771_v60 }
 0x145   : > { %v7144_v14 = vpop.eup %7143  ;;  %7163 = vrcp.f32 %v787_v7  ;;  %v491_v15 = vpop.xlane.xlu1 %490  ;;  %v1039_v16 = vrot.slane %v7142_v10, %v7765_v53  ;;  %v1043_v17 = vrot.slane %v7142_v10, %v7768_v59  ;;  %v1047_v18 = vrot.slane %v7142_v10, %v7771_v60 }
 0x146   : > { %v7146_v19 = vpop.eup %7145  ;;  %v786_v20 = vadd.f32 1.0, %v7144_v14  ;;  %7165 = vpow2.f32 %v6991_v8  ;;  %v6994_v21 = vmul.f32 -1.442695, %v491_v15  ;;  %v489_v22 = vpop.xlane.xlu0 %488  ;;  %v1051_v23 = vrot.slane %v7142_v10, %v7774_v62 }
 0x147   : > { %v7803_v24 = vpop.eup %7147  ;;  %v789_v25 = vadd.f32 1.0, %v7146_v19  ;;  %v6993_v26 = vmul.f32 -1.442695, %v489_v22  ;;  %v1055_v27 = vrot.slane %v7142_v10, %v7777_v63  ;;  %v1059_v28 = vrot.slane %v7142_v10, %v7780_v0 }
 0x148   : > { %v7807_v29 = vpop.eup %7149  ;;  %7167 = vrcp.f32 %v786_v20  ;;  %v1063_v30 = vrot.slane %v7142_v10, %v7783_v4  ;;  %v1067_v31 = vrot.slane %v7142_v10, %v7786_v5  ;;  %v3084_v32 = vcombine.low %v1039_v16, %v1043_v17 }
 0x149   : > { %v7152_v34 = vpop.eup %7151  ;;  %7169 = vrcp.f32 %v789_v25  ;;  %v495_v35 = vpop.xlane.xlu1 %494  ;;  %v3085_v36 = vcombine.low %v1047_v18, %v1051_v23  ;;  %v3086_v37 = vcombine.low %v1055_v27, %v1059_v28  ;;  %v1071_v38 = vrot.slane %v7807_v29, %v7765_v53 }
 0x14a   : > { %v7154_v39 = vpop.eup %7153  ;;  %v788_v40 = vadd.f32 1.0, %v7152_v34  ;;  %7171 = vpow2.f32 %v6994_v21  ;;  %v6996_v41 = vmul.f32 -1.442695, %v495_v35  ;;  %v493_v43 = vpop.xlane.xlu0 %492  ;;  %v3087_v44 = vcombine.low %v1063_v30, %v1067_v31 }
 0x14b   : > { %v7813_v45 = vpop.eup %7155  ;;  %v791_v46 = vadd.f32 1.0, %v7154_v39  ;;  %7173 = vpow2.f32 %v6993_v26  ;;  %v6995_v47 = vmul.f32 -1.442695, %v493_v43  ;;  %v3094_v48 = vrot.slane %v3084_v32, %v7791_v9 }
 0x14c   : > { %v7816_v49 = vpop.eup %7157  ;;  %7175 = vrcp.f32 %v788_v40  ;;  %v3101_v50 = vrot.slane %v3085_v36, %v7791_v9  ;;  %v3108_v51 = vrot.slane %v3086_v37, %v7791_v9  ;;  %v3115_v52 = vrot.slane %v3087_v44, %v7791_v9 }
 0x14d   : > { %v7160_v54 = vpop.eup %7159  ;;  %7177 = vrcp.f32 %v791_v46  ;;  %v499_v55 = vpop.xlane.xlu1 %498  ;;  %v1075_v56 = vrot.slane %v7807_v29, %v7768_v59  ;;  %v1079_v57 = vrot.slane %v7807_v29, %v7771_v60  ;;  %v1083_v58 = vrot.slane %v7807_v29, %v7774_v62 }
 0x14e   : > { %v7162_v61 = vpop.eup %7161  ;;  %v790_v1 = vadd.f32 1.0, %v7160_v54  ;;  %7179 = vpow2.f32 %v6996_v41  ;;  %v6998_v2 = vmul.f32 -1.442695, %v499_v55  ;;  %v497_v3 = vpop.xlane.xlu0 %496  ;;  %v3116_v7 = vcombine.low %v3094_v48, %v3101_v50 }
 0x14f   : > { %v7827_v8 = vpop.eup %7163  ;;  %v793_v10 = vadd.f32 1.0, %v7162_v61  ;;  %7181 = vpow2.f32 %v6995_v47  ;;  %v6997_v14 = vmul.f32 -1.442695, %v497_v3  ;;  %v3117_v15 = vcombine.low %v3108_v51, %v3115_v52 }
 0x150   : > { %v7166_v16 = vpop.eup %7165  ;;  %7183 = vrcp.f32 %v790_v1  ;;  %v3124_v17 = vrot.slane %v3116_v7, %v7791_v9  ;;  %v1087_v18 = vrot.slane %v7807_v29, %v7777_v63  ;;  %v1091_v19 = vrot.slane %v7807_v29, %v7780_v0 }
 0x151   : > { %7185 = vrcp.f32 %v793_v10  ;;  %v792_v20 = vadd.f32 1.0, %v7166_v16  ;;  %v3131_v21 = vrot.slane %v3117_v15, %v7791_v9  ;;  %v503_v22 = vpop.xlane.xlu1 %502  ;;  %v1095_v23 = vrot.slane %v7807_v29, %v7783_v4 }
 0x152   : > { %v7837_v25 = vpop.eup %7167  ;;  %7187 = vpow2.f32 %v6998_v2  ;;  %v7000_v26 = vmul.f32 -1.442695, %v503_v22  ;;  %v501_v27 = vpop.xlane.xlu0 %500  ;;  %v1099_v28 = vrot.slane %v7807_v29, %v7786_v5  ;;  %v3133_v30 = vcombine.low %v1071_v38, %v1075_v56 }
 0x153   : > { %v7841_v31 = vpop.eup %7169  ;;  %7189 = vrcp.f32 %v792_v20  ;;  %v3132_v32 = vcombine.low %v3124_v17, %v3131_v21  ;;  %v6999_v34 = vmul.f32 -1.442695, %v501_v27  ;;  %v3134_v35 = vcombine.low %v1079_v57, %v1083_v58 }
 0x154   : > { %v7172_v36 = vpop.eup %7171  ;;  %7191 = vpow2.f32 %v6997_v14  ;;  %v3135_v37 = vcombine.low %v1087_v18, %v1091_v19  ;;  %v3136_v39 = vcombine.low %v1095_v23, %v1099_v28  ;;  %v3143_v40 = vrot.slane %v3133_v30, %v7791_v9 }
 0x155   : > { %v7174_v41 = vpop.eup %7173  ;;  %v795_v43 = vadd.f32 1.0, %v7172_v36  ;;  %6221 = vperm.xlu0 %7123, %v3132_v32   ;;  %7193 = vpow2.f32 %v7000_v26  ;;  %v3150_v44 = vrot.slane %v3134_v35, %v7791_v9  ;;  %v507_v29 = vpop.xlane.xlu1 %506  ;;  %v1115_v38 = vrot.slane %v7788_v6, %v7774_v62 }
 0x156   : > { %v7847_v46 = vpop.eup %7175  ;;  %v794_v47 = vadd.f32 1.0, %v7174_v41  ;;  %7195 = vpow2.f32 %v6999_v34  ;;  %v3157_v48 = vrot.slane %v3135_v37, %v7791_v9  ;;  %v3164_v50 = vrot.slane %v3136_v39, %v7791_v9  ;;  %v505_v51 = vpop.xlane.xlu0 %504 }
 0x157   : > { %v7851_v52 = vpop.eup %7177  ;;  %7197 = vrcp.f32 %v795_v43  ;;  %v3165_v54 = vcombine.low %v3143_v40, %v3150_v44  ;;  %v7002_v55 = vmul.f32 -1.442695, %v507_v29  ;;  %v7001_v56 = vmul.f32 -1.442695, %v505_v51 }
 0x158   : > { %v7180_v57 = vpop.eup %7179  ;;  %7199 = vrcp.f32 %v794_v47  ;;  %v3166_v58 = vcombine.low %v3157_v48, %v3164_v50  ;;  %v1119_v61 = vrot.slane %v7788_v6, %v7777_v63  ;;  %v1123_v1 = vrot.slane %v7788_v6, %v7780_v0 }
 0x159   : > { %v7182_v2 = vpop.eup %7181  ;;  %v797_v3 = vadd.f32 1.0, %v7180_v57  ;;  %v3173_v7 = vrot.slane %v3165_v54, %v7791_v9  ;;  %7201 = vpow2.f32 %v7002_v55  ;;  %v1127_v10 = vrot.slane %v7788_v6, %v7783_v4  ;;  %v511_v14 = vpop.xlane.xlu1 %510 }
 0x15a   : > { %v7860_v15 = vpop.eup %7183  ;;  %v796_v16 = vadd.f32 1.0, %v7182_v2  ;;  %v3180_v17 = vrot.slane %v3166_v58, %v7791_v9  ;;  %7203 = vpow2.f32 %v7001_v56  ;;  %v1131_v18 = vrot.slane %v7788_v6, %v7786_v5 }
 0x15b   : > { %v7865_v19 = vpop.eup %7185  ;;  %7205 = vrcp.f32 %v797_v3  ;;  %v3182_v20 = vcombine.low %v1103_v11, %v1107_v12  ;;  %v3183_v21 = vcombine.low %v1111_v13, %v1115_v38  ;;  %v3184_v22 = vcombine.low %v1119_v61, %v1123_v1  ;;  %v509_v11 = vpop.xlane.xlu0 %508 }
 0x15c   : > { %v7188_v23 = vpop.eup %7187  ;;  %7207 = vrcp.f32 %v796_v16  ;;  %v3181_v26 = vcombine.low %v3173_v7, %v3180_v17  ;;  %v3185_v27 = vcombine.low %v1127_v10, %v1131_v18  ;;  %v7004_v28 = vmul.f32 -1.442695, %v511_v14 }
 0x15d   : > { %v7876_v30 = vpop.eup %7189  ;;  %v799_v32 = vadd.f32 1.0, %v7188_v23  ;;  %v3192_v34 = vrot.slane %v3182_v20, %v7791_v9  ;;  %v3199_v35 = vrot.slane %v3183_v21, %v7791_v9  ;;  %v3206_v36 = vrot.slane %v3184_v22, %v7791_v9  ;;  %v515_v61 = vpop.xlane.xlu1 %514 }
 0x15e   : > { %v7192_v12 = vpop.eup %7191  ;;  %6224 = vperm.xlu1 %7124, %v3181_v26   ;;  %v3213_v6 = vrot.slane %v3185_v27, %v7791_v9  ;;  %7209 = vpow2.f32 %v7004_v28  ;;  %v7003_v13 = vmul.f32 -1.442695, %v509_v11  ;;  %v1135_v37 = vrot.slane %v7803_v24, %v7765_v53 }
 0x15f   : > { %v7194_v39 = vpop.eup %7193  ;;  %7211 = vrcp.f32 %v799_v32  ;;  %v798_v40 = vadd.f32 1.0, %v7192_v12  ;;  %v3214_v41 = vcombine.low %v3192_v34, %v3199_v35  ;;  %v1139_v43 = vrot.slane %v7803_v24, %v7768_v59  ;;  %v513_v27 = vpop.xlane.xlu0 %512 }
 0x160   : > { %v7196_v44 = vpop.eup %7195  ;;  %v801_v29 = vadd.f32 1.0, %v7194_v39  ;;  %v3215_v38 = vcombine.low %v3206_v36, %v3213_v6  ;;  %7213 = vpow2.f32 %v7003_v13  ;;  %v1143_v47 = vrot.slane %v7803_v24, %v7771_v60 }
 0x161   : > { %v7888_v48 = vpop.eup %7197  ;;  %7215 = vrcp.f32 %v798_v40  ;;  %v800_v50 = vadd.f32 1.0, %v7196_v44  ;;  %v3222_v51 = vrot.slane %v3214_v41, %v7791_v9  ;;  %v1147_v54 = vrot.slane %v7803_v24, %v7774_v62 }
 0x162   : > { %v7893_v55 = vpop.eup %7199  ;;  %7217 = vrcp.f32 %v801_v29  ;;  %v3229_v56 = vrot.slane %v3215_v38, %v7791_v9  ;;  %v1151_v57 = vrot.slane %v7803_v24, %v7777_v63  ;;  %v1155_v58 = vrot.slane %v7803_v24, %v7780_v0 }
 0x163   : > { %v7202_v1 = vpop.eup %7201  ;;  %7219 = vrcp.f32 %v800_v50  ;;  %v1159_v2 = vrot.slane %v7803_v24, %v7783_v4  ;;  %v1163_v3 = vrot.slane %v7803_v24, %v7786_v5  ;;  %v3231_v7 = vcombine.low %v1135_v37, %v1139_v43 }
 0x164   : > { %v7204_v10 = vpop.eup %7203  ;;  %v803_v14 = vadd.f32 1.0, %v7202_v1  ;;  %v3230_v16 = vcombine.low %v3222_v51, %v3229_v56  ;;  %v3232_v17 = vcombine.low %v1143_v47, %v1147_v54  ;;  %v3233_v18 = vcombine.low %v1151_v57, %v1155_v58 }
 0x165   : > { %v7904_v20 = vpop.eup %7205  ;;  %v802_v21 = vadd.f32 1.0, %v7204_v10  ;;  %v3234_v22 = vcombine.low %v1159_v2, %v1163_v3  ;;  %v3241_v23 = vrot.slane %v3231_v7, %v7791_v9  ;;  %v7006_v26 = vmul.f32 -1.442695, %v515_v61 }
 0x166   : > { %v7907_v28 = vpop.eup %7207  ;;  %7221 = vrcp.f32 %v803_v14  ;;  %6227 = vperm.xlu1 %7124, %v3230_v16   ;;  %v3248_v24 = vrot.slane %v3232_v17, %v7791_v9  ;;  %v3255_v32 = vrot.slane %v3233_v18, %v7791_v9  ;;  %v7005_v34 = vmul.f32 -1.442695, %v513_v27 }
 0x167   : > { %7223 = vrcp.f32 %v802_v21  ;;  %v3262_v35 = vrot.slane %v3234_v22, %v7791_v9  ;;  %v1327_v36 = vrot.slane %v7841_v31, %v7765_v53  ;;  %v1331_v11 = vrot.slane %v7841_v31, %v7768_v59  ;;  %v519_v22 = vpop.xlane.xlu1 %518 }
 0x168   : > { %v7210_v12 = vpop.eup %7209  ;;  %v3263_v6 = vcombine.low %v3241_v23, %v3248_v24  ;;  %7225 = vpow2.f32 %v7006_v26  ;;  %v1335_v13 = vrot.slane %v7841_v31, %v7771_v60  ;;  %v1339_v37 = vrot.slane %v7841_v31, %v7774_v62 }
 0x169   : > { %v7920_v39 = vpop.eup %7211  ;;  %v805_v40 = vadd.f32 1.0, %v7210_v12  ;;  %v3264_v41 = vcombine.low %v3255_v32, %v3262_v35  ;;  %7227 = vpow2.f32 %v7005_v34  ;;  %v1343_v43 = vrot.slane %v7841_v31, %v7777_v63  ;;  %v517_v12 = vpop.xlane.xlu0 %516 }
 0x16a   : > { %v7214_v44 = vpop.eup %7213  ;;  %v3271_v29 = vrot.slane %v3263_v6, %v7791_v9  ;;  %v1347_v38 = vrot.slane %v7841_v31, %v7780_v0  ;;  %v1351_v47 = vrot.slane %v7841_v31, %v7783_v4  ;;  %v1355_v50 = vrot.slane %v7841_v31, %v7786_v5 }
 0x16b   : > { %v7931_v51 = vpop.eup %7215  ;;  %7229 = vrcp.f32 %v805_v40  ;;  %v804_v54 = vadd.f32 1.0, %v7214_v44  ;;  %v3278_v56 = vrot.slane %v3264_v41, %v7791_v9  ;;  %v3525_v57 = vcombine.low %v1327_v36, %v1331_v11 }
 0x16c   : > { %v7934_v58 = vpop.eup %7217  ;;  %v3526_v61 = vcombine.low %v1335_v13, %v1339_v37  ;;  %v3527_v1 = vcombine.low %v1343_v43, %v1347_v38  ;;  %v3528_v2 = vcombine.low %v1351_v47, %v1355_v50  ;;  %v1167_v3 = vrot.slane %v7816_v49, %v7765_v53 }
 0x16d   : > { %v7938_v7 = vpop.eup %7219  ;;  %7231 = vrcp.f32 %v804_v54  ;;  %v3279_v10 = vcombine.low %v3271_v29, %v3278_v56  ;;  %v3535_v31 = vrot.slane %v3525_v57, %v7791_v9  ;;  %v1171_v14 = vrot.slane %v7816_v49, %v7768_v59 }
 0x16e   : > { %v3542_v16 = vrot.slane %v3526_v61, %v7791_v9  ;;  %v3549_v17 = vrot.slane %v3527_v1, %v7791_v9  ;;  %v3556_v18 = vrot.slane %v3528_v2, %v7791_v9  ;;  %v1175_v21 = vrot.slane %v7816_v49, %v7771_v60 }
 0x16f   : > { %6230 = vperm.xlu1 %7124, %v3279_v10   ;;  %v1179_v23 = vrot.slane %v7816_v49, %v7774_v62  ;;  %v1183_v26 = vrot.slane %v7816_v49, %v7777_v63  ;;  %v1187_v27 = vrot.slane %v7816_v49, %v7780_v0  ;;  %v1191_v24 = vrot.slane %v7816_v49, %v7783_v4 }
 0x170   : > { %v7956_v32 = vpop.eup %7221  ;;  %v3557_v34 = vcombine.low %v3535_v31, %v3542_v16  ;;  %v3558_v35 = vcombine.low %v3549_v17, %v3556_v18  ;;  %v1195_v36 = vrot.slane %v7816_v49, %v7786_v5  ;;  %v3280_v11 = vcombine.low %v1167_v3, %v1171_v14 }
 0x171   : > { %v7960_v6 = vpop.eup %7223  ;;  %v3281_v13 = vcombine.low %v1175_v21, %v1179_v23  ;;  %v3282_v37 = vcombine.low %v1183_v26, %v1187_v27  ;;  %v7008_v40 = vmul.f32 -1.442695, %v519_v22  ;;  %v7007_v41 = vmul.f32 -1.442695, %v517_v12 }
 0x172   : > { %v7226_v43 = vpop.eup %7225  ;;  %v3565_v44 = vrot.slane %v3557_v34, %v7791_v9  ;;  %v3572_v29 = vrot.slane %v3558_v35, %v7791_v9  ;;  %v3283_v38 = vcombine.low %v1191_v24, %v1195_v36  ;;  %v3290_v47 = vrot.slane %v3280_v11, %v7791_v9 }
 0x173   : > { %v7228_v50 = vpop.eup %7227  ;;  %v807_v54 = vadd.f32 1.0, %v7226_v43  ;;  %v3297_v49 = vrot.slane %v3281_v13, %v7791_v9  ;;  %v3304_v56 = vrot.slane %v3282_v37, %v7791_v9  ;;  %7233 = vpow2.f32 %v7008_v40 }
 0x174   : > { %v3573_v57 = vcombine.low %v3565_v44, %v3572_v29  ;;  %v3311_v61 = vrot.slane %v3283_v38, %v7791_v9  ;;  %7235 = vpow2.f32 %v7007_v41  ;;  %v806_v2 = vadd.f32 1.0, %v7228_v50  ;;  %v523_v44 = vpop.xlane.xlu1 %522 }
 0x175   : > { %v7968_v1 = vpop.eup %7229  ;;  %v3312_v3 = vcombine.low %v3290_v47, %v3297_v49  ;;  %v1391_v10 = vrot.slane %v7851_v52, %v7765_v53  ;;  %v1395_v31 = vrot.slane %v7851_v52, %v7768_v59  ;;  %7237 = vrcp.f32 %v807_v54 }
 0x176   : > { %6248 = vperm.xlu0 %7123, %v3573_v57   ;;  %v3313_v14 = vcombine.low %v3304_v56, %v3311_v61  ;;  %v1399_v16 = vrot.slane %v7851_v52, %v7771_v60  ;;  %v1403_v17 = vrot.slane %v7851_v52, %v7774_v62  ;;  %v1407_v22 = vrot.slane %v7851_v52, %v7777_v63 }
 0x177   : > { %v7978_v18 = vpop.eup %7231  ;;  %v3320_v21 = vrot.slane %v3312_v3, %v7791_v9  ;;  %v1411_v23 = vrot.slane %v7851_v52, %v7780_v0  ;;  %v1415_v26 = vrot.slane %v7851_v52, %v7783_v4  ;;  %v1419_v24 = vrot.slane %v7851_v52, %v7786_v5 }
 0x178   : > { %v3327_v27 = vrot.slane %v3313_v14, %v7791_v9  ;;  %v3623_v34 = vcombine.low %v1391_v10, %v1395_v31  ;;  %v3624_v35 = vcombine.low %v1399_v16, %v1403_v17  ;;  %v1199_v11 = vrot.slane %v7813_v45, %v7765_v53 }
 0x179   : > { %v3625_v36 = vcombine.low %v1407_v22, %v1411_v23  ;;  %v1203_v12 = vrot.slane %v7813_v45, %v7768_v59  ;;  %v1207_v13 = vrot.slane %v7813_v45, %v7771_v60  ;;  %v3626_v40 = vcombine.low %v1415_v26, %v1419_v24  ;;  %v521_v24 = vpop.xlane.xlu0 %520 }
 0x17a   : > { %v3328_v37 = vcombine.low %v3320_v21, %v3327_v27  ;;  %v3633_v41 = vrot.slane %v3623_v34, %v7791_v9  ;;  %v3640_v43 = vrot.slane %v3624_v35, %v7791_v9  ;;  %v1211_v29 = vrot.slane %v7813_v45, %v7774_v62 }
 0x17b   : > { %v3647_v52 = vrot.slane %v3625_v36, %v7791_v9  ;;  %v1215_v38 = vrot.slane %v7813_v45, %v7777_v63  ;;  %v1219_v47 = vrot.slane %v7813_v45, %v7780_v0  ;;  %v3654_v50 = vrot.slane %v3626_v40, %v7791_v9 }
 0x17c   : > { %6233 = vperm.xlu1 %7124, %v3328_v37   ;;  %v3655_v54 = vcombine.low %v3633_v41, %v3640_v43  ;;  %v1223_v49 = vrot.slane %v7813_v45, %v7783_v4  ;;  %v1227_v56 = vrot.slane %v7813_v45, %v7786_v5  ;;  %v3329_v61 = vcombine.low %v1199_v11, %v1203_v12 }
 0x17d   : > { %v7234_v57 = vpop.eup %7233  ;;  %v3330_v3 = vcombine.low %v1207_v13, %v1211_v29  ;;  %v3331_v10 = vcombine.low %v1215_v38, %v1219_v47  ;;  %v7010_v31 = vmul.f32 -1.442695, %v523_v44  ;;  %v3656_v17 = vcombine.low %v3647_v52, %v3654_v50 }
 0x17e   : > { %v7236_v14 = vpop.eup %7235  ;;  %v809_v16 = vadd.f32 1.0, %v7234_v57  ;;  %v3663_v21 = vrot.slane %v3655_v54, %v7791_v9  ;;  %v3332_v22 = vcombine.low %v1223_v49, %v1227_v56  ;;  %7239 = vrcp.f32 %v806_v2 }
 0x17f   : > { %v3339_v23 = vrot.slane %v3329_v61, %v7791_v9  ;;  %v3346_v26 = vrot.slane %v3330_v3, %v7791_v9  ;;  %v3353_v27 = vrot.slane %v3331_v10, %v7791_v9  ;;  %v8014_v45 = vpop.eup %7237  ;;  %v8016_v34 = vadd.f32 1.0, %v7236_v14 }
 0x180   : > { %v3670_v35 = vrot.slane %v3656_v17, %v7791_v9  ;;  %v3360_v36 = vrot.slane %v3332_v22, %v7791_v9  ;;  %v7009_v11 = vmul.f32 -1.442695, %v521_v24  ;;  %7241 = vrcp.f32 %v809_v16 }
 0x181   : > { %v3361_v12 = vcombine.low %v3339_v23, %v3346_v26  ;;  %v1455_v2 = vrot.slane %v7865_v19, %v7765_v53  ;;  %v1459_v13 = vrot.slane %v7865_v19, %v7768_v59  ;;  %7243 = vpow2.f32 %v7010_v31 }
 0x182   : > { %v3671_v37 = vcombine.low %v3663_v21, %v3670_v35  ;;  %v3362_v40 = vcombine.low %v3353_v27, %v3360_v36  ;;  %v1463_v41 = vrot.slane %v7865_v19, %v7771_v60  ;;  %7245 = vpow2.f32 %v7009_v11  ;;  %v527_v21 = vpop.xlane.xlu1 %526 }
 0x183   : > { %v3369_v43 = vrot.slane %v3361_v12, %v7791_v9  ;;  %v1467_v44 = vrot.slane %v7865_v19, %v7774_v62  ;;  %v1471_v52 = vrot.slane %v7865_v19, %v7777_v63  ;;  %v1475_v38 = vrot.slane %v7865_v19, %v7780_v0 }
 0x184   : > { %6254 = vperm.xlu0 %7123, %v3671_v37   ;;  %v3376_v29 = vrot.slane %v3362_v40, %v7791_v9  ;;  %v1479_v47 = vrot.slane %v7865_v19, %v7783_v4  ;;  %v1483_v50 = vrot.slane %v7865_v19, %v7786_v5  ;;  %v3721_v54 = vcombine.low %v1455_v2, %v1459_v13  ;;  %v525_v2 = vpop.xlane.xlu0 %524 }
 0x185   : > { %v3722_v49 = vcombine.low %v1463_v41, %v1467_v44  ;;  %v1231_v56 = vrot.slane %v7837_v25, %v7765_v53  ;;  %v1235_v57 = vrot.slane %v7837_v25, %v7768_v59  ;;  %v3723_v3 = vcombine.low %v1471_v52, %v1475_v38 }
 0x186   : > { %v3377_v61 = vcombine.low %v3369_v43, %v3376_v29  ;;  %v3724_v10 = vcombine.low %v1479_v47, %v1483_v50  ;;  %v1239_v31 = vrot.slane %v7837_v25, %v7771_v60  ;;  %v3731_v14 = vrot.slane %v3721_v54, %v7791_v9 }
 0x187   : > { %v3738_v16 = vrot.slane %v3722_v49, %v7791_v9  ;;  %v1243_v19 = vrot.slane %v7837_v25, %v7774_v62  ;;  %v1247_v17 = vrot.slane %v7837_v25, %v7777_v63  ;;  %v3745_v22 = vrot.slane %v3723_v3, %v7791_v9 }
 0x188   : > { %6236 = vperm.xlu1 %7124, %v3377_v61   ;;  %v3752_v23 = vrot.slane %v3724_v10, %v7791_v9  ;;  %v1251_v26 = vrot.slane %v7837_v25, %v7780_v0  ;;  %v1255_v27 = vrot.slane %v7837_v25, %v7783_v4  ;;  %v8056_v24 = vpop.eup %7239  ;;  %v1259_v36 = vrot.slane %v7837_v25, %v7786_v5 }
 0x189   : > { %v3753_v35 = vcombine.low %v3731_v14, %v3738_v16  ;;  %v3378_v11 = vcombine.low %v1231_v56, %v1235_v57  ;;  %v3379_v12 = vcombine.low %v1239_v31, %v1243_v19  ;;  %v7012_v40 = vmul.f32 -1.442695, %v527_v21 }
 0x18a   : > { %v3754_v13 = vcombine.low %v3745_v22, %v3752_v23  ;;  %v3380_v37 = vcombine.low %v1247_v17, %v1251_v26  ;;  %v7011_v41 = vmul.f32 -1.442695, %v525_v2  ;;  %v8060_v43 = vpop.eup %7241  ;;  %v3381_v52 = vcombine.low %v1255_v27, %v1259_v36 }
 0x18b   : > { %v3761_v44 = vrot.slane %v3753_v35, %v7791_v9  ;;  %v3388_v29 = vrot.slane %v3378_v11, %v7791_v9  ;;  %v3395_v38 = vrot.slane %v3379_v12, %v7791_v9  ;;  %v7244_v47 = vpop.eup %7243  ;;  %7247 = vpow2.f32 %v7012_v40 }
 0x18c   : > { %v3768_v50 = vrot.slane %v3754_v13, %v7791_v9  ;;  %v3402_v25 = vrot.slane %v3380_v37, %v7791_v9  ;;  %v1519_v54 = vrot.slane %v7888_v48, %v7765_v53  ;;  %v7246_v49 = vpop.eup %7245  ;;  %v811_v56 = vadd.f32 1.0, %v7244_v47 }
 0x18d   : > { %v3409_v57 = vrot.slane %v3381_v52, %v7791_v9  ;;  %v3410_v61 = vcombine.low %v3388_v29, %v3395_v38  ;;  %7249 = vpow2.f32 %v7011_v41  ;;  %v1523_v10 = vrot.slane %v7888_v48, %v7768_v59 }
 0x18e   : > { %7251 = vrcp.f32 %v8016_v34  ;;  %v3769_v3 = vcombine.low %v3761_v44, %v3768_v50  ;;  %v1527_v31 = vrot.slane %v7888_v48, %v7771_v60  ;;  %v810_v14 = vadd.f32 1.0, %v7246_v49  ;;  %v531_v44 = vpop.xlane.xlu1 %530 }
 0x18f   : > { %v3411_v16 = vcombine.low %v3402_v25, %v3409_v57  ;;  %v3418_v19 = vrot.slane %v3410_v61, %v7791_v9  ;;  %v1531_v17 = vrot.slane %v7888_v48, %v7774_v62  ;;  %7253 = vrcp.f32 %v811_v56 }
 0x190   : > { %6260 = vperm.xlu0 %7123, %v3769_v3   ;;  %v1535_v21 = vrot.slane %v7888_v48, %v7777_v63  ;;  %v1539_v34 = vrot.slane %v7888_v48, %v7780_v0  ;;  %v1543_v22 = vrot.slane %v7888_v48, %v7783_v4  ;;  %v1547_v26 = vrot.slane %v7888_v48, %v7786_v5 }
 0x191   : > { %v3425_v23 = vrot.slane %v3411_v16, %v7791_v9  ;;  %v3819_v27 = vcombine.low %v1519_v54, %v1523_v10  ;;  %v3820_v35 = vcombine.low %v1527_v31, %v1531_v17  ;;  %v1263_v11 = vrot.slane %v7827_v8, %v7765_v53 }
 0x192   : > { %v3821_v36 = vcombine.low %v1535_v21, %v1539_v34  ;;  %v1267_v12 = vrot.slane %v7827_v8, %v7768_v59  ;;  %v1271_v2 = vrot.slane %v7827_v8, %v7771_v60  ;;  %v3822_v37 = vcombine.low %v1543_v22, %v1547_v26 }
 0x193   : > { %v3426_v13 = vcombine.low %v3418_v19, %v3425_v23  ;;  %v3829_v40 = vrot.slane %v3819_v27, %v7791_v9  ;;  %v3836_v41 = vrot.slane %v3820_v35, %v7791_v9  ;;  %v1275_v52 = vrot.slane %v7827_v8, %v7774_v62  ;;  %v529_v23 = vpop.xlane.xlu0 %528 }
 0x194   : > { %v3843_v48 = vrot.slane %v3821_v36, %v7791_v9  ;;  %v1279_v29 = vrot.slane %v7827_v8, %v7777_v63  ;;  %v1283_v38 = vrot.slane %v7827_v8, %v7780_v0  ;;  %v3850_v47 = vrot.slane %v3822_v37, %v7791_v9 }
 0x195   : > { %6239 = vperm.xlu1 %7124, %v3426_v13   ;;  %v3851_v50 = vcombine.low %v3829_v40, %v3836_v41  ;;  %v1287_v25 = vrot.slane %v7827_v8, %v7783_v4  ;;  %v1291_v54 = vrot.slane %v7827_v8, %v7786_v5  ;;  %v7248_v49 = vpop.eup %7247  ;;  %v3427_v56 = vcombine.low %v1263_v11, %v1267_v12 }
 0x196   : > { %v3428_v57 = vcombine.low %v1271_v2, %v1275_v52  ;;  %v3429_v61 = vcombine.low %v1279_v29, %v1283_v38  ;;  %v7014_v3 = vmul.f32 -1.442695, %v531_v44  ;;  %v813_v31 = vadd.f32 1.0, %v7248_v49 }
 0x197   : > { %v7250_v10 = vpop.eup %7249  ;;  %v3852_v16 = vcombine.low %v3843_v48, %v3850_v47  ;;  %v3859_v19 = vrot.slane %v3851_v50, %v7791_v9  ;;  %v3430_v17 = vcombine.low %v1287_v25, %v1291_v54  ;;  %7255 = vrcp.f32 %v810_v14 }
 0x198   : > { %v8108_v21 = vpop.eup %7251  ;;  %v3437_v34 = vrot.slane %v3427_v56, %v7791_v9  ;;  %v3444_v22 = vrot.slane %v3428_v57, %v7791_v9  ;;  %v3451_v8 = vrot.slane %v3429_v61, %v7791_v9  ;;  %v8113_v26 = vadd.f32 1.0, %v7250_v10 }
 0x199   : > { %v3866_v27 = vrot.slane %v3852_v16, %v7791_v9  ;;  %v3458_v35 = vrot.slane %v3430_v17, %v7791_v9  ;;  %v7013_v36 = vmul.f32 -1.442695, %v529_v23  ;;  %v8117_v11 = vpop.eup %7253  ;;  %7257 = vrcp.f32 %v813_v31 }
 0x19a   : > { %v3459_v12 = vcombine.low %v3437_v34, %v3444_v22  ;;  %v1583_v14 = vrot.slane %v7904_v20, %v7765_v53  ;;  %v1587_v2 = vrot.slane %v7904_v20, %v7768_v59  ;;  %7259 = vpow2.f32 %v7014_v3 }
 0x19b   : > { %v3867_v13 = vcombine.low %v3859_v19, %v3866_v27  ;;  %v3460_v37 = vcombine.low %v3451_v8, %v3458_v35  ;;  %v1591_v40 = vrot.slane %v7904_v20, %v7771_v60  ;;  %7261 = vpow2.f32 %v7013_v36  ;;  %v535_v19 = vpop.xlane.xlu1 %534 }
 0x19c   : > { %v3467_v41 = vrot.slane %v3459_v12, %v7791_v9  ;;  %v1595_v44 = vrot.slane %v7904_v20, %v7774_v62  ;;  %v1599_v48 = vrot.slane %v7904_v20, %v7777_v63  ;;  %v1603_v29 = vrot.slane %v7904_v20, %v7780_v0 }
 0x19d   : > { %6266 = vperm.xlu0 %7123, %v3867_v13   ;;  %v3474_v52 = vrot.slane %v3460_v37, %v7791_v9  ;;  %v1607_v38 = vrot.slane %v7904_v20, %v7783_v4  ;;  %v1611_v47 = vrot.slane %v7904_v20, %v7786_v5  ;;  %v3917_v50 = vcombine.low %v1583_v14, %v1587_v2  ;;  %v533_v14 = vpop.xlane.xlu0 %532 }
 0x19e   : > { %v3918_v25 = vcombine.low %v1591_v40, %v1595_v44  ;;  %v1295_v54 = vrot.slane %v7847_v46, %v7765_v53  ;;  %v1299_v49 = vrot.slane %v7847_v46, %v7768_v59  ;;  %v3919_v57 = vcombine.low %v1599_v48, %v1603_v29 }
 0x19f   : > { %v3475_v56 = vcombine.low %v3467_v41, %v3474_v52  ;;  %v3920_v61 = vcombine.low %v1607_v38, %v1611_v47  ;;  %v1303_v3 = vrot.slane %v7847_v46, %v7771_v60  ;;  %v3927_v10 = vrot.slane %v3917_v50, %v7791_v9 }
 0x1a0   : > { %v3934_v31 = vrot.slane %v3918_v25, %v7791_v9  ;;  %v1307_v20 = vrot.slane %v7847_v46, %v7774_v62  ;;  %v1311_v16 = vrot.slane %v7847_v46, %v7777_v63  ;;  %v3941_v17 = vrot.slane %v3919_v57, %v7791_v9 }
 0x1a1   : > { %6242 = vperm.xlu1 %7124, %v3475_v56   ;;  %v3948_v34 = vrot.slane %v3920_v61, %v7791_v9  ;;  %v1315_v22 = vrot.slane %v7847_v46, %v7780_v0  ;;  %v1319_v8 = vrot.slane %v7847_v46, %v7783_v4  ;;  %v8155_v23 = vpop.eup %7255  ;;  %v1323_v35 = vrot.slane %v7847_v46, %v7786_v5 }
 0x1a2   : > { %v3949_v27 = vcombine.low %v3927_v10, %v3934_v31  ;;  %v3476_v36 = vcombine.low %v1295_v54, %v1299_v49  ;;  %v3477_v12 = vcombine.low %v1303_v3, %v1307_v20  ;;  %v7016_v37 = vmul.f32 -1.442695, %v535_v19 }
 0x1a3   : > { %v3950_v2 = vcombine.low %v3941_v17, %v3948_v34  ;;  %v3478_v13 = vcombine.low %v1311_v16, %v1315_v22  ;;  %v7015_v40 = vmul.f32 -1.442695, %v533_v14  ;;  %v8159_v41 = vpop.eup %7257  ;;  %v3479_v48 = vcombine.low %v1319_v8, %v1323_v35 }
 0x1a4   : > { %v3957_v44 = vrot.slane %v3949_v27, %v7791_v9  ;;  %v3486_v52 = vrot.slane %v3476_v36, %v7791_v9  ;;  %v3493_v29 = vrot.slane %v3477_v12, %v7791_v9  ;;  %v7260_v38 = vpop.eup %7259  ;;  %7263 = vpow2.f32 %v7016_v37 }
 0x1a5   : > { %v3964_v47 = vrot.slane %v3950_v2, %v7791_v9  ;;  %v3500_v46 = vrot.slane %v3478_v13, %v7791_v9  ;;  %v7262_v50 = vpop.eup %7261  ;;  %v3507_v25 = vrot.slane %v3479_v48, %v7791_v9  ;;  %7265 = vpow2.f32 %v7015_v40 }
 0x1a6   : > { %v3508_v54 = vcombine.low %v3486_v52, %v3493_v29  ;;  %v1647_v49 = vrot.slane %v7920_v39, %v7765_v53  ;;  %7267 = vrcp.f32 %v8113_v26  ;;  %v1651_v57 = vrot.slane %v7920_v39, %v7768_v59  ;;  %v539_v29 = vpop.xlane.xlu1 %538 }
 0x1a7   : > { %v3965_v56 = vcombine.low %v3957_v44, %v3964_v47  ;;  %v1655_v61 = vrot.slane %v7920_v39, %v7771_v60  ;;  %v815_v3 = vadd.f32 1.0, %v7260_v38  ;;  %v3509_v10 = vcombine.low %v3500_v46, %v3507_v25 }
 0x1a8   : > { %v3516_v31 = vrot.slane %v3508_v54, %v7791_v9  ;;  %v1659_v20 = vrot.slane %v7920_v39, %v7774_v62  ;;  %v814_v16 = vadd.f32 1.0, %v7262_v50  ;;  %v1663_v19 = vrot.slane %v7920_v39, %v7777_v63 }
 0x1a9   : > { %6272 = vperm.xlu0 %7123, %v3965_v56   ;;  %v1667_v26 = vrot.slane %v7920_v39, %v7780_v0  ;;  %v1671_v17 = vrot.slane %v7920_v39, %v7783_v4  ;;  %v3523_v34 = vrot.slane %v3509_v10, %v7791_v9  ;;  %v1675_v22 = vrot.slane %v7920_v39, %v7786_v5 }
 0x1aa   : > { %v4015_v8 = vcombine.low %v1647_v49, %v1651_v57  ;;  %v4016_v27 = vcombine.low %v1655_v61, %v1659_v20  ;;  %v1359_v36 = vrot.slane %v7860_v15, %v7765_v53  ;;  %v1363_v12 = vrot.slane %v7860_v15, %v7768_v59 }
 0x1ab   : > { %v4017_v35 = vcombine.low %v1663_v19, %v1667_v26  ;;  %v1367_v14 = vrot.slane %v7860_v15, %v7771_v60  ;;  %v3524_v2 = vcombine.low %v3516_v31, %v3523_v34  ;;  %v4018_v13 = vcombine.low %v1671_v17, %v1675_v22  ;;  %v537_v34 = vpop.xlane.xlu0 %536 }
 0x1ac   : > { %v4025_v37 = vrot.slane %v4015_v8, %v7791_v9  ;;  %v4032_v40 = vrot.slane %v4016_v27, %v7791_v9  ;;  %v1371_v44 = vrot.slane %v7860_v15, %v7774_v62  ;;  %v1375_v48 = vrot.slane %v7860_v15, %v7777_v63 }
 0x1ad   : > { %v4039_v39 = vrot.slane %v4017_v35, %v7791_v9  ;;  %v1379_v52 = vrot.slane %v7860_v15, %v7780_v0  ;;  %6245 = vperm.xlu1 %7124, %v3524_v2   ;;  %v4046_v38 = vrot.slane %v4018_v13, %v7791_v9  ;;  %v1383_v46 = vrot.slane %v7860_v15, %v7783_v4 }
 0x1ae   : > { %v4047_v47 = vcombine.low %v4025_v37, %v4032_v40  ;;  %v1387_v50 = vrot.slane %v7860_v15, %v7786_v5  ;;  %v7264_v25 = vpop.eup %7263  ;;  %7269 = vrcp.f32 %v815_v3  ;;  %v3574_v54 = vcombine.low %v1359_v36, %v1363_v12 }
 0x1af   : > { %v3575_v49 = vcombine.low %v1367_v14, %v1371_v44  ;;  %v3576_v56 = vcombine.low %v1375_v48, %v1379_v52  ;;  %v7266_v57 = vpop.eup %7265  ;;  %v4048_v61 = vcombine.low %v4039_v39, %v4046_v38  ;;  %v7018_v20 = vmul.f32 -1.442695, %v539_v29 }
 0x1b0   : > { %v4055_v10 = vrot.slane %v4047_v47, %v7791_v9  ;;  %v3577_v31 = vcombine.low %v1383_v46, %v1387_v50  ;;  %v8207_v19 = vpop.eup %7267  ;;  %7271 = vrcp.f32 %v814_v16  ;;  %v3584_v26 = vrot.slane %v3574_v54, %v7791_v9 }
 0x1b1   : > { %v3591_v17 = vrot.slane %v3575_v49, %v7791_v9  ;;  %v3598_v15 = vrot.slane %v3576_v56, %v7791_v9  ;;  %v817_v3 = vadd.f32 1.0, %v7264_v25  ;;  %v4062_v22 = vrot.slane %v4048_v61, %v7791_v9 }
 0x1b2   : > { %v3605_v8 = vrot.slane %v3577_v31, %v7791_v9  ;;  %v7017_v27 = vmul.f32 -1.442695, %v537_v34  ;;  %v816_v35 = vadd.f32 1.0, %v7266_v57  ;;  %v1711_v12 = vrot.slane %v7934_v58, %v7765_v53 }
 0x1b3   : > { %v3606_v36 = vcombine.low %v3584_v26, %v3591_v17  ;;  %v1715_v16 = vrot.slane %v7934_v58, %v7768_v59  ;;  %v4063_v14 = vcombine.low %v4055_v10, %v4062_v22  ;;  %7273 = vpow2.f32 %v7018_v20  ;;  %v543_v20 = vpop.xlane.xlu1 %542 }
 0x1b4   : > { %v3607_v2 = vcombine.low %v3598_v15, %v3605_v8  ;;  %v1719_v13 = vrot.slane %v7934_v58, %v7771_v60  ;;  %7275 = vpow2.f32 %v7017_v27  ;;  %v1723_v40 = vrot.slane %v7934_v58, %v7774_v62 }
 0x1b5   : > { %v3614_v37 = vrot.slane %v3606_v36, %v7791_v9  ;;  %v1727_v39 = vrot.slane %v7934_v58, %v7777_v63  ;;  %6278 = vperm.xlu0 %7123, %v4063_v14   ;;  %v1731_v48 = vrot.slane %v7934_v58, %v7780_v0  ;;  %v1735_v52 = vrot.slane %v7934_v58, %v7783_v4 }
 0x1b6   : > { %v3621_v44 = vrot.slane %v3607_v2, %v7791_v9  ;;  %v1739_v29 = vrot.slane %v7934_v58, %v7786_v5  ;;  %v4113_v38 = vcombine.low %v1711_v12, %v1715_v16  ;;  %v4114_v47 = vcombine.low %v1719_v13, %v1723_v40 }
 0x1b7   : > { %v1423_v46 = vrot.slane %v7876_v30, %v7765_v53  ;;  %v1427_v50 = vrot.slane %v7876_v30, %v7768_v59  ;;  %v4115_v54 = vcombine.low %v1727_v39, %v1731_v48  ;;  %v1431_v56 = vrot.slane %v7876_v30, %v7771_v60 }
 0x1b8   : > { %v3622_v25 = vcombine.low %v3614_v37, %v3621_v44  ;;  %v4116_v49 = vcombine.low %v1735_v52, %v1739_v29  ;;  %v8238_v57 = vpop.eup %7269  ;;  %v4123_v61 = vrot.slane %v4113_v38, %v7791_v9  ;;  %v4130_v58 = vrot.slane %v4114_v47, %v7791_v9  ;;  %v541_v38 = vpop.xlane.xlu0 %540 }
 0x1b9   : > { %v1435_v10 = vrot.slane %v7876_v30, %v7774_v62  ;;  %v1439_v31 = vrot.slane %v7876_v30, %v7777_v63  ;;  %v4137_v26 = vrot.slane %v4115_v54, %v7791_v9  ;;  %v1443_v15 = vrot.slane %v7876_v30, %v7780_v0 }
 0x1ba   : > { %6251 = vperm.xlu1 %7124, %v3622_v25   ;;  %v4144_v17 = vrot.slane %v4116_v49, %v7791_v9  ;;  %v1447_v34 = vrot.slane %v7876_v30, %v7783_v4  ;;  %v8252_v22 = vpop.eup %7271  ;;  %v4145_v8 = vcombine.low %v4123_v61, %v4130_v58  ;;  %v1451_v27 = vrot.slane %v7876_v30, %v7786_v5 }
 0x1bb   : > { %v3672_v36 = vcombine.low %v1423_v46, %v1427_v50  ;;  %v3673_v12 = vcombine.low %v1431_v56, %v1435_v10  ;;  %7277 = vrcp.f32 %v817_v3  ;;  %v3674_v14 = vcombine.low %v1439_v31, %v1443_v15 }
 0x1bc   : > { %v4146_v16 = vcombine.low %v4137_v26, %v4144_v17  ;;  %v7020_v2 = vmul.f32 -1.442695, %v543_v20  ;;  %v4153_v13 = vrot.slane %v4145_v8, %v7791_v9  ;;  %v3675_v37 = vcombine.low %v1447_v34, %v1451_v27 }
 0x1bd   : > { %v3682_v40 = vrot.slane %v3672_v36, %v7791_v9  ;;  %v3689_v39 = vrot.slane %v3673_v12, %v7791_v9  ;;  %v7274_v44 = vpop.eup %7273  ;;  %7279 = vrcp.f32 %v816_v35  ;;  %v3696_v52 = vrot.slane %v3674_v14, %v7791_v9 }
 0x1be   : > { %v4160_v48 = vrot.slane %v4146_v16, %v7791_v9  ;;  %v7276_v30 = vpop.eup %7275  ;;  %v3703_v29 = vrot.slane %v3675_v37, %v7791_v9  ;;  %7281 = vpow2.f32 %v7020_v2  ;;  %v1775_v47 = vrot.slane %v7956_v32, %v7765_v53 }
 0x1bf   : > { %v3704_v3 = vcombine.low %v3682_v40, %v3689_v39  ;;  %v7019_v50 = vmul.f32 -1.442695, %v541_v38  ;;  %v1779_v25 = vrot.slane %v7956_v32, %v7768_v59  ;;  %v1783_v35 = vrot.slane %v7956_v32, %v7771_v60 }
 0x1c0   : > { %v4161_v46 = vcombine.low %v4153_v13, %v4160_v48  ;;  %v819_v54 = vadd.f32 1.0, %v7274_v44  ;;  %v3705_v49 = vcombine.low %v3696_v52, %v3703_v29  ;;  %v1787_v61 = vrot.slane %v7956_v32, %v7774_v62 }
 0x1c1   : > { %v3712_v56 = vrot.slane %v3704_v3, %v7791_v9  ;;  %v818_v58 = vadd.f32 1.0, %v7276_v30  ;;  %v1791_v10 = vrot.slane %v7956_v32, %v7777_v63  ;;  %v1795_v31 = vrot.slane %v7956_v32, %v7780_v0 }
 0x1c2   : > { %6284 = vperm.xlu0 %7123, %v4161_v46   ;;  %v1799_v20 = vrot.slane %v7956_v32, %v7783_v4  ;;  %v3719_v26 = vrot.slane %v3705_v49, %v7791_v9  ;;  %v1803_v17 = vrot.slane %v7956_v32, %v7786_v5  ;;  %v4211_v15 = vcombine.low %v1775_v47, %v1779_v25  ;;  %v547_v25 = vpop.xlane.xlu1 %546 }
 0x1c3   : > { %v4212_v34 = vcombine.low %v1783_v35, %v1787_v61  ;;  %v4213_v8 = vcombine.low %v1791_v10, %v1795_v31  ;;  %v1487_v27 = vrot.slane %v7893_v55, %v7765_v53  ;;  %v1491_v36 = vrot.slane %v7893_v55, %v7768_v59 }
 0x1c4   : > { %v1495_v12 = vrot.slane %v7893_v55, %v7771_v60  ;;  %v3720_v16 = vcombine.low %v3712_v56, %v3719_v26  ;;  %v4214_v14 = vcombine.low %v1799_v20, %v1803_v17  ;;  %v4221_v2 = vrot.slane %v4211_v15, %v7791_v9  ;;  %v545_v26 = vpop.xlane.xlu0 %544 }
 0x1c5   : > { %v4228_v13 = vrot.slane %v4212_v34, %v7791_v9  ;;  %v8288_v37 = vpop.eup %7277  ;;  %v4235_v32 = vrot.slane %v4213_v8, %v7791_v9  ;;  %v1499_v40 = vrot.slane %v7893_v55, %v7774_v62  ;;  %v1503_v39 = vrot.slane %v7893_v55, %v7777_v63 }
 0x1c6   : > { %v1507_v44 = vrot.slane %v7893_v55, %v7780_v0  ;;  %6257 = vperm.xlu1 %7124, %v3720_v16   ;;  %v4242_v48 = vrot.slane %v4214_v14, %v7791_v9  ;;  %v1511_v30 = vrot.slane %v7893_v55, %v7783_v4  ;;  %v1515_v29 = vrot.slane %v7893_v55, %v7786_v5 }
 0x1c7   : > { %v4243_v52 = vcombine.low %v4221_v2, %v4228_v13  ;;  %v8302_v3 = vpop.eup %7279  ;;  %7283 = vpow2.f32 %v7019_v50  ;;  %v3770_v38 = vcombine.low %v1487_v27, %v1491_v36  ;;  %v3771_v47 = vcombine.low %v1495_v12, %v1499_v40 }
 0x1c8   : > { %v3772_v46 = vcombine.low %v1503_v39, %v1507_v44  ;;  %v7282_v35 = vpop.eup %7281  ;;  %v4244_v49 = vcombine.low %v4235_v32, %v4242_v48  ;;  %v3773_v61 = vcombine.low %v1511_v30, %v1515_v29  ;;  %v7022_v10 = vmul.f32 -1.442695, %v547_v25 }
 0x1c9   : > { %v4251_v56 = vrot.slane %v4243_v52, %v7791_v9  ;;  %7285 = vrcp.f32 %v819_v54  ;;  %v3780_v31 = vrot.slane %v3770_v38, %v7791_v9  ;;  %v3787_v20 = vrot.slane %v3771_v47, %v7791_v9 }
 0x1ca   : > { %v3794_v55 = vrot.slane %v3772_v46, %v7791_v9  ;;  %7287 = vrcp.f32 %v818_v58  ;;  %v4258_v50 = vrot.slane %v4244_v49, %v7791_v9  ;;  %v3801_v17 = vrot.slane %v3773_v61, %v7791_v9 }
 0x1cb   : > { %v7021_v15 = vmul.f32 -1.442695, %v545_v26  ;;  %v8310_v34 = vadd.f32 1.0, %v7282_v35  ;;  %v3802_v8 = vcombine.low %v3780_v31, %v3787_v20  ;;  %v1839_v27 = vrot.slane %v7968_v1, %v7765_v53 }
 0x1cc   : > { %v1843_v54 = vrot.slane %v7968_v1, %v7768_v59  ;;  %v4259_v36 = vcombine.low %v4251_v56, %v4258_v50  ;;  %v3803_v12 = vcombine.low %v3794_v55, %v3801_v17  ;;  %7289 = vpow2.f32 %v7022_v10 }
 0x1cd   : > { %v1847_v58 = vrot.slane %v7968_v1, %v7771_v60  ;;  %v3810_v16 = vrot.slane %v3802_v8, %v7791_v9  ;;  %7291 = vpow2.f32 %v7021_v15  ;;  %v1851_v14 = vrot.slane %v7968_v1, %v7774_v62  ;;  %v551_v8 = vpop.xlane.xlu1 %550 }
 0x1ce   : > { %v1855_v2 = vrot.slane %v7968_v1, %v7777_v63  ;;  %6290 = vperm.xlu0 %7123, %v4259_v36   ;;  %v3817_v13 = vrot.slane %v3803_v12, %v7791_v9  ;;  %v1859_v32 = vrot.slane %v7968_v1, %v7780_v0  ;;  %v1863_v40 = vrot.slane %v7968_v1, %v7783_v4 }
 0x1cf   : > { %v1867_v39 = vrot.slane %v7968_v1, %v7786_v5  ;;  %v4309_v44 = vcombine.low %v1839_v27, %v1843_v54  ;;  %v4310_v48 = vcombine.low %v1847_v58, %v1851_v14  ;;  %v1551_v52 = vrot.slane %v7907_v28, %v7765_v53  ;;  %v549_v27 = vpop.xlane.xlu0 %548 }
 0x1d0   : > { %v1555_v30 = vrot.slane %v7907_v28, %v7768_v59  ;;  %v3818_v29 = vcombine.low %v3810_v16, %v3817_v13  ;;  %v4311_v38 = vcombine.low %v1855_v2, %v1859_v32  ;;  %v1559_v46 = vrot.slane %v7907_v28, %v7771_v60 }
 0x1d1   : > { %v4312_v47 = vcombine.low %v1863_v40, %v1867_v39  ;;  %v7284_v25 = vpop.eup %7283  ;;  %v4319_v35 = vrot.slane %v4309_v44, %v7791_v9  ;;  %v4326_v49 = vrot.slane %v4310_v48, %v7791_v9  ;;  %v1563_v1 = vrot.slane %v7907_v28, %v7774_v62 }
 0x1d2   : > { %v1567_v56 = vrot.slane %v7907_v28, %v7777_v63  ;;  %6263 = vperm.xlu1 %7124, %v3818_v29   ;;  %v4333_v61 = vrot.slane %v4311_v38, %v7791_v9  ;;  %v1571_v31 = vrot.slane %v7907_v28, %v7780_v0  ;;  %v1575_v20 = vrot.slane %v7907_v28, %v7783_v4 }
 0x1d3   : > { %v4340_v10 = vrot.slane %v4312_v47, %v7791_v9  ;;  %v8348_v55 = vpop.eup %7285  ;;  %v4341_v26 = vcombine.low %v4319_v35, %v4326_v49  ;;  %v1579_v50 = vrot.slane %v7907_v28, %v7786_v5  ;;  %v3868_v17 = vcombine.low %v1551_v52, %v1555_v30 }
 0x1d4   : > { %v3869_v15 = vcombine.low %v1559_v46, %v1563_v1  ;;  %v8352_v54 = vpop.eup %7287  ;;  %v3870_v12 = vcombine.low %v1567_v56, %v1571_v31  ;;  %v7024_v58 = vmul.f32 -1.442695, %v551_v8  ;;  %v7023_v16 = vmul.f32 -1.442695, %v549_v27 }
 0x1d5   : > { %v4342_v36 = vcombine.low %v4333_v61, %v4340_v10  ;;  %v4349_v14 = vrot.slane %v4341_v26, %v7791_v9  ;;  %v3871_v2 = vcombine.low %v1575_v20, %v1579_v50  ;;  %v3878_v13 = vrot.slane %v3868_v17, %v7791_v9 }
 0x1d6   : > { %v3885_v32 = vrot.slane %v3869_v15, %v7791_v9  ;;  %v7290_v40 = vpop.eup %7289  ;;  %v3892_v39 = vrot.slane %v3870_v12, %v7791_v9  ;;  %7293 = vpow2.f32 %v7024_v58  ;;  %v820_v48 = vadd.f32 1.0, %v7284_v25 }
 0x1d7   : > { %v4356_v28 = vrot.slane %v4342_v36, %v7791_v9  ;;  %v7292_v44 = vpop.eup %7291  ;;  %v3899_v52 = vrot.slane %v3871_v2, %v7791_v9  ;;  %v1903_v29 = vrot.slane %v8014_v45, %v7765_v53  ;;  %7295 = vpow2.f32 %v7023_v16 }
 0x1d8   : > { %v3900_v30 = vcombine.low %v3878_v13, %v3885_v32  ;;  %v1907_v47 = vrot.slane %v8014_v45, %v7768_v59  ;;  %v1911_v46 = vrot.slane %v8014_v45, %v7771_v60  ;;  %7297 = vrcp.f32 %v8310_v34 }
 0x1d9   : > { %v4357_v38 = vcombine.low %v4349_v14, %v4356_v28  ;;  %v3901_v35 = vcombine.low %v3892_v39, %v3899_v52  ;;  %v1915_v25 = vrot.slane %v8014_v45, %v7774_v62  ;;  %v823_v1 = vadd.f32 1.0, %v7290_v40 }
 0x1da   : > { %v3908_v49 = vrot.slane %v3900_v30, %v7791_v9  ;;  %v1919_v56 = vrot.slane %v8014_v45, %v7777_v63  ;;  %v1923_v61 = vrot.slane %v8014_v45, %v7780_v0  ;;  %v1927_v10 = vrot.slane %v8014_v45, %v7783_v4 }
 0x1db   : > { %6296 = vperm.xlu0 %7123, %v4357_v38   ;;  %v3915_v31 = vrot.slane %v3901_v35, %v7791_v9  ;;  %v1931_v34 = vrot.slane %v8014_v45, %v7786_v5  ;;  %v4407_v20 = vcombine.low %v1903_v29, %v1907_v47  ;;  %v4408_v26 = vcombine.low %v1911_v46, %v1915_v25 }
 0x1dc   : > { %v4409_v50 = vcombine.low %v1919_v56, %v1923_v61  ;;  %v1615_v17 = vrot.slane %v7931_v51, %v7765_v53  ;;  %v1619_v15 = vrot.slane %v7931_v51, %v7768_v59  ;;  %v1623_v8 = vrot.slane %v7931_v51, %v7771_v60 }
 0x1dd   : > { %v3916_v27 = vcombine.low %v3908_v49, %v3915_v31  ;;  %v4410_v36 = vcombine.low %v1927_v10, %v1931_v34  ;;  %v4417_v12 = vrot.slane %v4407_v20, %v7791_v9  ;;  %v4424_v58 = vrot.slane %v4408_v26, %v7791_v9  ;;  %v555_v34 = vpop.xlane.xlu1 %554 }
 0x1de   : > { %v4431_v45 = vrot.slane %v4409_v50, %v7791_v9  ;;  %v1627_v16 = vrot.slane %v7931_v51, %v7774_v62  ;;  %v1631_v14 = vrot.slane %v7931_v51, %v7777_v63  ;;  %v1635_v2 = vrot.slane %v7931_v51, %v7780_v0 }
 0x1df   : > { %6269 = vperm.xlu1 %7124, %v3916_v27   ;;  %v4438_v13 = vrot.slane %v4410_v36, %v7791_v9  ;;  %v4439_v32 = vcombine.low %v4417_v12, %v4424_v58  ;;  %v1639_v40 = vrot.slane %v7931_v51, %v7783_v4  ;;  %v1643_v28 = vrot.slane %v7931_v51, %v7786_v5  ;;  %v553_v27 = vpop.xlane.xlu0 %552 }
 0x1e0   : > { %v7294_v39 = vpop.eup %7293  ;;  %v822_v52 = vadd.f32 1.0, %v7292_v44  ;;  %v3966_v30 = vcombine.low %v1615_v17, %v1619_v15  ;;  %v3967_v29 = vcombine.low %v1623_v8, %v1627_v16  ;;  %v3968_v38 = vcombine.low %v1631_v14, %v1635_v2 }
 0x1e1   : > { %7299 = vrcp.f32 %v820_v48  ;;  %v4440_v47 = vcombine.low %v4431_v45, %v4438_v13  ;;  %v4447_v46 = vrot.slane %v4439_v32, %v7791_v9  ;;  %v3969_v35 = vcombine.low %v1639_v40, %v1643_v28  ;;  %v7296_v49 = vpop.eup %7295 }
 0x1e2   : > { %v825_v25 = vadd.f32 1.0, %v7294_v39  ;;  %v3976_v56 = vrot.slane %v3966_v30, %v7791_v9  ;;  %v3983_v61 = vrot.slane %v3967_v29, %v7791_v9  ;;  %v3990_v10 = vrot.slane %v3968_v38, %v7791_v9  ;;  %v8403_v31 = vpop.eup %7297 }
 0x1e3   : > { %7301 = vrcp.f32 %v823_v1  ;;  %v4454_v51 = vrot.slane %v4440_v47, %v7791_v9  ;;  %v3997_v44 = vrot.slane %v3969_v35, %v7791_v9  ;;  %v1967_v20 = vrot.slane %v8060_v43, %v7765_v53 }
 0x1e4   : > { %7303 = vrcp.f32 %v822_v52  ;;  %v3998_v48 = vcombine.low %v3976_v56, %v3983_v61  ;;  %v1971_v26 = vrot.slane %v8060_v43, %v7768_v59  ;;  %v824_v50 = vadd.f32 1.0, %v7296_v49 }
 0x1e5   : > { %v4455_v17 = vcombine.low %v4447_v46, %v4454_v51  ;;  %v3999_v15 = vcombine.low %v3990_v10, %v3997_v44  ;;  %v1975_v8 = vrot.slane %v8060_v43, %v7771_v60  ;;  %7305 = vrcp.f32 %v825_v25  ;;  %v559_v46 = vpop.xlane.xlu1 %558 }
 0x1e6   : > { %v4006_v1 = vrot.slane %v3998_v48, %v7791_v9  ;;  %v1979_v36 = vrot.slane %v8060_v43, %v7774_v62  ;;  %v1983_v12 = vrot.slane %v8060_v43, %v7777_v63  ;;  %v1987_v45 = vrot.slane %v8060_v43, %v7780_v0 }
 0x1e7   : > { %6302 = vperm.xlu0 %7123, %v4455_v17   ;;  %v4013_v58 = vrot.slane %v3999_v15, %v7791_v9  ;;  %v1991_v16 = vrot.slane %v8060_v43, %v7783_v4  ;;  %v1995_v14 = vrot.slane %v8060_v43, %v7786_v5  ;;  %v4505_v2 = vcombine.low %v1967_v20, %v1971_v26  ;;  %v557_v20 = vpop.xlane.xlu0 %556 }
 0x1e8   : > { %v4506_v13 = vcombine.low %v1975_v8, %v1979_v36  ;;  %v1679_v32 = vrot.slane %v7938_v7, %v7765_v53  ;;  %v1683_v40 = vrot.slane %v7938_v7, %v7768_v59  ;;  %v4507_v39 = vcombine.low %v1983_v12, %v1987_v45 }
 0x1e9   : > { %v4014_v28 = vcombine.low %v4006_v1, %v4013_v58  ;;  %v4508_v52 = vcombine.low %v1991_v16, %v1995_v14  ;;  %v1687_v30 = vrot.slane %v7938_v7, %v7771_v60  ;;  %v4515_v29 = vrot.slane %v4505_v2, %v7791_v9 }
 0x1ea   : > { %v4522_v38 = vrot.slane %v4506_v13, %v7791_v9  ;;  %v1691_v43 = vrot.slane %v7938_v7, %v7774_v62  ;;  %v1695_v47 = vrot.slane %v7938_v7, %v7777_v63  ;;  %v4529_v49 = vrot.slane %v4507_v39, %v7791_v9 }
 0x1eb   : > { %v8437_v35 = vpop.eup %7299  ;;  %6275 = vperm.xlu1 %7124, %v4014_v28   ;;  %v4536_v25 = vrot.slane %v4508_v52, %v7791_v9  ;;  %v1699_v56 = vrot.slane %v7938_v7, %v7780_v0  ;;  %v1703_v61 = vrot.slane %v7938_v7, %v7783_v4  ;;  %v1707_v51 = vrot.slane %v7938_v7, %v7786_v5 }
 0x1ec   : > { %v4537_v10 = vcombine.low %v4515_v29, %v4522_v38  ;;  %v4064_v44 = vcombine.low %v1679_v32, %v1683_v40  ;;  %v4065_v48 = vcombine.low %v1687_v30, %v1691_v43  ;;  %v7028_v8 = vmul.f32 -1.442695, %v559_v46 }
 0x1ed   : > { %v8447_v26 = vpop.eup %7301  ;;  %v4538_v17 = vcombine.low %v4529_v49, %v4536_v25  ;;  %v4066_v15 = vcombine.low %v1695_v47, %v1699_v56  ;;  %v7027_v1 = vmul.f32 -1.442695, %v557_v20  ;;  %v4067_v58 = vcombine.low %v1703_v61, %v1707_v51 }
 0x1ee   : > { %v8449_v36 = vpop.eup %7303  ;;  %v4545_v12 = vrot.slane %v4537_v10, %v7791_v9  ;;  %v4074_v45 = vrot.slane %v4064_v44, %v7791_v9  ;;  %v4081_v16 = vrot.slane %v4065_v48, %v7791_v9  ;;  %v7026_v14 = vmul.f32 -1.442695, %v555_v34 }
 0x1ef   : > { %v4552_v7 = vrot.slane %v4538_v17, %v7791_v9  ;;  %v4088_v2 = vrot.slane %v4066_v15, %v7791_v9  ;;  %7307 = vpow2.f32 %v7028_v8  ;;  %v8456_v13 = vpop.eup %7305  ;;  %v4095_v32 = vrot.slane %v4067_v58, %v7791_v9  ;;  %v563_v8 = vpop.xlane.xlu1 %562 }
 0x1f0   : > { %v4096_v40 = vcombine.low %v4074_v45, %v4081_v16  ;;  %7309 = vpow2.f32 %v7027_v1  ;;  %v2031_v28 = vrot.slane %v8117_v11, %v7765_v53  ;;  %v7025_v39 = vmul.f32 -1.442695, %v553_v27 }
 0x1f1   : > { %v4553_v52 = vcombine.low %v4545_v12, %v4552_v7  ;;  %v2035_v30 = vrot.slane %v8117_v11, %v7768_v59  ;;  %v2039_v34 = vrot.slane %v8117_v11, %v7771_v60  ;;  %7311 = vrcp.f32 %v824_v50 }
 0x1f2   : > { %v4097_v29 = vcombine.low %v4088_v2, %v4095_v32  ;;  %v4104_v38 = vrot.slane %v4096_v40, %v7791_v9  ;;  %v2043_v43 = vrot.slane %v8117_v11, %v7774_v62  ;;  %7313 = vpow2.f32 %v7026_v14 }
 0x1f3   : > { %6308 = vperm.xlu0 %7123, %v4553_v52   ;;  %v2047_v47 = vrot.slane %v8117_v11, %v7777_v63  ;;  %v2051_v27 = vrot.slane %v8117_v11, %v7780_v0  ;;  %v2055_v46 = vrot.slane %v8117_v11, %v7783_v4  ;;  %v2059_v50 = vrot.slane %v8117_v11, %v7786_v5 }
 0x1f4   : > { %v4111_v49 = vrot.slane %v4097_v29, %v7791_v9  ;;  %v4603_v25 = vcombine.low %v2031_v28, %v2035_v30  ;;  %v4604_v56 = vcombine.low %v2039_v34, %v2043_v43  ;;  %v1743_v10 = vrot.slane %v7960_v6, %v7765_v53 }
 0x1f5   : > { %v4605_v61 = vcombine.low %v2047_v47, %v2051_v27  ;;  %v1747_v51 = vrot.slane %v7960_v6, %v7768_v59  ;;  %v1751_v44 = vrot.slane %v7960_v6, %v7771_v60  ;;  %v4606_v20 = vcombine.low %v2055_v46, %v2059_v50 }
 0x1f6   : > { %v4112_v48 = vcombine.low %v4104_v38, %v4111_v49  ;;  %v4613_v17 = vrot.slane %v4603_v25, %v7791_v9  ;;  %v4620_v15 = vrot.slane %v4604_v56, %v7791_v9  ;;  %v1755_v1 = vrot.slane %v7960_v6, %v7774_v62  ;;  %v561_v49 = vpop.xlane.xlu0 %560 }
 0x1f7   : > { %v4627_v11 = vrot.slane %v4605_v61, %v7791_v9  ;;  %v1759_v12 = vrot.slane %v7960_v6, %v7777_v63  ;;  %v1763_v58 = vrot.slane %v7960_v6, %v7780_v0  ;;  %v4634_v45 = vrot.slane %v4606_v20, %v7791_v9 }
 0x1f8   : > { %6281 = vperm.xlu1 %7124, %v4112_v48   ;;  %v4635_v16 = vcombine.low %v4613_v17, %v4620_v15  ;;  %v1767_v14 = vrot.slane %v7960_v6, %v7783_v4  ;;  %v1771_v7 = vrot.slane %v7960_v6, %v7786_v5  ;;  %v4162_v32 = vcombine.low %v1743_v10, %v1747_v51 }
 0x1f9   : > { %v7308_v2 = vpop.eup %7307  ;;  %v4163_v40 = vcombine.low %v1751_v44, %v1755_v1  ;;  %v4164_v28 = vcombine.low %v1759_v12, %v1763_v58  ;;  %v7030_v52 = vmul.f32 -1.442695, %v563_v8  ;;  %v4636_v29 = vcombine.low %v4627_v11, %v4634_v45 }
 0x1fa   : > { %v7310_v30 = vpop.eup %7309  ;;  %v829_v34 = vadd.f32 1.0, %v7308_v2  ;;  %v4643_v38 = vrot.slane %v4635_v16, %v7791_v9  ;;  %v4165_v43 = vcombine.low %v1767_v14, %v1771_v7  ;;  %7315 = vpow2.f32 %v7025_v39 }
 0x1fb   : > { %v4172_v47 = vrot.slane %v4162_v32, %v7791_v9  ;;  %v4179_v27 = vrot.slane %v4163_v40, %v7791_v9  ;;  %v4186_v46 = vrot.slane %v4164_v28, %v7791_v9  ;;  %v8501_v6 = vpop.eup %7311  ;;  %v8503_v50 = vadd.f32 1.0, %v7310_v30 }
 0x1fc   : > { %v4650_v25 = vrot.slane %v4636_v29, %v7791_v9  ;;  %v4193_v56 = vrot.slane %v4165_v43, %v7791_v9  ;;  %v7029_v61 = vmul.f32 -1.442695, %v561_v49  ;;  %v8507_v10 = vpop.eup %7313  ;;  %7317 = vrcp.f32 %v829_v34 }
 0x1fd   : > { %v4194_v39 = vcombine.low %v4172_v47, %v4179_v27  ;;  %v2095_v51 = vrot.slane %v8159_v41, %v7765_v53  ;;  %v2099_v44 = vrot.slane %v8159_v41, %v7768_v59  ;;  %7319 = vpow2.f32 %v7030_v52 }
 0x1fe   : > { %v4651_v48 = vcombine.low %v4643_v38, %v4650_v25  ;;  %v4195_v20 = vcombine.low %v4186_v46, %v4193_v56  ;;  %v2103_v17 = vrot.slane %v8159_v41, %v7771_v60  ;;  %7321 = vpow2.f32 %v7029_v61  ;;  %v567_v38 = vpop.xlane.xlu1 %566 }
 0x1ff   : > { %v4202_v15 = vrot.slane %v4194_v39, %v7791_v9  ;;  %v2107_v8 = vrot.slane %v8159_v41, %v7774_v62  ;;  %v2111_v11 = vrot.slane %v8159_v41, %v7777_v63  ;;  %v2115_v12 = vrot.slane %v8159_v41, %v7780_v0 }
 0x200   : > { %6314 = vperm.xlu0 %7123, %v4651_v48   ;;  %v4209_v1 = vrot.slane %v4195_v20, %v7791_v9  ;;  %v2119_v58 = vrot.slane %v8159_v41, %v7783_v4  ;;  %v2123_v45 = vrot.slane %v8159_v41, %v7786_v5  ;;  %v4701_v16 = vcombine.low %v2095_v51, %v2099_v44  ;;  %v565_v51 = vpop.xlane.xlu0 %564 }
 0x201   : > { %v4702_v14 = vcombine.low %v2103_v17, %v2107_v8  ;;  %v1807_v7 = vrot.slane %v7978_v18, %v7765_v53  ;;  %v1811_v2 = vrot.slane %v7978_v18, %v7768_v59  ;;  %v4703_v40 = vcombine.low %v2111_v11, %v2115_v12 }
 0x202   : > { %v4210_v32 = vcombine.low %v4202_v15, %v4209_v1  ;;  %v4704_v28 = vcombine.low %v2119_v58, %v2123_v45  ;;  %v1815_v52 = vrot.slane %v7978_v18, %v7771_v60  ;;  %v4711_v30 = vrot.slane %v4701_v16, %v7791_v9 }
 0x203   : > { %v4718_v34 = vrot.slane %v4702_v14, %v7791_v9  ;;  %v1819_v41 = vrot.slane %v7978_v18, %v7774_v62  ;;  %v1823_v29 = vrot.slane %v7978_v18, %v7777_v63  ;;  %v4725_v43 = vrot.slane %v4703_v40, %v7791_v9 }
 0x204   : > { %6287 = vperm.xlu1 %7124, %v4210_v32   ;;  %v4732_v47 = vrot.slane %v4704_v28, %v7791_v9  ;;  %v1827_v27 = vrot.slane %v7978_v18, %v7780_v0  ;;  %v1831_v46 = vrot.slane %v7978_v18, %v7783_v4  ;;  %v8545_v49 = vpop.eup %7315  ;;  %v1835_v56 = vrot.slane %v7978_v18, %v7786_v5 }
 0x205   : > { %v4733_v25 = vcombine.low %v4711_v30, %v4718_v34  ;;  %v4260_v61 = vcombine.low %v1807_v7, %v1811_v2  ;;  %v4261_v39 = vcombine.low %v1815_v52, %v1819_v41  ;;  %v7032_v20 = vmul.f32 -1.442695, %v567_v38 }
 0x206   : > { %v4734_v44 = vcombine.low %v4725_v43, %v4732_v47  ;;  %v4262_v48 = vcombine.low %v1823_v29, %v1827_v27  ;;  %v7031_v17 = vmul.f32 -1.442695, %v565_v51  ;;  %v8549_v15 = vpop.eup %7317  ;;  %v4263_v11 = vcombine.low %v1831_v46, %v1835_v56 }
 0x207   : > { %v4741_v8 = vrot.slane %v4733_v25, %v7791_v9  ;;  %v4270_v1 = vrot.slane %v4260_v61, %v7791_v9  ;;  %v4277_v12 = vrot.slane %v4261_v39, %v7791_v9  ;;  %v7320_v58 = vpop.eup %7319  ;;  %7323 = vpow2.f32 %v7032_v20 }
 0x208   : > { %v4748_v45 = vrot.slane %v4734_v44, %v7791_v9  ;;  %v4284_v18 = vrot.slane %v4262_v48, %v7791_v9  ;;  %v7322_v16 = vpop.eup %7321  ;;  %v4291_v14 = vrot.slane %v4263_v11, %v7791_v9  ;;  %7325 = vpow2.f32 %v7031_v17 }
 0x209   : > { %v4292_v7 = vcombine.low %v4270_v1, %v4277_v12  ;;  %v2159_v2 = vrot.slane %v8238_v57, %v7765_v53  ;;  %7327 = vrcp.f32 %v8503_v50  ;;  %v2163_v40 = vrot.slane %v8238_v57, %v7768_v59  ;;  %v571_v12 = vpop.xlane.xlu1 %570 }
 0x20a   : > { %v4749_v32 = vcombine.low %v4741_v8, %v4748_v45  ;;  %v2167_v28 = vrot.slane %v8238_v57, %v7771_v60  ;;  %v831_v52 = vadd.f32 1.0, %v7320_v58  ;;  %v4293_v30 = vcombine.low %v4284_v18, %v4291_v14 }
 0x20b   : > { %v4300_v34 = vrot.slane %v4292_v7, %v7791_v9  ;;  %v2171_v41 = vrot.slane %v8238_v57, %v7774_v62  ;;  %v830_v29 = vadd.f32 1.0, %v7322_v16  ;;  %v2175_v38 = vrot.slane %v8238_v57, %v7777_v63 }
 0x20c   : > { %6320 = vperm.xlu0 %7123, %v4749_v32   ;;  %v2179_v50 = vrot.slane %v8238_v57, %v7780_v0  ;;  %v2183_v43 = vrot.slane %v8238_v57, %v7783_v4  ;;  %v4307_v47 = vrot.slane %v4293_v30, %v7791_v9  ;;  %v2187_v27 = vrot.slane %v8238_v57, %v7786_v5 }
 0x20d   : > { %v4799_v46 = vcombine.low %v2159_v2, %v2163_v40  ;;  %v4800_v25 = vcombine.low %v2167_v28, %v2171_v41  ;;  %v1871_v61 = vrot.slane %v8056_v24, %v7765_v53  ;;  %v1875_v39 = vrot.slane %v8056_v24, %v7768_v59 }
 0x20e   : > { %v4801_v56 = vcombine.low %v2175_v38, %v2179_v50  ;;  %v1879_v51 = vrot.slane %v8056_v24, %v7771_v60  ;;  %v4308_v44 = vcombine.low %v4300_v34, %v4307_v47  ;;  %v4802_v48 = vcombine.low %v2183_v43, %v2187_v27  ;;  %v569_v47 = vpop.xlane.xlu0 %568 }
 0x20f   : > { %v4809_v20 = vrot.slane %v4799_v46, %v7791_v9  ;;  %v4816_v17 = vrot.slane %v4800_v25, %v7791_v9  ;;  %v1883_v8 = vrot.slane %v8056_v24, %v7774_v62  ;;  %v1887_v11 = vrot.slane %v8056_v24, %v7777_v63 }
 0x210   : > { %v4823_v57 = vrot.slane %v4801_v56, %v7791_v9  ;;  %v1891_v1 = vrot.slane %v8056_v24, %v7780_v0  ;;  %6293 = vperm.xlu1 %7124, %v4308_v44   ;;  %v4830_v58 = vrot.slane %v4802_v48, %v7791_v9  ;;  %v1895_v18 = vrot.slane %v8056_v24, %v7783_v4 }
 0x211   : > { %v4831_v45 = vcombine.low %v4809_v20, %v4816_v17  ;;  %v1899_v16 = vrot.slane %v8056_v24, %v7786_v5  ;;  %v7324_v14 = vpop.eup %7323  ;;  %7329 = vrcp.f32 %v831_v52  ;;  %v4358_v7 = vcombine.low %v1871_v61, %v1875_v39 }
 0x212   : > { %v4359_v2 = vcombine.low %v1879_v51, %v1883_v8  ;;  %v4360_v32 = vcombine.low %v1887_v11, %v1891_v1  ;;  %v7326_v40 = vpop.eup %7325  ;;  %v4832_v28 = vcombine.low %v4823_v57, %v4830_v58  ;;  %v7034_v41 = vmul.f32 -1.442695, %v571_v12 }
 0x213   : > { %v4839_v30 = vrot.slane %v4831_v45, %v7791_v9  ;;  %v4361_v34 = vcombine.low %v1895_v18, %v1899_v16  ;;  %v8597_v38 = vpop.eup %7327  ;;  %7331 = vrcp.f32 %v830_v29  ;;  %v4368_v50 = vrot.slane %v4358_v7, %v7791_v9 }
 0x214   : > { %v4375_v43 = vrot.slane %v4359_v2, %v7791_v9  ;;  %v4382_v24 = vrot.slane %v4360_v32, %v7791_v9  ;;  %v833_v52 = vadd.f32 1.0, %v7324_v14  ;;  %v4846_v27 = vrot.slane %v4832_v28, %v7791_v9 }
 0x215   : > { %v4389_v46 = vrot.slane %v4361_v34, %v7791_v9  ;;  %v7033_v25 = vmul.f32 -1.442695, %v569_v47  ;;  %v832_v56 = vadd.f32 1.0, %v7326_v40  ;;  %v2223_v39 = vrot.slane %v8288_v37, %v7765_v53 }
 0x216   : > { %v4390_v61 = vcombine.low %v4368_v50, %v4375_v43  ;;  %v2227_v29 = vrot.slane %v8288_v37, %v7768_v59  ;;  %v4847_v51 = vcombine.low %v4839_v30, %v4846_v27  ;;  %7333 = vpow2.f32 %v7034_v41  ;;  %v575_v41 = vpop.xlane.xlu1 %574 }
 0x217   : > { %v4391_v44 = vcombine.low %v4382_v24, %v4389_v46  ;;  %v2231_v48 = vrot.slane %v8288_v37, %v7771_v60  ;;  %7335 = vpow2.f32 %v7033_v25  ;;  %v2235_v17 = vrot.slane %v8288_v37, %v7774_v62 }
 0x218   : > { %v4398_v20 = vrot.slane %v4390_v61, %v7791_v9  ;;  %v2239_v57 = vrot.slane %v8288_v37, %v7777_v63  ;;  %6326 = vperm.xlu0 %7123, %v4847_v51   ;;  %v2243_v11 = vrot.slane %v8288_v37, %v7780_v0  ;;  %v2247_v1 = vrot.slane %v8288_v37, %v7783_v4 }
 0x219   : > { %v4405_v8 = vrot.slane %v4391_v44, %v7791_v9  ;;  %v2251_v12 = vrot.slane %v8288_v37, %v7786_v5  ;;  %v4897_v58 = vcombine.low %v2223_v39, %v2227_v29  ;;  %v4898_v45 = vcombine.low %v2231_v48, %v2235_v17 }
 0x21a   : > { %v1935_v18 = vrot.slane %v8108_v21, %v7765_v53  ;;  %v1939_v16 = vrot.slane %v8108_v21, %v7768_v59  ;;  %v4899_v7 = vcombine.low %v2239_v57, %v2243_v11  ;;  %v1943_v32 = vrot.slane %v8108_v21, %v7771_v60 }
 0x21b   : > { %v4406_v14 = vcombine.low %v4398_v20, %v4405_v8  ;;  %v4900_v2 = vcombine.low %v2247_v1, %v2251_v12  ;;  %v8628_v40 = vpop.eup %7329  ;;  %v4907_v28 = vrot.slane %v4897_v58, %v7791_v9  ;;  %v4914_v37 = vrot.slane %v4898_v45, %v7791_v9  ;;  %v573_v58 = vpop.xlane.xlu0 %572 }
 0x21c   : > { %v1947_v30 = vrot.slane %v8108_v21, %v7774_v62  ;;  %v1951_v34 = vrot.slane %v8108_v21, %v7777_v63  ;;  %v4921_v50 = vrot.slane %v4899_v7, %v7791_v9  ;;  %v1955_v24 = vrot.slane %v8108_v21, %v7780_v0 }
 0x21d   : > { %6299 = vperm.xlu1 %7124, %v4406_v14   ;;  %v4928_v43 = vrot.slane %v4900_v2, %v7791_v9  ;;  %v1959_v47 = vrot.slane %v8108_v21, %v7783_v4  ;;  %v8642_v27 = vpop.eup %7331  ;;  %v4929_v46 = vcombine.low %v4907_v28, %v4914_v37  ;;  %v1963_v25 = vrot.slane %v8108_v21, %v7786_v5 }
 0x21e   : > { %v4456_v61 = vcombine.low %v1935_v18, %v1939_v16  ;;  %v4457_v39 = vcombine.low %v1943_v32, %v1947_v30  ;;  %7337 = vrcp.f32 %v833_v52  ;;  %v4458_v51 = vcombine.low %v1951_v34, %v1955_v24 }
 0x21f   : > { %v4930_v29 = vcombine.low %v4921_v50, %v4928_v43  ;;  %v7036_v44 = vmul.f32 -1.442695, %v575_v41  ;;  %v4937_v48 = vrot.slane %v4929_v46, %v7791_v9  ;;  %v4459_v20 = vcombine.low %v1959_v47, %v1963_v25 }
 0x220   : > { %v4466_v17 = vrot.slane %v4456_v61, %v7791_v9  ;;  %v4473_v57 = vrot.slane %v4457_v39, %v7791_v9  ;;  %v7334_v8 = vpop.eup %7333  ;;  %7339 = vrcp.f32 %v832_v56  ;;  %v4480_v1 = vrot.slane %v4458_v51, %v7791_v9 }
 0x221   : > { %v4944_v11 = vrot.slane %v4930_v29, %v7791_v9  ;;  %v7336_v21 = vpop.eup %7335  ;;  %v4487_v12 = vrot.slane %v4459_v20, %v7791_v9  ;;  %7341 = vpow2.f32 %v7036_v44  ;;  %v2287_v45 = vrot.slane %v8348_v55, %v7765_v53 }
 0x222   : > { %v4488_v52 = vcombine.low %v4466_v17, %v4473_v57  ;;  %v7035_v16 = vmul.f32 -1.442695, %v573_v58  ;;  %v2291_v14 = vrot.slane %v8348_v55, %v7768_v59  ;;  %v2295_v56 = vrot.slane %v8348_v55, %v7771_v60 }
 0x223   : > { %v4945_v18 = vcombine.low %v4937_v48, %v4944_v11  ;;  %v835_v7 = vadd.f32 1.0, %v7334_v8  ;;  %v4489_v2 = vcombine.low %v4480_v1, %v4487_v12  ;;  %v2299_v28 = vrot.slane %v8348_v55, %v7774_v62  ;;  %v577_v11 = vpop.xlane.xlu0 %576 }
 0x224   : > { %v4496_v32 = vrot.slane %v4488_v52, %v7791_v9  ;;  %v834_v37 = vadd.f32 1.0, %v7336_v21  ;;  %v2303_v30 = vrot.slane %v8348_v55, %v7777_v63  ;;  %v2307_v34 = vrot.slane %v8348_v55, %v7780_v0 }
 0x225   : > { %6332 = vperm.xlu0 %7123, %v4945_v18   ;;  %v2311_v41 = vrot.slane %v8348_v55, %v7783_v4  ;;  %v4503_v50 = vrot.slane %v4489_v2, %v7791_v9  ;;  %v2315_v43 = vrot.slane %v8348_v55, %v7786_v5  ;;  %v4995_v24 = vcombine.low %v2287_v45, %v2291_v14 }
 0x226   : > { %v4996_v47 = vcombine.low %v2295_v56, %v2299_v28  ;;  %v4997_v46 = vcombine.low %v2303_v30, %v2307_v34  ;;  %v1999_v25 = vrot.slane %v8155_v23, %v7765_v53  ;;  %v2003_v61 = vrot.slane %v8155_v23, %v7768_v59 }
 0x227   : > { %v2007_v39 = vrot.slane %v8155_v23, %v7771_v60  ;;  %v4504_v29 = vcombine.low %v4496_v32, %v4503_v50  ;;  %v4998_v51 = vcombine.low %v2311_v41, %v2315_v43  ;;  %v5005_v44 = vrot.slane %v4995_v24, %v7791_v9 }
 0x228   : > { %v5012_v48 = vrot.slane %v4996_v47, %v7791_v9  ;;  %v8678_v20 = vpop.eup %7337  ;;  %v5019_v55 = vrot.slane %v4997_v46, %v7791_v9  ;;  %v2011_v17 = vrot.slane %v8155_v23, %v7774_v62  ;;  %v2015_v57 = vrot.slane %v8155_v23, %v7777_v63 }
 0x229   : > { %v2019_v8 = vrot.slane %v8155_v23, %v7780_v0  ;;  %6305 = vperm.xlu1 %7124, %v4504_v29   ;;  %v5026_v1 = vrot.slane %v4998_v51, %v7791_v9  ;;  %v2023_v12 = vrot.slane %v8155_v23, %v7783_v4  ;;  %v2027_v52 = vrot.slane %v8155_v23, %v7786_v5 }
 0x22a   : > { %v5027_v21 = vcombine.low %v5005_v44, %v5012_v48  ;;  %v8692_v58 = vpop.eup %7339  ;;  %7343 = vpow2.f32 %v7035_v16  ;;  %v4554_v45 = vcombine.low %v1999_v25, %v2003_v61  ;;  %v4555_v18 = vcombine.low %v2007_v39, %v2011_v17 }
 0x22b   : > { %v4556_v14 = vcombine.low %v2015_v57, %v2019_v8  ;;  %v7342_v56 = vpop.eup %7341  ;;  %v5028_v2 = vcombine.low %v5019_v55, %v5026_v1  ;;  %v4557_v28 = vcombine.low %v2023_v12, %v2027_v52  ;;  %v7037_v30 = vmul.f32 -1.442695, %v577_v11 }
 0x22c   : > { %v5035_v32 = vrot.slane %v5027_v21, %v7791_v9  ;;  %7345 = vrcp.f32 %v835_v7  ;;  %v4564_v34 = vrot.slane %v4554_v45, %v7791_v9  ;;  %v4571_v41 = vrot.slane %v4555_v18, %v7791_v9 }
 0x22d   : > { %v4578_v50 = vrot.slane %v4556_v14, %v7791_v9  ;;  %7347 = vrcp.f32 %v834_v37  ;;  %v5042_v23 = vrot.slane %v5028_v2, %v7791_v9  ;;  %v4585_v16 = vrot.slane %v4557_v28, %v7791_v9  ;;  %v579_v14 = vpop.xlane.xlu1 %578 }
 0x22e   : > { %v2351_v43 = vrot.slane %v8403_v31, %v7765_v53  ;;  %v8702_v24 = vadd.f32 1.0, %v7342_v56  ;;  %v4586_v47 = vcombine.low %v4564_v34, %v4571_v41  ;;  %v2355_v7 = vrot.slane %v8403_v31, %v7768_v59 }
 0x22f   : > { %v2359_v46 = vrot.slane %v8403_v31, %v7771_v60  ;;  %v5043_v25 = vcombine.low %v5035_v32, %v5042_v23  ;;  %v4587_v61 = vcombine.low %v4578_v50, %v4585_v16  ;;  %7349 = vpow2.f32 %v7037_v30 }
 0x230   : > { %v2363_v37 = vrot.slane %v8403_v31, %v7774_v62  ;;  %v4594_v39 = vrot.slane %v4586_v47, %v7791_v9  ;;  %v2367_v29 = vrot.slane %v8403_v31, %v7777_v63  ;;  %v2371_v51 = vrot.slane %v8403_v31, %v7780_v0 }
 0x231   : > { %v2375_v44 = vrot.slane %v8403_v31, %v7783_v4  ;;  %6338 = vperm.xlu0 %7123, %v5043_v25   ;;  %v4601_v48 = vrot.slane %v4587_v61, %v7791_v9  ;;  %v2379_v55 = vrot.slane %v8403_v31, %v7786_v5  ;;  %v5093_v17 = vcombine.low %v2351_v43, %v2355_v7 }
 0x232   : > { %v5094_v57 = vcombine.low %v2359_v46, %v2363_v37  ;;  %v5095_v8 = vcombine.low %v2367_v29, %v2371_v51  ;;  %v2063_v11 = vrot.slane %v8207_v19, %v7765_v53  ;;  %v2067_v1 = vrot.slane %v8207_v19, %v7768_v59 }
 0x233   : > { %v2071_v21 = vrot.slane %v8207_v19, %v7771_v60  ;;  %v4602_v12 = vcombine.low %v4594_v39, %v4601_v48  ;;  %v5096_v52 = vcombine.low %v2375_v44, %v2379_v55  ;;  %v5103_v45 = vrot.slane %v5093_v17, %v7791_v9 }
 0x234   : > { %v5110_v18 = vrot.slane %v5094_v57, %v7791_v9  ;;  %v7344_v31 = vpop.eup %7343  ;;  %v5117_v56 = vrot.slane %v5095_v8, %v7791_v9  ;;  %v2075_v2 = vrot.slane %v8207_v19, %v7774_v62  ;;  %v2079_v32 = vrot.slane %v8207_v19, %v7777_v63 }
 0x235   : > { %v2083_v28 = vrot.slane %v8207_v19, %v7780_v0  ;;  %6311 = vperm.xlu1 %7124, %v4602_v12   ;;  %v5124_v30 = vrot.slane %v5096_v52, %v7791_v9  ;;  %v2087_v41 = vrot.slane %v8207_v19, %v7783_v4  ;;  %v2091_v50 = vrot.slane %v8207_v19, %v7786_v5  ;;  %v581_v12 = vpop.xlane.xlu0 %580 }
 0x236   : > { %v5125_v34 = vcombine.low %v5103_v45, %v5110_v18  ;;  %v8740_v23 = vpop.eup %7345  ;;  %v4652_v16 = vcombine.low %v2063_v11, %v2067_v1  ;;  %v4653_v43 = vcombine.low %v2071_v21, %v2075_v2  ;;  %v7038_v7 = vmul.f32 -1.442695, %v579_v14 }
 0x237   : > { %v4654_v47 = vcombine.low %v2079_v32, %v2083_v28  ;;  %v8742_v46 = vpop.eup %7347  ;;  %v5126_v25 = vcombine.low %v5117_v56, %v5124_v30  ;;  %v4655_v37 = vcombine.low %v2087_v41, %v2091_v50  ;;  %v2127_v39 = vrot.slane %v8252_v22, %v7765_v53 }
 0x238   : > { %v5133_v61 = vrot.slane %v5125_v34, %v7791_v9  ;;  %v4662_v29 = vrot.slane %v4652_v16, %v7791_v9  ;;  %v4669_v51 = vrot.slane %v4653_v43, %v7791_v9  ;;  %7351 = vpow2.f32 %v7038_v7  ;;  %v583_v7 = vpop.xlane.xlu1 %582 }
 0x239   : > { %v4676_v19 = vrot.slane %v4654_v47, %v7791_v9  ;;  %v7350_v44 = vpop.eup %7349  ;;  %v5140_v48 = vrot.slane %v5126_v25, %v7791_v9  ;;  %v4683_v55 = vrot.slane %v4655_v37, %v7791_v9  ;;  %v2131_v17 = vrot.slane %v8252_v22, %v7768_v59 }
 0x23a   : > { %v2135_v57 = vrot.slane %v8252_v22, %v7771_v60  ;;  %v8756_v8 = vadd.f32 1.0, %v7344_v31  ;;  %v4684_v11 = vcombine.low %v4662_v29, %v4669_v51  ;;  %v2139_v1 = vrot.slane %v8252_v22, %v7774_v62 }
 0x23b   : > { %v2143_v21 = vrot.slane %v8252_v22, %v7777_v63  ;;  %v5141_v52 = vcombine.low %v5133_v61, %v5140_v48  ;;  %v4685_v45 = vcombine.low %v4676_v19, %v4683_v55  ;;  %v2147_v18 = vrot.slane %v8252_v22, %v7780_v0 }
 0x23c   : > { %v2151_v14 = vrot.slane %v8252_v22, %v7783_v4  ;;  %7353 = vrcp.f32 %v8702_v24  ;;  %v4692_v31 = vrot.slane %v4684_v11, %v7791_v9  ;;  %v2155_v56 = vrot.slane %v8252_v22, %v7786_v5 }
 0x23d   : > { %v4750_v2 = vcombine.low %v2127_v39, %v2131_v17  ;;  %6344 = vperm.xlu0 %7123, %v5141_v52   ;;  %v4699_v32 = vrot.slane %v4685_v45, %v7791_v9  ;;  %v4751_v28 = vcombine.low %v2135_v57, %v2139_v1  ;;  %v4752_v30 = vcombine.low %v2143_v21, %v2147_v18 }
 0x23e   : > { %v7039_v34 = vmul.f32 -1.442695, %v581_v12  ;;  %v4753_v41 = vcombine.low %v2151_v14, %v2155_v56  ;;  %v2191_v16 = vrot.slane %v8302_v3, %v7765_v53  ;;  %v2195_v24 = vrot.slane %v8302_v3, %v7768_v59 }
 0x23f   : > { %v4760_v50 = vrot.slane %v4750_v2, %v7791_v9  ;;  %v4700_v43 = vcombine.low %v4692_v31, %v4699_v32  ;;  %v4767_v47 = vrot.slane %v4751_v28, %v7791_v9  ;;  %v4774_v22 = vrot.slane %v4752_v30, %v7791_v9 }
 0x240   : > { %7355 = vpow2.f32 %v7039_v34  ;;  %v4781_v25 = vrot.slane %v4753_v41, %v7791_v9  ;;  %v2199_v61 = vrot.slane %v8302_v3, %v7771_v60  ;;  %v2203_v37 = vrot.slane %v8302_v3, %v7774_v62 }
 0x241   : > { %v2207_v39 = vrot.slane %v8302_v3, %v7777_v63  ;;  %6317 = vperm.xlu1 %7124, %v4700_v43   ;;  %v4782_v29 = vcombine.low %v4760_v50, %v4767_v47  ;;  %v2211_v51 = vrot.slane %v8302_v3, %v7780_v0  ;;  %v2215_v19 = vrot.slane %v8302_v3, %v7783_v4 }
 0x242   : > { %v2219_v48 = vrot.slane %v8302_v3, %v7786_v5  ;;  %v7352_v55 = vpop.eup %7351  ;;  %v4783_v17 = vcombine.low %v4774_v22, %v4781_v25  ;;  %v4848_v57 = vcombine.low %v2191_v16, %v2195_v24  ;;  %v4849_v11 = vcombine.low %v2199_v61, %v2203_v37 }
 0x243   : > { %v7040_v1 = vmul.f32 -1.442695, %v583_v7  ;;  %v838_v21 = vadd.f32 1.0, %v7350_v44  ;;  %v4790_v12 = vrot.slane %v4782_v29, %v7791_v9  ;;  %v4850_v52 = vcombine.low %v2207_v39, %v2211_v51  ;;  %v585_v51 = vpop.xlane.xlu0 %584 }
 0x244   : > { %v4851_v45 = vcombine.low %v2215_v19, %v2219_v48  ;;  %v4797_v18 = vrot.slane %v4783_v17, %v7791_v9  ;;  %v4858_v14 = vrot.slane %v4848_v57, %v7791_v9  ;;  %v4865_v31 = vrot.slane %v4849_v11, %v7791_v9 }
 0x245   : > { %7357 = vpow2.f32 %v7040_v1  ;;  %v839_v56 = vadd.f32 1.0, %v7352_v55  ;;  %v4872_v3 = vrot.slane %v4850_v52, %v7791_v9  ;;  %v2255_v32 = vrot.slane %v8352_v54, %v7765_v53 }
 0x246   : > { %v4879_v2 = vrot.slane %v4851_v45, %v7791_v9  ;;  %v8799_v44 = vpop.eup %7353  ;;  %v4798_v28 = vcombine.low %v4790_v12, %v4797_v18  ;;  %v4880_v30 = vcombine.low %v4858_v14, %v4865_v31  ;;  %v2259_v34 = vrot.slane %v8352_v54, %v7768_v59 }
 0x247   : > { %v2263_v41 = vrot.slane %v8352_v54, %v7771_v60  ;;  %v2267_v16 = vrot.slane %v8352_v54, %v7774_v62  ;;  %v2271_v24 = vrot.slane %v8352_v54, %v7777_v63  ;;  %v2275_v43 = vrot.slane %v8352_v54, %v7780_v0 }
 0x248   : > { %v4881_v50 = vcombine.low %v4872_v3, %v4879_v2  ;;  %6323 = vperm.xlu1 %7124, %v4798_v28   ;;  %v4888_v47 = vrot.slane %v4880_v30, %v7791_v9  ;;  %v2279_v22 = vrot.slane %v8352_v54, %v7783_v4  ;;  %v2283_v7 = vrot.slane %v8352_v54, %v7786_v5 }
 0x249   : > { %v4946_v25 = vcombine.low %v2255_v32, %v2259_v34  ;;  %7359 = vrcp.f32 %v8756_v8  ;;  %v4947_v39 = vcombine.low %v2263_v41, %v2267_v16  ;;  %v4948_v29 = vcombine.low %v2271_v24, %v2275_v43 }
 0x24a   : > { %v7356_v61 = vpop.eup %7355  ;;  %v4895_v37 = vrot.slane %v4881_v50, %v7791_v9  ;;  %7361 = vrcp.f32 %v838_v21  ;;  %v4949_v19 = vcombine.low %v2279_v22, %v2283_v7  ;;  %v2607_v55 = vrot.slane %v8549_v15, %v7765_v53 }
 0x24b   : > { %v4956_v48 = vrot.slane %v4946_v25, %v7791_v9  ;;  %7363 = vrcp.f32 %v839_v56  ;;  %v4963_v54 = vrot.slane %v4947_v39, %v7791_v9  ;;  %v4970_v57 = vrot.slane %v4948_v29, %v7791_v9 }
 0x24c   : > { %v4896_v17 = vcombine.low %v4888_v47, %v4895_v37  ;;  %v4977_v8 = vrot.slane %v4949_v19, %v7791_v9  ;;  %v7041_v11 = vmul.f32 -1.442695, %v585_v51  ;;  %v2611_v1 = vrot.slane %v8549_v15, %v7768_v59 }
 0x24d   : > { %v2615_v21 = vrot.slane %v8549_v15, %v7771_v60  ;;  %v4978_v12 = vcombine.low %v4956_v48, %v4963_v54  ;;  %v2619_v52 = vrot.slane %v8549_v15, %v7774_v62  ;;  %v2623_v45 = vrot.slane %v8549_v15, %v7777_v63 }
 0x24e   : > { %6329 = vperm.xlu1 %7124, %v4896_v17   ;;  %v2627_v18 = vrot.slane %v8549_v15, %v7780_v0  ;;  %v4979_v31 = vcombine.low %v4970_v57, %v4977_v8  ;;  %v2631_v56 = vrot.slane %v8549_v15, %v7783_v4  ;;  %v2635_v3 = vrot.slane %v8549_v15, %v7786_v5 }
 0x24f   : > { %v7358_v14 = vpop.eup %7357  ;;  %v5485_v2 = vcombine.low %v2607_v55, %v2611_v1  ;;  %v840_v32 = vadd.f32 1.0, %v7356_v61  ;;  %v4986_v28 = vrot.slane %v4978_v12, %v7791_v9  ;;  %v5486_v30 = vcombine.low %v2615_v21, %v2619_v52 }
 0x250   : > { %v5487_v34 = vcombine.low %v2623_v45, %v2627_v18  ;;  %v4993_v41 = vrot.slane %v4979_v31, %v7791_v9  ;;  %v5488_v50 = vcombine.low %v2631_v56, %v2635_v3  ;;  %v2319_v24 = vrot.slane %v8437_v35, %v7765_v53 }
 0x251   : > { %v5495_v16 = vrot.slane %v5485_v2, %v7791_v9  ;;  %v841_v43 = vadd.f32 1.0, %v7358_v14  ;;  %v5502_v47 = vrot.slane %v5486_v30, %v7791_v9  ;;  %v2323_v15 = vrot.slane %v8437_v35, %v7768_v59 }
 0x252   : > { %v5509_v22 = vrot.slane %v5487_v34, %v7791_v9  ;;  %v4994_v7 = vcombine.low %v4986_v28, %v4993_v41  ;;  %v5516_v25 = vrot.slane %v5488_v50, %v7791_v9  ;;  %v2327_v61 = vrot.slane %v8437_v35, %v7771_v60 }
 0x253   : > { %v2331_v37 = vrot.slane %v8437_v35, %v7774_v62  ;;  %v8852_v39 = vpop.eup %7359  ;;  %v5517_v29 = vcombine.low %v5495_v16, %v5502_v47  ;;  %v2335_v51 = vrot.slane %v8437_v35, %v7777_v63  ;;  %v2339_v19 = vrot.slane %v8437_v35, %v7780_v0 }
 0x254   : > { %v2343_v48 = vrot.slane %v8437_v35, %v7783_v4  ;;  %v8860_v55 = vpop.eup %7361  ;;  %6335 = vperm.xlu1 %7124, %v4994_v7   ;;  %v5518_v17 = vcombine.low %v5509_v22, %v5516_v25  ;;  %v2347_v54 = vrot.slane %v8437_v35, %v7786_v5  ;;  %v5044_v57 = vcombine.low %v2319_v24, %v2323_v15 }
 0x255   : > { %v5045_v8 = vcombine.low %v2327_v61, %v2331_v37  ;;  %v8864_v1 = vpop.eup %7363  ;;  %7365 = vpow2.f32 %v7041_v11  ;;  %v5525_v21 = vrot.slane %v5517_v29, %v7791_v9  ;;  %v5046_v12 = vcombine.low %v2335_v51, %v2339_v19 }
 0x256   : > { %v5532_v52 = vrot.slane %v5518_v17, %v7791_v9  ;;  %v5047_v45 = vcombine.low %v2343_v48, %v2347_v54  ;;  %v5054_v18 = vrot.slane %v5044_v57, %v7791_v9  ;;  %v2671_v14 = vrot.slane %v8628_v40, %v7765_v53 }
 0x257   : > { %7367 = vrcp.f32 %v840_v32  ;;  %v5061_v31 = vrot.slane %v5045_v8, %v7791_v9  ;;  %v5068_v35 = vrot.slane %v5046_v12, %v7791_v9  ;;  %v2675_v56 = vrot.slane %v8628_v40, %v7768_v59 }
 0x258   : > { %7369 = vrcp.f32 %v841_v43  ;;  %v5533_v11 = vcombine.low %v5525_v21, %v5532_v52  ;;  %v5075_v3 = vrot.slane %v5047_v45, %v7791_v9  ;;  %v2679_v2 = vrot.slane %v8628_v40, %v7771_v60  ;;  %v587_v21 = vpop.xlane.xlu1 %586 }
 0x259   : > { %v5076_v28 = vcombine.low %v5054_v18, %v5061_v31  ;;  %v2683_v30 = vrot.slane %v8628_v40, %v7774_v62  ;;  %v2687_v32 = vrot.slane %v8628_v40, %v7777_v63  ;;  %v2691_v34 = vrot.slane %v8628_v40, %v7780_v0 }
 0x25a   : > { %6368 = vperm.xlu0 %7123, %v5533_v11   ;;  %v5077_v41 = vcombine.low %v5068_v35, %v5075_v3  ;;  %v2695_v50 = vrot.slane %v8628_v40, %v7783_v4  ;;  %v2699_v16 = vrot.slane %v8628_v40, %v7786_v5  ;;  %v5583_v24 = vcombine.low %v2671_v14, %v2675_v56 }
 0x25b   : > { %v5084_v43 = vrot.slane %v5076_v28, %v7791_v9  ;;  %v5584_v47 = vcombine.low %v2679_v2, %v2683_v30  ;;  %v5585_v22 = vcombine.low %v2687_v32, %v2691_v34  ;;  %v2575_v15 = vrot.slane %v8597_v38, %v7765_v53 }
 0x25c   : > { %v5091_v7 = vrot.slane %v5077_v41, %v7791_v9  ;;  %v5586_v25 = vcombine.low %v2695_v50, %v2699_v16  ;;  %v5593_v61 = vrot.slane %v5583_v24, %v7791_v9  ;;  %v2579_v37 = vrot.slane %v8597_v38, %v7768_v59 }
 0x25d   : > { %v5600_v29 = vrot.slane %v5584_v47, %v7791_v9  ;;  %v5607_v40 = vrot.slane %v5585_v22, %v7791_v9  ;;  %v2583_v51 = vrot.slane %v8597_v38, %v7771_v60  ;;  %v2587_v19 = vrot.slane %v8597_v38, %v7774_v62 }
 0x25e   : > { %v5092_v48 = vcombine.low %v5084_v43, %v5091_v7  ;;  %v5614_v17 = vrot.slane %v5586_v25, %v7791_v9  ;;  %v2591_v54 = vrot.slane %v8597_v38, %v7777_v63  ;;  %v2595_v57 = vrot.slane %v8597_v38, %v7780_v0 }
 0x25f   : > { %v7366_v8 = vpop.eup %7365  ;;  %v5615_v12 = vcombine.low %v5593_v61, %v5600_v29  ;;  %v2599_v52 = vrot.slane %v8597_v38, %v7783_v4  ;;  %v2603_v45 = vrot.slane %v8597_v38, %v7786_v5  ;;  %v5436_v18 = vcombine.low %v2575_v15, %v2579_v37 }
 0x260   : > { %6341 = vperm.xlu1 %7124, %v5092_v48   ;;  %v5616_v14 = vcombine.low %v5607_v40, %v5614_v17  ;;  %v5437_v31 = vcombine.low %v2583_v51, %v2587_v19  ;;  %v5438_v35 = vcombine.low %v2591_v54, %v2595_v57  ;;  %v2735_v56 = vrot.slane %v8678_v20, %v7765_v53 }
 0x261   : > { %v8912_v11 = vpop.eup %7367  ;;  %v5623_v3 = vrot.slane %v5615_v12, %v7791_v9  ;;  %v5439_v2 = vcombine.low %v2599_v52, %v2603_v45  ;;  %v5446_v28 = vrot.slane %v5436_v18, %v7791_v9  ;;  %v2739_v30 = vrot.slane %v8678_v20, %v7768_v59 }
 0x262   : > { %v8918_v32 = vpop.eup %7369  ;;  %v8920_v38 = vmul.f32 -1.442695, %v587_v21  ;;  %v5630_v34 = vrot.slane %v5616_v14, %v7791_v9  ;;  %v5453_v41 = vrot.slane %v5437_v31, %v7791_v9  ;;  %v5460_v50 = vrot.slane %v5438_v35, %v7791_v9 }
 0x263   : > { %v5467_v16 = vrot.slane %v5439_v2, %v7791_v9  ;;  %v2743_v24 = vrot.slane %v8678_v20, %v7771_v60  ;;  %v2747_v43 = vrot.slane %v8678_v20, %v7774_v62  ;;  %v2751_v47 = vrot.slane %v8678_v20, %v7777_v63 }
 0x264   : > { %v8932_v22 = vadd.f32 1.0, %v7366_v8  ;;  %v5631_v15 = vcombine.low %v5623_v3, %v5630_v34  ;;  %v5468_v7 = vcombine.low %v5446_v28, %v5453_v41  ;;  %v2755_v25 = vrot.slane %v8678_v20, %v7780_v0 }
 0x265   : > { %v5469_v61 = vcombine.low %v5460_v50, %v5467_v16  ;;  %v2759_v37 = vrot.slane %v8678_v20, %v7783_v4  ;;  %v2763_v29 = vrot.slane %v8678_v20, %v7786_v5  ;;  %v5681_v40 = vcombine.low %v2735_v56, %v2739_v30 }
 0x266   : > { %6374 = vperm.xlu0 %7123, %v5631_v15   ;;  %v5476_v51 = vrot.slane %v5468_v7, %v7791_v9  ;;  %v5682_v19 = vcombine.low %v2743_v24, %v2747_v43  ;;  %v5683_v48 = vcombine.low %v2751_v47, %v2755_v25  ;;  %v2639_v17 = vrot.slane %v8642_v27, %v7765_v53 }
 0x267   : > { %v5483_v54 = vrot.slane %v5469_v61, %v7791_v9  ;;  %v5684_v57 = vcombine.low %v2759_v37, %v2763_v29  ;;  %v5691_v8 = vrot.slane %v5681_v40, %v7791_v9  ;;  %v2643_v21 = vrot.slane %v8642_v27, %v7768_v59 }
 0x268   : > { %v5698_v12 = vrot.slane %v5682_v19, %v7791_v9  ;;  %v5705_v20 = vrot.slane %v5683_v48, %v7791_v9  ;;  %v2647_v52 = vrot.slane %v8642_v27, %v7771_v60  ;;  %v2651_v45 = vrot.slane %v8642_v27, %v7774_v62 }
 0x269   : > { %v5484_v18 = vcombine.low %v5476_v51, %v5483_v54  ;;  %v5712_v14 = vrot.slane %v5684_v57, %v7791_v9  ;;  %v2655_v31 = vrot.slane %v8642_v27, %v7777_v63  ;;  %v2659_v35 = vrot.slane %v8642_v27, %v7780_v0 }
 0x26a   : > { %v5713_v56 = vcombine.low %v5691_v8, %v5698_v12  ;;  %v2663_v3 = vrot.slane %v8642_v27, %v7783_v4  ;;  %v2667_v2 = vrot.slane %v8642_v27, %v7786_v5  ;;  %v5534_v28 = vcombine.low %v2639_v17, %v2643_v21 }
 0x26b   : > { %6365 = vperm.xlu1 %7124, %v5484_v18   ;;  %v5714_v30 = vcombine.low %v5705_v20, %v5712_v14  ;;  %v5535_v34 = vcombine.low %v2647_v52, %v2651_v45  ;;  %v5536_v41 = vcombine.low %v2655_v31, %v2659_v35  ;;  %v2799_v50 = vrot.slane %v8740_v23, %v7765_v53 }
 0x26c   : > { %v5721_v16 = vrot.slane %v5713_v56, %v7791_v9  ;;  %v5537_v24 = vcombine.low %v2663_v3, %v2667_v2  ;;  %v5544_v43 = vrot.slane %v5534_v28, %v7791_v9  ;;  %v2803_v47 = vrot.slane %v8740_v23, %v7768_v59 }
 0x26d   : > { %v5728_v15 = vrot.slane %v5714_v30, %v7791_v9  ;;  %v5551_v27 = vrot.slane %v5535_v34, %v7791_v9  ;;  %v5558_v7 = vrot.slane %v5536_v41, %v7791_v9  ;;  %v2807_v25 = vrot.slane %v8740_v23, %v7771_v60 }
 0x26e   : > { %v5565_v61 = vrot.slane %v5537_v24, %v7791_v9  ;;  %v2811_v37 = vrot.slane %v8740_v23, %v7774_v62  ;;  %v2815_v29 = vrot.slane %v8740_v23, %v7777_v63  ;;  %v2819_v40 = vrot.slane %v8740_v23, %v7780_v0 }
 0x26f   : > { %v5729_v51 = vcombine.low %v5721_v16, %v5728_v15  ;;  %v5566_v19 = vcombine.low %v5544_v43, %v5551_v27  ;;  %v2823_v48 = vrot.slane %v8740_v23, %v7783_v4  ;;  %v2827_v17 = vrot.slane %v8740_v23, %v7786_v5 }
 0x270   : > { %v5567_v54 = vcombine.low %v5558_v7, %v5565_v61  ;;  %v5779_v57 = vcombine.low %v2799_v50, %v2803_v47  ;;  %v5780_v8 = vcombine.low %v2807_v25, %v2811_v37  ;;  %v5781_v21 = vcombine.low %v2815_v29, %v2819_v40 }
 0x271   : > { %6380 = vperm.xlu0 %7123, %v5729_v51   ;;  %v5574_v12 = vrot.slane %v5566_v19, %v7791_v9  ;;  %v5782_v20 = vcombine.low %v2823_v48, %v2827_v17  ;;  %v2703_v52 = vrot.slane %v8692_v58, %v7765_v53  ;;  %v2707_v45 = vrot.slane %v8692_v58, %v7768_v59 }
 0x272   : > { %v5581_v18 = vrot.slane %v5567_v54, %v7791_v9  ;;  %v5789_v14 = vrot.slane %v5779_v57, %v7791_v9  ;;  %v5796_v23 = vrot.slane %v5780_v8, %v7791_v9  ;;  %v5803_v31 = vrot.slane %v5781_v21, %v7791_v9 }
 0x273   : > { %v5810_v35 = vrot.slane %v5782_v20, %v7791_v9  ;;  %v2711_v56 = vrot.slane %v8692_v58, %v7771_v60  ;;  %v2715_v3 = vrot.slane %v8692_v58, %v7774_v62  ;;  %v2719_v2 = vrot.slane %v8692_v58, %v7777_v63 }
 0x274   : > { %v5582_v28 = vcombine.low %v5574_v12, %v5581_v18  ;;  %v5811_v30 = vcombine.low %v5789_v14, %v5796_v23  ;;  %v2723_v34 = vrot.slane %v8692_v58, %v7780_v0  ;;  %v2727_v41 = vrot.slane %v8692_v58, %v7783_v4 }
 0x275   : > { %v5812_v50 = vcombine.low %v5803_v31, %v5810_v35  ;;  %v2731_v16 = vrot.slane %v8692_v58, %v7786_v5  ;;  %v5632_v24 = vcombine.low %v2703_v52, %v2707_v45  ;;  %v5633_v43 = vcombine.low %v2711_v56, %v2715_v3  ;;  %v9014_v58 = vpop.permute.xlu1 %6224 }
 0x276   : > { %6371 = vperm.xlu1 %7124, %v5582_v28   ;;  %v5819_v47 = vrot.slane %v5811_v30, %v7791_v9  ;;  %v5634_v15 = vcombine.low %v2719_v2, %v2723_v34  ;;  %v2863_v27 = vrot.slane %v8799_v44, %v7765_v53  ;;  %v2867_v7 = vrot.slane %v8799_v44, %v7768_v59 }
 0x277   : > { %v5826_v25 = vrot.slane %v5812_v50, %v7791_v9  ;;  %v5635_v61 = vcombine.low %v2727_v41, %v2731_v16  ;;  %v5642_v37 = vrot.slane %v5632_v24, %v7791_v9  ;;  %v5649_v29 = vrot.slane %v5633_v43, %v7791_v9 }
 0x278   : > { %v5656_v40 = vrot.slane %v5634_v15, %v7791_v9  ;;  %v2871_v51 = vrot.slane %v8799_v44, %v7771_v60  ;;  %v2875_v19 = vrot.slane %v8799_v44, %v7774_v62  ;;  %v2879_v48 = vrot.slane %v8799_v44, %v7777_v63 }
 0x279   : > { %v5827_v17 = vcombine.low %v5819_v47, %v5826_v25  ;;  %v5663_v54 = vrot.slane %v5635_v61, %v7791_v9  ;;  %v5664_v57 = vcombine.low %v5642_v37, %v5649_v29  ;;  %v2883_v8 = vrot.slane %v8799_v44, %v7780_v0  ;;  %v9043_v34 = vpop.permute.xlu1 %6227 }
 0x27a   : > { %v2887_v21 = vrot.slane %v8799_v44, %v7783_v4  ;;  %v2891_v12 = vrot.slane %v8799_v44, %v7786_v5  ;;  %v5877_v20 = vcombine.low %v2863_v27, %v2867_v7  ;;  %v5878_v52 = vcombine.low %v2871_v51, %v2875_v19 }
 0x27b   : > { %6386 = vperm.xlu0 %7123, %v5827_v17   ;;  %v5665_v45 = vcombine.low %v5656_v40, %v5663_v54  ;;  %v5672_v18 = vrot.slane %v5664_v57, %v7791_v9  ;;  %v5879_v14 = vcombine.low %v2879_v48, %v2883_v8  ;;  %v2767_v23 = vrot.slane %v8742_v46, %v7765_v53 }
 0x27c   : > { %v5880_v31 = vcombine.low %v2887_v21, %v2891_v12  ;;  %v5887_v35 = vrot.slane %v5877_v20, %v7791_v9  ;;  %v5894_v56 = vrot.slane %v5878_v52, %v7791_v9  ;;  %v2771_v3 = vrot.slane %v8742_v46, %v7768_v59 }
 0x27d   : > { %v5679_v44 = vrot.slane %v5665_v45, %v7791_v9  ;;  %v5901_v2 = vrot.slane %v5879_v14, %v7791_v9  ;;  %v2775_v28 = vrot.slane %v8742_v46, %v7771_v60  ;;  %v2779_v30 = vrot.slane %v8742_v46, %v7774_v62  ;;  %v9072_v20 = vpop.permute.xlu1 %6230 }
 0x27e   : > { %v5908_v41 = vrot.slane %v5880_v31, %v7791_v9  ;;  %v5909_v50 = vcombine.low %v5887_v35, %v5894_v56  ;;  %v2783_v16 = vrot.slane %v8742_v46, %v7777_v63  ;;  %v2787_v24 = vrot.slane %v8742_v46, %v7780_v0 }
 0x27f   : > { %v5680_v43 = vcombine.low %v5672_v18, %v5679_v44  ;;  %v2791_v47 = vrot.slane %v8742_v46, %v7783_v4  ;;  %v2795_v15 = vrot.slane %v8742_v46, %v7786_v5  ;;  %v5730_v27 = vcombine.low %v2767_v23, %v2771_v3 }
 0x280   : > { %v5910_v7 = vcombine.low %v5901_v2, %v5908_v41  ;;  %v5917_v25 = vrot.slane %v5909_v50, %v7791_v9  ;;  %v5731_v61 = vcombine.low %v2775_v28, %v2779_v30  ;;  %v5732_v37 = vcombine.low %v2783_v16, %v2787_v24 }
 0x281   : > { %6377 = vperm.xlu1 %7124, %v5680_v43   ;;  %v5733_v29 = vcombine.low %v2791_v47, %v2795_v15  ;;  %v5740_v40 = vrot.slane %v5730_v27, %v7791_v9  ;;  %v2831_v51 = vrot.slane %v8852_v39, %v7765_v53  ;;  %v2835_v19 = vrot.slane %v8852_v39, %v7768_v59 }
 0x282   : > { %v5924_v48 = vrot.slane %v5910_v7, %v7791_v9  ;;  %v5747_v46 = vrot.slane %v5731_v61, %v7791_v9  ;;  %v5754_v17 = vrot.slane %v5732_v37, %v7791_v9  ;;  %v2839_v54 = vrot.slane %v8852_v39, %v7771_v60  ;;  %v9098_v61 = vpop.permute.xlu1 %6233 }
 0x283   : > { %v5761_v57 = vrot.slane %v5733_v29, %v7791_v9  ;;  %v2843_v8 = vrot.slane %v8852_v39, %v7774_v62  ;;  %v2847_v21 = vrot.slane %v8852_v39, %v7777_v63  ;;  %v2851_v12 = vrot.slane %v8852_v39, %v7780_v0 }
 0x284   : > { %v5925_v52 = vcombine.low %v5917_v25, %v5924_v48  ;;  %v5762_v45 = vcombine.low %v5740_v40, %v5747_v46  ;;  %v2855_v18 = vrot.slane %v8852_v39, %v7783_v4  ;;  %v2859_v14 = vrot.slane %v8852_v39, %v7786_v5 }
 0x285   : > { %v5763_v23 = vcombine.low %v5754_v17, %v5761_v57  ;;  %v5828_v31 = vcombine.low %v2831_v51, %v2835_v19  ;;  %v5829_v35 = vcombine.low %v2839_v54, %v2843_v8  ;;  %v5830_v56 = vcombine.low %v2847_v21, %v2851_v12 }
 0x286   : > { %6392 = vperm.xlu0 %7123, %v5925_v52   ;;  %v5770_v3 = vrot.slane %v5762_v45, %v7791_v9  ;;  %v5831_v44 = vcombine.low %v2855_v18, %v2859_v14  ;;  %v2895_v2 = vrot.slane %v8860_v55, %v7765_v53  ;;  %v2899_v28 = vrot.slane %v8860_v55, %v7768_v59 }
 0x287   : > { %v5777_v30 = vrot.slane %v5763_v23, %v7791_v9  ;;  %v5838_v41 = vrot.slane %v5828_v31, %v7791_v9  ;;  %v5845_v39 = vrot.slane %v5829_v35, %v7791_v9  ;;  %v5852_v50 = vrot.slane %v5830_v56, %v7791_v9 }
 0x288   : > { %v5859_v16 = vrot.slane %v5831_v44, %v7791_v9  ;;  %v2903_v24 = vrot.slane %v8860_v55, %v7771_v60  ;;  %v2907_v43 = vrot.slane %v8860_v55, %v7774_v62  ;;  %v2911_v47 = vrot.slane %v8860_v55, %v7777_v63 }
 0x289   : > { %v5778_v15 = vcombine.low %v5770_v3, %v5777_v30  ;;  %v5860_v27 = vcombine.low %v5838_v41, %v5845_v39  ;;  %v2915_v7 = vrot.slane %v8860_v55, %v7780_v0  ;;  %v2919_v25 = vrot.slane %v8860_v55, %v7783_v4 }
 0x28a   : > { %v5861_v37 = vcombine.low %v5852_v50, %v5859_v16  ;;  %v2923_v29 = vrot.slane %v8860_v55, %v7786_v5  ;;  %v5926_v40 = vcombine.low %v2895_v2, %v2899_v28  ;;  %v5927_v51 = vcombine.low %v2903_v24, %v2907_v43  ;;  %v9124_v2 = vpop.permute.xlu1 %6236 }
 0x28b   : > { %6383 = vperm.xlu1 %7124, %v5778_v15   ;;  %v5868_v19 = vrot.slane %v5860_v27, %v7791_v9  ;;  %v5928_v48 = vcombine.low %v2911_v47, %v2915_v7  ;;  %v2383_v46 = vrot.slane %v8449_v36, %v7765_v53  ;;  %v2387_v17 = vrot.slane %v8449_v36, %v7768_v59 }
 0x28c   : > { %v5875_v54 = vrot.slane %v5861_v37, %v7791_v9  ;;  %v5929_v57 = vcombine.low %v2919_v25, %v2923_v29  ;;  %v5936_v8 = vrot.slane %v5926_v40, %v7791_v9  ;;  %v5943_v21 = vrot.slane %v5927_v51, %v7791_v9 }
 0x28d   : > { %v5950_v55 = vrot.slane %v5928_v48, %v7791_v9  ;;  %v2391_v12 = vrot.slane %v8449_v36, %v7771_v60  ;;  %v2395_v52 = vrot.slane %v8449_v36, %v7774_v62  ;;  %v2399_v45 = vrot.slane %v8449_v36, %v7777_v63 }
 0x28e   : > { %v5876_v18 = vcombine.low %v5868_v19, %v5875_v54  ;;  %v5957_v14 = vrot.slane %v5929_v57, %v7791_v9  ;;  %v5958_v23 = vcombine.low %v5936_v8, %v5943_v21  ;;  %v2403_v31 = vrot.slane %v8449_v36, %v7780_v0  ;;  %v9149_v8 = vpop.permute.xlu1 %6239 }
 0x28f   : > { %v2407_v35 = vrot.slane %v8449_v36, %v7783_v4  ;;  %v2411_v56 = vrot.slane %v8449_v36, %v7786_v5  ;;  %v5142_v3 = vcombine.low %v2383_v46, %v2387_v17  ;;  %v5143_v44 = vcombine.low %v2391_v12, %v2395_v52 }
 0x290   : > { %6389 = vperm.xlu1 %7124, %v5876_v18   ;;  %v5959_v28 = vcombine.low %v5950_v55, %v5957_v14  ;;  %v5966_v30 = vrot.slane %v5958_v23, %v7791_v9  ;;  %v5144_v41 = vcombine.low %v2399_v45, %v2403_v31  ;;  %v2927_v39 = vrot.slane %v8864_v1, %v7765_v53 }
 0x291   : > { %v5145_v50 = vcombine.low %v2407_v35, %v2411_v56  ;;  %v5152_v16 = vrot.slane %v5142_v3, %v7791_v9  ;;  %v5159_v24 = vrot.slane %v5143_v44, %v7791_v9  ;;  %v2931_v36 = vrot.slane %v8864_v1, %v7768_v59 }
 0x292   : > { %v5973_v43 = vrot.slane %v5959_v28, %v7791_v9  ;;  %v5166_v47 = vrot.slane %v5144_v41, %v7791_v9  ;;  %v2935_v15 = vrot.slane %v8864_v1, %v7771_v60  ;;  %v2939_v27 = vrot.slane %v8864_v1, %v7774_v62 }
 0x293   : > { %v5173_v7 = vrot.slane %v5145_v50, %v7791_v9  ;;  %v5174_v25 = vcombine.low %v5152_v16, %v5159_v24  ;;  %v2943_v37 = vrot.slane %v8864_v1, %v7777_v63  ;;  %v2947_v29 = vrot.slane %v8864_v1, %v7780_v0 }
 0x294   : > { %v5974_v40 = vcombine.low %v5966_v30, %v5973_v43  ;;  %v2951_v51 = vrot.slane %v8864_v1, %v7783_v4  ;;  %v2955_v19 = vrot.slane %v8864_v1, %v7786_v5  ;;  %v5975_v48 = vcombine.low %v2927_v39, %v2931_v36 }
 0x295   : > { %v5175_v46 = vcombine.low %v5166_v47, %v5173_v7  ;;  %v5182_v17 = vrot.slane %v5174_v25, %v7791_v9  ;;  %v5976_v54 = vcombine.low %v2935_v15, %v2939_v27  ;;  %v5977_v57 = vcombine.low %v2943_v37, %v2947_v29  ;;  %v9177_v15 = vpop.permute.xlu1 %6242 }
 0x296   : > { %6395 = vperm.xlu0 %7123, %v5974_v40   ;;  %v5978_v21 = vcombine.low %v2951_v51, %v2955_v19  ;;  %v5985_v55 = vrot.slane %v5975_v48, %v7791_v9  ;;  %v2415_v12 = vrot.slane %v8447_v26, %v7765_v53  ;;  %v2419_v52 = vrot.slane %v8447_v26, %v7768_v59 }
 0x297   : > { %v5189_v1 = vrot.slane %v5175_v46, %v7791_v9  ;;  %v5992_v45 = vrot.slane %v5976_v54, %v7791_v9  ;;  %v5999_v18 = vrot.slane %v5977_v57, %v7791_v9  ;;  %v2423_v14 = vrot.slane %v8447_v26, %v7771_v60 }
 0x298   : > { %v6006_v23 = vrot.slane %v5978_v21, %v7791_v9  ;;  %v2427_v31 = vrot.slane %v8447_v26, %v7774_v62  ;;  %v2431_v35 = vrot.slane %v8447_v26, %v7777_v63  ;;  %v2435_v56 = vrot.slane %v8447_v26, %v7780_v0 }
 0x299   : > { %v5190_v3 = vcombine.low %v5182_v17, %v5189_v1  ;;  %v6007_v44 = vcombine.low %v5985_v55, %v5992_v45  ;;  %v2439_v28 = vrot.slane %v8447_v26, %v7783_v4  ;;  %v2443_v30 = vrot.slane %v8447_v26, %v7786_v5  ;;  %v9198_v1 = vpop.permute.xlu0 %6221 }
 0x29a   : > { %v6008_v41 = vcombine.low %v5999_v18, %v6006_v23  ;;  %v5191_v39 = vcombine.low %v2415_v12, %v2419_v52  ;;  %v5192_v50 = vcombine.low %v2423_v14, %v2427_v31  ;;  %v5193_v16 = vcombine.low %v2431_v35, %v2435_v56  ;;  %v9205_v31 = vpop.permute.xlu1 %6245 }
 0x29b   : > { %6347 = vperm.xlu1 %7124, %v5190_v3   ;;  %v6015_v24 = vrot.slane %v6007_v44, %v7791_v9  ;;  %v5194_v36 = vcombine.low %v2439_v28, %v2443_v30  ;;  %v2959_v43 = vrot.slane %v8912_v11, %v7765_v53  ;;  %v2963_v47 = vrot.slane %v8912_v11, %v7768_v59 }
 0x29c   : > { %v6022_v27 = vrot.slane %v6008_v41, %v7791_v9  ;;  %v5201_v26 = vrot.slane %v5191_v39, %v7791_v9  ;;  %v5208_v7 = vrot.slane %v5192_v50, %v7791_v9  ;;  %v5215_v25 = vrot.slane %v5193_v16, %v7791_v9 }
 0x29d   : > { %v5222_v37 = vrot.slane %v5194_v36, %v7791_v9  ;;  %v2967_v29 = vrot.slane %v8912_v11, %v7771_v60  ;;  %v2971_v40 = vrot.slane %v8912_v11, %v7774_v62  ;;  %v2975_v51 = vrot.slane %v8912_v11, %v7777_v63  ;;  %v9223_v16 = vpop.permute.xlu0 %6248 }
 0x29e   : > { %v6023_v19 = vcombine.low %v6015_v24, %v6022_v27  ;;  %v5223_v48 = vcombine.low %v5201_v26, %v5208_v7  ;;  %v2979_v46 = vrot.slane %v8912_v11, %v7780_v0  ;;  %v2983_v17 = vrot.slane %v8912_v11, %v7783_v4 }
 0x29f   : > { %v5224_v54 = vcombine.low %v5215_v25, %v5222_v37  ;;  %v2987_v57 = vrot.slane %v8912_v11, %v7786_v5  ;;  %v6024_v21 = vcombine.low %v2959_v43, %v2963_v47  ;;  %v6025_v55 = vcombine.low %v2967_v29, %v2971_v40 }
 0x2a0   : > { %7371 = vpow2.f32 %v8920_v38  ;;  %6398 = vperm.xlu0 %7123, %v6023_v19   ;;  %v5231_v12 = vrot.slane %v5223_v48, %v7791_v9  ;;  %v6026_v52 = vcombine.low %v2975_v51, %v2979_v46  ;;  %v2447_v45 = vrot.slane %v8501_v6, %v7765_v53  ;;  %v9236_v51 = vpop.permute.xlu1 %6251 }
 0x2a1   : > { %v5238_v18 = vrot.slane %v5224_v54, %v7791_v9  ;;  %v6027_v14 = vcombine.low %v2983_v17, %v2987_v57  ;;  %v6034_v23 = vrot.slane %v6024_v21, %v7791_v9  ;;  %v6041_v11 = vrot.slane %v6025_v55, %v7791_v9 }
 0x2a2   : > { %v826_v38 = vadd.f32 1.0, %v8545_v49  ;;  %v6048_v35 = vrot.slane %v6026_v52, %v7791_v9  ;;  %v2451_v56 = vrot.slane %v8501_v6, %v7768_v59  ;;  %v2455_v3 = vrot.slane %v8501_v6, %v7771_v60 }
 0x2a3   : > { %v5239_v44 = vcombine.low %v5231_v12, %v5238_v18  ;;  %v6055_v28 = vrot.slane %v6027_v14, %v7791_v9  ;;  %v6056_v30 = vcombine.low %v6034_v23, %v6041_v11  ;;  %v2459_v41 = vrot.slane %v8501_v6, %v7774_v62  ;;  %v9251_v14 = vpop.permute.xlu0 %6254 }
 0x2a4   : > { %7373 = vrcp.f32 %v8932_v22  ;;  %v2463_v49 = vrot.slane %v8501_v6, %v7777_v63  ;;  %v2467_v39 = vrot.slane %v8501_v6, %v7780_v0  ;;  %v2471_v50 = vrot.slane %v8501_v6, %v7783_v4 }
 0x2a5   : > { %6350 = vperm.xlu1 %7124, %v5239_v44   ;;  %v6057_v24 = vcombine.low %v6048_v35, %v6055_v28  ;;  %v6064_v36 = vrot.slane %v6056_v30, %v7791_v9  ;;  %v2475_v43 = vrot.slane %v8501_v6, %v7786_v5  ;;  %v5240_v47 = vcombine.low %v2447_v45, %v2451_v56 }
 0x2a6   : > { %v5241_v22 = vcombine.low %v2455_v3, %v2459_v41  ;;  %v5242_v27 = vcombine.low %v2463_v49, %v2467_v39  ;;  %v2991_v26 = vrot.slane %v8918_v32, %v7765_v53  ;;  %v2995_v7 = vrot.slane %v8918_v32, %v7768_v59  ;;  %v9260_v49 = vpop.permute.xlu1 %6257 }
 0x2a7   : > { %v6071_v25 = vrot.slane %v6057_v24, %v7791_v9  ;;  %v5243_v37 = vcombine.low %v2471_v50, %v2475_v43  ;;  %v5250_v29 = vrot.slane %v5240_v47, %v7791_v9  ;;  %v2999_v40 = vrot.slane %v8918_v32, %v7771_v60 }
 0x2a8   : > { %v5257_v6 = vrot.slane %v5241_v22, %v7791_v9  ;;  %v5264_v19 = vrot.slane %v5242_v27, %v7791_v9  ;;  %v3003_v48 = vrot.slane %v8918_v32, %v7774_v62  ;;  %v3007_v46 = vrot.slane %v8918_v32, %v7777_v63 }
 0x2a9   : > { %v6072_v17 = vcombine.low %v6064_v36, %v6071_v25  ;;  %v5271_v54 = vrot.slane %v5243_v37, %v7791_v9  ;;  %v3011_v57 = vrot.slane %v8918_v32, %v7780_v0  ;;  %v3015_v21 = vrot.slane %v8918_v32, %v7783_v4 }
 0x2aa   : > { %v7372_v55 = vpop.eup %7371  ;;  %v5272_v12 = vcombine.low %v5250_v29, %v5257_v6  ;;  %v3019_v52 = vrot.slane %v8918_v32, %v7786_v5  ;;  %v6073_v45 = vcombine.low %v2991_v26, %v2995_v7  ;;  %v6074_v18 = vcombine.low %v2999_v40, %v3003_v48  ;;  %v9277_v29 = vpop.permute.xlu0 %6260 }
 0x2ab   : > { %7375 = vrcp.f32 %v826_v38  ;;  %6401 = vperm.xlu0 %7123, %v6072_v17   ;;  %v5273_v23 = vcombine.low %v5264_v19, %v5271_v54  ;;  %v6075_v11 = vcombine.low %v3007_v46, %v3011_v57  ;;  %v843_v28 = vadd.f32 1.0, %v7372_v55 }
 0x2ac   : > { %v5280_v35 = vrot.slane %v5272_v12, %v7791_v9  ;;  %v6076_v56 = vcombine.low %v3015_v21, %v3019_v52  ;;  %v6083_v3 = vrot.slane %v6073_v45, %v7791_v9  ;;  %v6090_v44 = vrot.slane %v6074_v18, %v7791_v9  ;;  %v9287_v12 = vpop.permute.xlu1 %6263 }
 0x2ad   : > { %v5287_v30 = vrot.slane %v5273_v23, %v7791_v9  ;;  %v6097_v32 = vrot.slane %v6075_v11, %v7791_v9  ;;  %v2479_v41 = vrot.slane %v8456_v13, %v7765_v53  ;;  %v2483_v24 = vrot.slane %v8456_v13, %v7768_v59 }
 0x2ae   : > { %v7374_v38 = vpop.eup %7373  ;;  %v6104_v39 = vrot.slane %v6076_v56, %v7791_v9  ;;  %v6105_v50 = vcombine.low %v6083_v3, %v6090_v44  ;;  %v2487_v36 = vrot.slane %v8456_v13, %v7771_v60  ;;  %v827_v43 = vadd.f32 1.0, %v8507_v10 }
 0x2af   : > { %v5288_v47 = vcombine.low %v5280_v35, %v5287_v30  ;;  %v2491_v22 = vrot.slane %v8456_v13, %v7774_v62  ;;  %v2495_v27 = vrot.slane %v8456_v13, %v7777_v63  ;;  %v2499_v25 = vrot.slane %v8456_v13, %v7780_v0 }
 0x2b0   : > { %v6106_v26 = vcombine.low %v6097_v32, %v6104_v39  ;;  %v6113_v7 = vrot.slane %v6105_v50, %v7791_v9  ;;  %v2503_v37 = vrot.slane %v8456_v13, %v7783_v4  ;;  %7377 = vrcp.f32 %v843_v28  ;;  %v9296_v32 = vpop.permute.xlu0 %6266 }
 0x2b1   : > { %6353 = vperm.xlu1 %7124, %v5288_v47   ;;  %v2507_v10 = vrot.slane %v8456_v13, %v7786_v5  ;;  %v5289_v40 = vcombine.low %v2479_v41, %v2483_v24  ;;  %v5290_v6 = vcombine.low %v2487_v36, %v2491_v22  ;;  %v5291_v48 = vcombine.low %v2495_v27, %v2499_v25 }
 0x2b2   : > { %v6120_v19 = vrot.slane %v6106_v26, %v7791_v9  ;;  %v3023_v46 = vrot.slane %v7374_v38, %v7765_v53  ;;  %v3027_v17 = vrot.slane %v7374_v38, %v7768_v59  ;;  %v3031_v55 = vrot.slane %v7374_v38, %v7771_v60  ;;  %9697 = vst [vmem:[#allocation19_spill] sm:$0xff] %v9296_v32 }
 0x2b3   : > { %v5292_v54 = vcombine.low %v2503_v37, %v2507_v10  ;;  %v5299_v57 = vrot.slane %v5289_v40, %v7791_v9  ;;  %v5306_v21 = vrot.slane %v5290_v6, %v7791_v9  ;;  %v5313_v13 = vrot.slane %v5291_v48, %v7791_v9 }
 0x2b4   : > { %v6121_v52 = vcombine.low %v6113_v7, %v6120_v19  ;;  %v3035_v45 = vrot.slane %v7374_v38, %v7774_v62  ;;  %v3039_v18 = vrot.slane %v7374_v38, %v7777_v63  ;;  %v3043_v56 = vrot.slane %v7374_v38, %v7780_v0  ;;  %v9305_v7 = vpop.permute.xlu1 %6269 }
 0x2b5   : > { %v7376_v23 = vpop.eup %7375  ;;  %v5320_v11 = vrot.slane %v5292_v54, %v7791_v9  ;;  %v5321_v35 = vcombine.low %v5299_v57, %v5306_v21  ;;  %v3047_v3 = vrot.slane %v7374_v38, %v7783_v4  ;;  %v3051_v44 = vrot.slane %v7374_v38, %v7786_v5  ;;  %v9314_v57 = vpop.permute.xlu0 %6272 }
 0x2b6   : > { %6404 = vperm.xlu0 %7123, %v6121_v52   ;;  %v6122_v28 = vcombine.low %v3023_v46, %v3027_v17  ;;  %v6123_v30 = vcombine.low %v3031_v55, %v3035_v45  ;;  %v6124_v50 = vcombine.low %v3039_v18, %v3043_v56  ;;  %7379 = vrcp.f32 %v827_v43 }
 0x2b7   : > { %v5322_v41 = vcombine.low %v5313_v13, %v5320_v11  ;;  %v5329_v39 = vrot.slane %v5321_v35, %v7791_v9  ;;  %v6125_v24 = vcombine.low %v3047_v3, %v3051_v44  ;;  %v2511_v38 = vrot.slane %v7376_v23, %v7765_v53 }
 0x2b8   : > { %v6132_v36 = vrot.slane %v6122_v28, %v7791_v9  ;;  %v6139_v47 = vrot.slane %v6123_v30, %v7791_v9  ;;  %v6146_v27 = vrot.slane %v6124_v50, %v7791_v9  ;;  %v2515_v26 = vrot.slane %v7376_v23, %v7768_v59  ;;  %v9324_v30 = vpop.permute.xlu1 %6275 }
 0x2b9   : > { %v5336_v22 = vrot.slane %v5322_v41, %v7791_v9  ;;  %v6153_v25 = vrot.slane %v6125_v24, %v7791_v9  ;;  %v2519_v43 = vrot.slane %v7376_v23, %v7771_v60  ;;  %v2523_v6 = vrot.slane %v7376_v23, %v7774_v62 }
 0x2ba   : > { %v6154_v37 = vcombine.low %v6132_v36, %v6139_v47  ;;  %v7378_v10 = vpop.eup %7377  ;;  %v2527_v19 = vrot.slane %v7376_v23, %v7777_v63  ;;  %v2531_v48 = vrot.slane %v7376_v23, %v7780_v0  ;;  %v2535_v54 = vrot.slane %v7376_v23, %v7783_v4 }
 0x2bb   : > { %v5337_v40 = vcombine.low %v5329_v39, %v5336_v22  ;;  %v6155_v46 = vcombine.low %v6146_v27, %v6153_v25  ;;  %v2539_v21 = vrot.slane %v7376_v23, %v7786_v5  ;;  %v5338_v55 = vcombine.low %v2511_v38, %v2515_v26 }
 0x2bc   : > { %v6162_v17 = vrot.slane %v6154_v37, %v7791_v9  ;;  %v5339_v52 = vcombine.low %v2519_v43, %v2523_v6  ;;  %v5340_v13 = vcombine.low %v2527_v19, %v2531_v48  ;;  %v3055_v18 = vrot.slane %v7378_v10, %v7765_v53  ;;  %v9332_v37 = vpop.permute.xlu0 %6278 }
 0x2bd   : > { %6356 = vperm.xlu1 %7124, %v5337_v40   ;;  %v6169_v45 = vrot.slane %v6155_v46, %v7791_v9  ;;  %v3059_v11 = vrot.slane %v7378_v10, %v7768_v59  ;;  %v3063_v35 = vrot.slane %v7378_v10, %v7771_v60  ;;  %v5341_v56 = vcombine.low %v2535_v54, %v2539_v21 }
 0x2be   : > { %v5348_v3 = vrot.slane %v5338_v55, %v7791_v9  ;;  %v5355_v44 = vrot.slane %v5339_v52, %v7791_v9  ;;  %v5362_v28 = vrot.slane %v5340_v13, %v7791_v9  ;;  %v3067_v41 = vrot.slane %v7378_v10, %v7774_v62  ;;  %v9342_v55 = vpop.permute.xlu1 %6281 }
 0x2bf   : > { %v6170_v23 = vcombine.low %v6162_v17, %v6169_v45  ;;  %v3071_v39 = vrot.slane %v7378_v10, %v7777_v63  ;;  %v3075_v50 = vrot.slane %v7378_v10, %v7780_v0  ;;  %v5369_v24 = vrot.slane %v5341_v56, %v7791_v9 }
 0x2c0   : > { %v5370_v36 = vcombine.low %v5348_v3, %v5355_v44  ;;  %v3079_v47 = vrot.slane %v7378_v10, %v7783_v4  ;;  %v3083_v22 = vrot.slane %v7378_v10, %v7786_v5  ;;  %v7380_v27 = vpop.eup %7379  ;;  %v6171_v38 = vcombine.low %v3055_v18, %v3059_v11 }
 0x2c1   : > { %6407 = vperm.xlu0 %7123, %v6170_v23   ;;  %v6172_v26 = vcombine.low %v3063_v35, %v3067_v41  ;;  %v6173_v25 = vcombine.low %v3071_v39, %v3075_v50  ;;  %v5371_v43 = vcombine.low %v5362_v28, %v5369_v24  ;;  %v2543_v54 = vrot.slane %v7380_v27, %v7765_v53 }
 0x2c2   : > { %v5378_v40 = vrot.slane %v5370_v36, %v7791_v9  ;;  %v6174_v6 = vcombine.low %v3079_v47, %v3083_v22  ;;  %v6181_v19 = vrot.slane %v6171_v38, %v7791_v9  ;;  %v2547_v21 = vrot.slane %v7380_v27, %v7768_v59  ;;  %v9351_v59 = vpop.permute.xlu0 %6284  ;;  %v9357_v24 = vpop.permute.xlu1 %6287 }
 0x2c3   : > { %v6188_v48 = vrot.slane %v6172_v26, %v7791_v9  ;;  %v6195_v46 = vrot.slane %v6173_v25, %v7791_v9  ;;  %v5385_v17 = vrot.slane %v5371_v43, %v7791_v9  ;;  %v2551_v13 = vrot.slane %v7380_v27, %v7771_v60 }
 0x2c4   : > { %v6202_v10 = vrot.slane %v6174_v6, %v7791_v9  ;;  %v2555_v45 = vrot.slane %v7380_v27, %v7774_v62  ;;  %v2559_v35 = vrot.slane %v7380_v27, %v7777_v63  ;;  %v2563_v56 = vrot.slane %v7380_v27, %v7780_v0 }
 0x2c5   : > { %v6203_v52 = vcombine.low %v6181_v19, %v6188_v48  ;;  %v5386_v18 = vcombine.low %v5378_v40, %v5385_v17  ;;  %v2567_v44 = vrot.slane %v7380_v27, %v7783_v4  ;;  %v2571_v53 = vrot.slane %v7380_v27, %v7786_v5 }
 0x2c6   : > { %v6204_v11 = vcombine.low %v6195_v46, %v6202_v10  ;;  %v5387_v60 = vcombine.low %v2543_v54, %v2547_v21  ;;  %v5388_v23 = vcombine.low %v2551_v13, %v2555_v45  ;;  %v5389_v62 = vcombine.low %v2559_v35, %v2563_v56  ;;  %v9360_v47 = vpop.permute.xlu0 %6290  ;;  %v9364_v38 = vpop.permute.xlu1 %6293 }
 0x2c7   : > { %v6211_v3 = vrot.slane %v6203_v52, %v7791_v9  ;;  %6359 = vperm.xlu1 %7124, %v5386_v18   ;;  %v5390_v41 = vcombine.low %v2567_v44, %v2571_v53  ;;  %v6413_v26 = vand.u32 127, %v9677_v33 }
 0x2c8   : > { %v6218_v28 = vrot.slane %v6204_v11, %v7791_v9  ;;  %v5397_v63 = vrot.slane %v5387_v60, %v7791_v9  ;;  %v5404_v0 = vrot.slane %v5388_v23, %v7791_v9  ;;  %v5411_v50 = vrot.slane %v5389_v62, %v7791_v9 }
 0x2c9   : > { %v5418_v4 = vrot.slane %v5390_v41, %v7791_v9  ;;  %v6418_v43 = vadd.s32 4294967288, %v6413_v26  ;;  %v6425_v6 = vadd.s32 4294967280, %v6413_v26  ;;  %v6432_v19 = vadd.s32 4294967272, %v6413_v26 }
 0x2ca   : > { %v6219_v39 = vcombine.low %v6211_v3, %v6218_v28  ;;  %v5419_v5 = vcombine.low %v5397_v63, %v5404_v0  ;;  %v9367_v40 = vpop.permute.xlu0 %6296  ;;  %v6439_v48 = vadd.s32 4294967264, %v6413_v26  ;;  %v9370_v46 = vsub.s32 %v6413_v26, %v7762_v42  ;;  %v9372_v17 = vpop.permute.xlu1 %6299 }
 0x2cb   : > { %v5420_v36 = vcombine.low %v5411_v50, %v5418_v4  ;;  %v9375_v10 = vsub.s32 %v6418_v43, %v7762_v42  ;;  %v6474_v54 = vadd.s32 4294967224, %v6413_v26  ;;  %v6453_v21 = vadd.s32 4294967248, %v6413_v26 }
 0x2cc   : > { %6410 = vperm.xlu0 %7123, %v6219_v39   ;;  %v5427_v22 = vrot.slane %v5419_v5, %v7791_v9  ;;  %v9378_v52 = vsub.s32 %v6425_v6, %v7762_v42  ;;  %v9381_v13 = vsub.s32 %v6432_v19, %v7762_v42  ;;  %v6446_v45 = vadd.s32 4294967256, %v6413_v26 }
 0x2cd   : > { %v5434_v27 = vrot.slane %v5420_v36, %v7791_v9  ;;  %v9384_v18 = vsub.s32 %v6439_v48, %v7762_v42  ;;  %v6488_v11 = vadd.s32 4294967208, %v6413_v26  ;;  %v6467_v35 = vadd.s32 4294967232, %v6413_v26 }
 0x2ce   : > { %v6303_v56 = vpop.permute.xlu0 %6302  ;;  %v6460_v3 = vadd.s32 4294967240, %v6413_v26  ;;  %v6530_v44 = vrot.slane %v9314_v57, %v9375_v10  ;;  %v6526_v53 = vrot.slane %v9305_v7, %v9370_v46  ;;  %v6535_v28 = vrot.slane %v9324_v30, %v9378_v52  ;;  %v6306_v30 = vpop.permute.xlu1 %6305 }
 0x2cf   : > { %v5435_v25 = vcombine.low %v5427_v22, %v5434_v27  ;;  %v9393_v60 = vsub.s32 %v6474_v54, %v7762_v42  ;;  %v9396_v23 = vsub.s32 %v6453_v21, %v7762_v42  ;;  %v6481_v62 = vadd.s32 4294967216, %v6413_v26 }
 0x2d0   : > { %v6545_v41 = vrot.slane %v9342_v55, %v9384_v18  ;;  %v9401_v39 = vsub.s32 %v6446_v45, %v7762_v42  ;;  %v6540_v7 = vrot.slane %v9332_v37, %v9381_v13  ;;  %v6531_v57 = vsel %vm6423_vm0, %v6530_v44, %v6526_v53 }
 0x2d1   : > { %6362 = vperm.xlu1 %7124, %v5435_v25   ;;  %v9407_v63 = vsub.s32 %v6467_v35, %v7762_v42  ;;  %v6495_v0 = vadd.s32 4294967200, %v6413_v26  ;;  %v6536_v50 = vsel %vm6430_vm1, %v6535_v28, %v6531_v57  ;;  %v6555_v4 = vrot.slane %v9357_v24, %v9396_v23 }
 0x2d2   : > { %v9413_v55 = vsub.s32 %v6488_v11, %v7762_v42  ;;  %v9416_v5 = vsub.s32 %v6460_v3, %v7762_v42  ;;  %v6550_v37 = vrot.slane %v9351_v59, %v9401_v39  ;;  %v6541_v36 = vsel %vm6437_vm2, %v6540_v7, %v6536_v50  ;;  %v6309_v43 = vpop.permute.xlu0 %6308  ;;  %v6312_v35 = vpop.permute.xlu1 %6311 }
 0x2d3   : > { %v9422_v22 = vsub.s32 %v6481_v62, %v7762_v42  ;;  %v6509_v27 = vadd.s32 4294967184, %v6413_v26  ;;  %v6546_v25 = vsel %vm6444_vm3, %v6545_v41, %v6541_v36  ;;  %v6565_v24 = vrot.slane %v9364_v38, %v9407_v63 }
 0x2d4   : > { %v6502_v6 = vadd.s32 4294967192, %v6413_v26  ;;  %v6560_v19 = vrot.slane %v9360_v47, %v9416_v5  ;;  %v6551_v48 = vsel %vm6451_vm4, %v6550_v37, %v6546_v25  ;;  %v9431_v59 = vsub.s32 %v6495_v0, %v7762_v42 }
 0x2d5   : > { %v6556_v54 = vsel %vm6458_vm5, %v6555_v4, %v6551_v48  ;;  %v6575_v21 = vrot.slane %v9372_v17, %v9422_v22  ;;  %v6516_v45 = vadd.s32 4294967176, %v6413_v26  ;;  %v6570_v38 = vrot.slane %v9367_v40, %v9393_v60 }
 0x2d6   : > { %v6561_v11 = vsel %vm6465_vm6, %v6560_v19, %v6556_v54  ;;  %v9440_v47 = vsub.s32 %v6509_v27, %v7762_v42  ;;  %v6585_v44 = vrot.slane %v6306_v30, %v9431_v59  ;;  %v9445_v53 = vsub.s32 %v6502_v6, %v7762_v42  ;;  %v6315_v40 = vpop.permute.xlu0 %6314  ;;  %v6318_v37 = vpop.permute.xlu1 %6317 }
 0x2d7   : > { %v6566_v3 = vsel %vm6472_vm7, %v6565_v24, %v6561_v11  ;;  %v6580_v26 = vrot.slane %v6303_v56, %v9413_v55  ;;  %v9452_v41 = vsub.s32 %v6516_v45, %v7762_v42  ;;  %v6443_v9 = vrot.slane %v9098_v61, %v9384_v18 }
 0x2d8   : > { %v6571_v17 = vsel %vm6479_vm8, %v6570_v38, %v6566_v3  ;;  %v6595_v62 = vrot.slane %v6312_v35, %v9440_v47  ;;  %v6590_v7 = vrot.slane %v6309_v43, %v9445_v53 }
 0x2d9   : > { %v6576_v28 = vsel %vm6486_vm9, %v6575_v21, %v6571_v17  ;;  %9698 = vst [vmem:[#allocation20_spill] sm:$0xff] %v9452_v41  ;;  %v6600_v56 = vrot.slane %v6315_v40, %v9452_v41 }
 0x2da   : > { %v6581_v57 = vsel %vm6493_vm10, %v6580_v26, %v6576_v28  ;;  %v6321_v42 = vpop.permute.xlu0 %6320  ;;  %v6324_v27 = vpop.permute.xlu1 %6323 }
 0x2db   : > { %v6586_v30 = vsel %vm6500_vm11, %v6585_v44, %v6581_v57 }
 0x2dc   : > { %v6591_v0 = vsel %vm6507_vm12, %v6590_v7, %v6586_v30  ;;  %v6422_v7 = vrot.slane %v9014_v58, %v9375_v10  ;;  %v6429_v30 = vrot.slane %v9043_v34, %v9378_v52  ;;  %v6450_v34 = vrot.slane %v9124_v2, %v9401_v39 }
 0x2dd   : > { %v6596_v50 = vsel %vm6514_vm13, %v6595_v62, %v6591_v0  ;;  %v6417_v0 = vrot.slane %v9198_v1, %v9370_v46  ;;  %v6609_v2 = vrot.slane %v6321_v42, %v9375_v10 }
 0x2de   : > { %v9461_v4 = vsel %vm6521_vm14, %v6600_v56, %v6596_v50  ;;  %v9463_v36 = vpop.permute.xlu0 %6326  ;;  %v6330_v43 = vpop.permute.xlu1 %6329  ;;  %v6436_v50 = vrot.slane %v9072_v20, %v9381_v13  ;;  %v6614_v20 = vrot.slane %v6324_v27, %v9378_v52  ;;  %v6471_v27 = vrot.slane %v9205_v31, %v9407_v63 }
 0x2df   : > { %9699 = vst [vmem:[#allocation21_spill] sm:$0xff] %v9461_v4  ;;  %v6424_v58 = vsel %vm6423_vm0, %v6422_v7, %v6417_v0  ;;  %v6457_v7 = vrot.slane %v9149_v8, %v9396_v23 }
 0x2e0   : > { %v6431_v1 = vsel %vm6430_vm1, %v6429_v30, %v6424_v58 }
 0x2e1   : > { %v6438_v41 = vsel %vm6437_vm2, %v6436_v50, %v6431_v1 }
 0x2e2   : > { %v9465_v25 = vpop.permute.xlu0 %6332  ;;  %v9469_v6 = vpop.permute.xlu1 %6335 }
 0x2e3   : > { %v6634_v50 = vrot.slane %v9469_v6, %v9396_v23 }
 0x2e6   : > { %v9467_v24 = vpop.permute.xlu0 %6338  ;;  %v9473_v48 = vpop.permute.xlu1 %6341 }
 0x2ea   : > { %v9471_v19 = vpop.permute.xlu0 %6344  ;;  %v6366_v21 = vpop.permute.xlu1 %6365 }
 0x2eb   : > { %v6684_v57 = vrot.slane %v6366_v21, %v9370_v46  ;;  %v6605_v21 = vrot.slane %v6318_v37, %v9370_v46 }
 0x2ee   : > { %v6369_v54 = vpop.permute.xlu0 %6368 }
 0x2ef   : > { %v6688_v33 = vrot.slane %v6369_v54, %v9375_v10  ;;  %v6624_v10 = vrot.slane %v6330_v43, %v9384_v18 }
 0x2f2   : > { %v6375_v45 = vpop.permute.xlu0 %6374 }
 0x2f3   : > { %v6698_v46 = vrot.slane %v6375_v45, %v9381_v13  ;;  %v6619_v45 = vrot.slane %v9463_v36, %v9381_v13 }
 0x2f5   : > { %v6372_v38 = vpop.permute.xlu1 %6371 }
 0x2f6   : > { %v6381_v11 = vpop.permute.xlu0 %6380  ;;  %v6693_v56 = vrot.slane %v6372_v38, %v9378_v52  ;;  %v6689_v38 = vsel %vm6423_vm0, %v6688_v33, %v6684_v57  ;;  %v6445_v33 = vsel %vm6444_vm3, %v6443_v9, %v6438_v41  ;;  %v6464_v52 = vrot.slane %v9177_v15, %v9416_v5 }
 0x2f7   : > { %v6452_v37 = vsel %vm6451_vm4, %v6450_v34, %v6445_v33  ;;  %v6708_v31 = vrot.slane %v6381_v11, %v9401_v39  ;;  %v6478_v11 = vrot.slane %v9223_v16, %v9393_v60  ;;  %v6644_v16 = vrot.slane %v9473_v48, %v9407_v63 }
 0x2f8   : > { %v6694_v54 = vsel %vm6430_vm1, %v6693_v56, %v6689_v38  ;;  %v6459_v15 = vsel %vm6458_vm5, %v6457_v7, %v6452_v37  ;;  %v6499_v38 = vrot.slane %v9260_v49, %v9431_v59  ;;  %v6639_v49 = vrot.slane %v9467_v24, %v9416_v5 }
 0x2f9   : > { %v6699_v57 = vsel %vm6437_vm2, %v6698_v46, %v6694_v54  ;;  %v6466_v30 = vsel %vm6465_vm6, %v6464_v52, %v6459_v15  ;;  %v6513_v7 = vrot.slane %v9287_v12, %v9440_v47  ;;  %v6649_v12 = vrot.slane %v9471_v19, %v9393_v60 }
 0x2fa   : > { %v6387_v3 = vpop.permute.xlu0 %6386  ;;  %v6473_v0 = vsel %vm6472_vm7, %v6471_v27, %v6466_v30  ;;  %v9702_v30 = vld [vmem:[#allocation21_spill] sm:$0xff] }
 0x2fb   : > { %v6718_v58 = vrot.slane %v6387_v3, %v9416_v5  ;;  %v6492_v3 = vrot.slane %v9251_v14, %v9413_v55 }
 0x300   : > { %v6378_v35 = vpop.permute.xlu1 %6377 }
 0x301   : > { %v6703_v32 = vrot.slane %v6378_v35, %v9384_v18  ;;  %v6610_v35 = vsel %vm6423_vm0, %v6609_v2, %v6605_v21  ;;  %v6485_v18 = vrot.slane %v9236_v51, %v9422_v22  ;;  %v6629_v51 = vrot.slane %v9465_v25, %v9401_v39 }
 0x302   : > { %v6615_v8 = vsel %vm6430_vm1, %v6614_v20, %v6610_v35  ;;  %v6480_v21 = vsel %vm6479_vm8, %v6478_v11, %v6473_v0 }
 0x303   : > { %v6704_v42 = vsel %vm6444_vm3, %v6703_v32, %v6699_v57  ;;  %v6620_v32 = vsel %vm6437_vm2, %v6619_v45, %v6615_v8  ;;  %v9701_v57 = vld [vmem:[#allocation19_spill] sm:$0xff] }
 0x304   : > { %v6709_v43 = vsel %vm6451_vm4, %v6708_v31, %v6704_v42 }
 0x305   : > { %v9475_v26 = vpop.permute.xlu0 %6392 }
 0x306   : > { %v6728_v20 = vrot.slane %v9475_v26, %v9393_v60  ;;  %v6506_v26 = vrot.slane %v9277_v29, %v9445_v53 }
 0x30a   : > { %v6384_v44 = vpop.permute.xlu1 %6383 }
 0x30b   : > { %v6713_v9 = vrot.slane %v6384_v44, %v9396_v23  ;;  %v6625_v44 = vsel %vm6444_vm3, %v6624_v10, %v6620_v32 }
 0x30c   : > { %v6630_v23 = vsel %vm6451_vm4, %v6629_v51, %v6625_v44  ;;  %v9705_v51 = vlaneseq }
 0x30d   : > { %v6714_v13 = vsel %vm6458_vm5, %v6713_v9, %v6709_v43  ;;  %v6635_v1 = vsel %vm6458_vm5, %v6634_v50, %v6630_v23  ;;  %v9703_v50 = vld [vmem:[#allocation18_spill] sm:$0xff] }
 0x30e   : > { %v6719_v6 = vsel %vm6465_vm6, %v6718_v58, %v6714_v13  ;;  %v6640_v2 = vsel %vm6465_vm6, %v6639_v49, %v6635_v1  ;;  %vm6787_vm15 = vcmp.lt.s32.totalorder %v9705_v51, 512 }
 0x30f   : > { %v9477_v17 = vpop.permute.xlu1 %6389  ;;  %v6645_v46 = vsel %vm6472_vm7, %v6644_v16, %v6640_v2 }
 0x310   : > { %v6723_v36 = vrot.slane %v9477_v17, %v9407_v63  ;;  %v6487_v17 = vsel %vm6486_vm9, %v6485_v18, %v6480_v21  ;;  %v6650_v29 = vsel %vm6479_vm8, %v6649_v12, %v6645_v46 }
 0x311   : > { %v6494_v54 = vsel %vm6493_vm10, %v6492_v3, %v6487_v17 }
 0x312   : > { %v6724_v39 = vsel %vm6472_vm7, %v6723_v36, %v6719_v6  ;;  %v6501_v48 = vsel %vm6500_vm11, %v6499_v38, %v6494_v54 }
 0x313   : > { %v6729_v63 = vsel %vm6479_vm8, %v6728_v20, %v6724_v39  ;;  %v6508_v27 = vsel %vm6507_vm12, %v6506_v26, %v6501_v48 }
 0x315   : > { %v9479_v40 = vpop.permute.xlu0 %6395 }
 0x316   : > { %v6733_v14 = vrot.slane %v9479_v40, %v9422_v22 }
 0x318   : > { %v6734_v37 = vsel %vm6486_vm9, %v6733_v14, %v6729_v63 }
 0x31a   : > { %v9481_v28 = vpop.permute.xlu1 %6347 }
 0x31b   : > { %v6654_v5 = vrot.slane %v9481_v28, %v9422_v22 }
 0x31f   : > { %v9483_v62 = vpop.permute.xlu0 %6398 }
 0x320   : > { %v6738_v33 = vrot.slane %v9483_v62, %v9413_v55  ;;  %v6515_v62 = vsel %vm6514_vm13, %v6513_v7, %v6508_v27 }
 0x322   : > { %v6739_v8 = vsel %vm6493_vm10, %v6738_v33, %v6734_v37 }
 0x324   : > { %v9498_v4 = vpop.permute.xlu1 %6350 }
 0x325   : > { %v6659_v52 = vrot.slane %v9498_v4, %v9413_v55  ;;  %v6655_v55 = vsel %vm6486_vm9, %v6654_v5, %v6650_v29 }
 0x327   : > { %v6660_v10 = vsel %vm6493_vm10, %v6659_v52, %v6655_v55 }
 0x32a   : > { %v9509_v61 = vpop.permute.xlu0 %6401 }
 0x32b   : > { %v6743_v40 = vrot.slane %v9509_v61, %v9431_v59  ;;  %v9700_v61 = vld [vmem:[#allocation20_spill] sm:$0xff] }
 0x330   : > { %v6354_v41 = vpop.permute.xlu1 %6353 }
 0x331   : > { %v6664_v22 = vrot.slane %v6354_v41, %v9431_v59  ;;  %v6520_v59 = vrot.slane %v9701_v57, %v9700_v61 }
 0x333   : > { %v6665_v9 = vsel %vm6500_vm11, %v6664_v22, %v6660_v10  ;;  %v6522_v15 = vsel %vm6521_vm14, %v6520_v59, %v6515_v62 }
 0x335   : > { %v6405_v56 = vpop.permute.xlu0 %6404 }
 0x336   : > { %v6748_v60 = vrot.slane %v6405_v56, %v9445_v53  ;;  %v6760_v56 = vcombine.low %v6522_v15, %v9702_v30 }
 0x338   : > { %v6768_v36 = vrot.slane %v6760_v56, %v9703_v50 }
 0x33c   : > { %v6357_v34 = vpop.permute.xlu1 %6356 }
 0x33d   : > { %v6669_v19 = vrot.slane %v6357_v34, %v9445_v53  ;;  %v6744_v53 = vsel %vm6500_vm11, %v6743_v40, %v6739_v8 }
 0x33f   : > { %v6670_v45 = vsel %vm6507_vm12, %v6669_v19, %v6665_v9 }
 0x340   : > { %v6408_v25 = vpop.permute.xlu0 %6407 }
 0x341   : > { %v6753_v4 = vrot.slane %v6408_v25, %v9440_v47 }
 0x346   : > { %v6360_v24 = vpop.permute.xlu1 %6359 }
 0x347   : > { %v6674_v35 = vrot.slane %v6360_v24, %v9440_v47  ;;  %v6749_v47 = vsel %vm6507_vm12, %v6748_v60, %v6744_v53 }
 0x348   : > { %v6754_v0 = vsel %vm6514_vm13, %v6753_v4, %v6749_v47 }
 0x349   : > { %v6675_v18 = vsel %vm6514_vm13, %v6674_v35, %v6670_v45 }
 0x34b   : > { %v6411_v28 = vpop.permute.xlu0 %6410 }
 0x34c   : > { %v6758_v42 = vrot.slane %v6411_v28, %v9700_v61 }
 0x34e   : > { %v6759_v32 = vsel %vm6521_vm14, %v6758_v42, %v6754_v0 }
 0x350   : > { %v6363_v41 = vpop.permute.xlu1 %6362 }
 0x351   : > { %v6679_v31 = vrot.slane %v6363_v41, %v9700_v61 }
 0x353   : > { %v6680_v43 = vsel %vm6521_vm14, %v6679_v31, %v6675_v18 }
 0x354   : > { %v6761_v44 = vcombine.low %v6680_v43, %v6759_v32 }
 0x356   : > { %v6775_v13 = vrot.slane %v6761_v44, %v9703_v50 }
 0x358   : > { %v6776_v11 = vcombine.low %v6768_v36, %v6775_v13 }
 0x35a   : > { %v6783_v58 = vrot.slane %v6776_v11, %v9703_v50 }
 0x35c   : > { %6789 = vst.msk [vmem:[%s9706_s12] sm:$0xf] %vm6787_vm15, %v6783_v58 }
 0x35d   : > { %7474 = shalt.err (!%p7471_p7)
}
 0x35e   : > { %s7475_s9 = scalar_lea.hbm %s9622_s11, 64  ;;  %s7479_s16 = scalar_lea.hbm %s9671_s4, 128 }
 0x35f   : > { %p7476_p9 = scmp.ne.s32.totalorder %s9622_s11, %s7475_s9  ;;  %p7480_p2 = scmp.lt.u32.totalorder %s9622_s11, %s9671_s4 }
 0x360   : > { %p7481_p5 = scmp.lt.u32.totalorder %s7479_s16, %s7475_s9  ;;  %p7483_p6 = scmp.lt.u32.totalorder %s7475_s9, %s9622_s11 }
 0x361   : > { %p7477_p1 = pnand %p7476_p9, %p9708_p11 }
 0x362   : > { %p7482_p8 = por %p7481_p5, %p7480_p2 }
 0x363   : > { %p7478_p10 = pneg %p7477_p1 }
 0x364   : > { %p7484_p12 = por %p7483_p6, %p7482_p8 }
 0x366   : > { %p7485_p13 = pnand %p7484_p12, %p7478_p10 }
 0x368   : > { %7488 = shalt.err (!%p7485_p13)
}
 0x369   : > { %7057 = dma.vmem_to_hbm [thread:$0]  (%p9708_p11), %s9624_s0, 64, %s9622_s11, %s6791_s19  }
 0x36a PF: > { %p7074_p0 = scmp.ge.s32.totalorder %s7537_s26, 2  ;;  %s6817_s13 = sand.u32 1, %s7525_s1  }
 0x36b   : > { %p9709_p3 = scmp.ne.s32.totalorder %s9686_s8, 0  ;;  %s6818_s6 = scalar_lea.sflag [#allocation9], %s6817_s13 }
 0x36d   : > { %p7067_p4 = pnand %p7074_p0, %p9709_p3 }
 0x36f   : > { %7520 = dma.done.wait (!%p7067_p4), %s6818_s6, 64  }
 0x370   : > { %7522 = vsyncadd (!%p7067_p4), %s6818_s6, 4294967232  ;;  %s9710_s3 = sld [smem:[#allocation17_spill]]  ;;  %p26_p7 = scmp.ge.s32.totalorder %s7608_s29, 4  }
 0x371   : > { %s9711_s1 = smov %s7529_s24  ;;  %s9712_s24 = smov %s7533_s25 }
 0x372   : > { %s9714_s26 = smov %s7608_s29  ;;  %28 = sbr.rel (!%p26_p7) target bundleno = 31 (0x1f), region = 119 }
 0x376   : > { %s9713_s25 = smov %s9710_s3 }
 0x379   :  { %6823 = vsyncpa [#allocation8], 1 }
 0x37a   :  { %6825 = vsyncpa [#allocation8 + $0x1], 1 }
 0x37b   :  { %6826 = vsyncpa [#allocation11], 1 }
 0x37c   :  { %6827 = vsyncpa [#allocation9], 1 }
 0x37d   :  { %6829 = vsyncpa [#allocation9 + $0x1], 1 }

</bundles_post_ra>
